<compile_context>
chip_gen: v5e
topology: v5e:2x2
jax: 0.10.0
libtpu: 0.0.40
codegen_flags: <defaults>
</compile_context>

<pallas_src>
import functools

import jax
import jax.numpy as jnp
import numpy as np
from jax.experimental import pallas as pl
from jax.experimental.pallas import tpu as pltpu


def _warp_kernel(klo_ref, khi_ref, locs_ref, src_ref, out_ref, acc_ref,
                 *, D, H, W, TK):
    n = pl.program_id(0)
    m = pl.program_id(1)
    k = pl.program_id(2)
    nk = pl.num_programs(2)

    @pl.when(k == 0)
    def _init():
        acc_ref[...] = jnp.zeros_like(acc_ref)

    # Skip k-tiles that cannot contain any of this row-tile's 8 corners.
    @pl.when((k >= klo_ref[n, m]) & (k <= khi_ref[n, m]))
    def _compute():
        TM = locs_ref.shape[2]
        locs = locs_ref[0]                       # (3, TM) f32, lane-dense
        z = locs[0:1, :]
        y = locs[1:2, :]
        x = locs[2:3, :]
        z0 = jnp.floor(z); fz = z - z0
        y0 = jnp.floor(y); fy = y - y0
        x0 = jnp.floor(x); fx = x - x0

        rows = jax.lax.broadcasted_iota(jnp.int32, (TK, TM), 0) + k * TK
        slab = jnp.zeros((TK, TM), jnp.float32)  # single slab, accumulated
        for dz in (0, 1):
            zi = z0 + dz
            wz = fz if dz else 1.0 - fz
            vz = (zi >= 0.0) & (zi <= D - 1.0)
            zc = jnp.clip(zi, 0.0, D - 1.0).astype(jnp.int32)
            for dy in (0, 1):
                yi = y0 + dy
                wy = fy if dy else 1.0 - fy
                vy = (yi >= 0.0) & (yi <= H - 1.0)
                yc = jnp.clip(yi, 0.0, H - 1.0).astype(jnp.int32)
                for dx in (0, 1):
                    xi = x0 + dx
                    wx = fx if dx else 1.0 - fx
                    vx = (xi >= 0.0) & (xi <= W - 1.0)
                    xc = jnp.clip(xi, 0.0, W - 1.0).astype(jnp.int32)
                    w = wz * wy * wx * (vz & vy & vx).astype(jnp.float32)
                    idx = zc * (H * W) + yc * W + xc          # (1, TM) int32
                    slab = slab + w * (idx == rows).astype(jnp.float32)

        acc_ref[...] += jnp.dot(src_ref[0].astype(jnp.float32), slab,
                                preferred_element_type=jnp.float32)

    @pl.when(k == nk - 1)
    def _finalize():
        out_ref[0] = acc_ref[...].astype(out_ref.dtype)


def spatial_transformer(src, flow, *, tile_m=256, tile_k=256):
    """src: (N, C, D, H, W), flow: (N, 3, D, H, W) -> (N, C, D, H, W)."""
    N, C, D, H, W = src.shape
    assert flow.shape == (N, 3, D, H, W)
    S = D * H * W
    HW = H * W

    TM = int(tile_m)
    TK = int(tile_k)
    num_m = pl.cdiv(S, TM)
    num_k = pl.cdiv(S, TK)
    Sm = num_m * TM        # padded output-point axis
    Sk = num_k * TK        # padded source axis

    # identity grid (d, h, w), channels-first flattened: (3, S)
    gd, gh, gw = jnp.meshgrid(jnp.arange(D), jnp.arange(H), jnp.arange(W),
                              indexing="ij")
    grid = jnp.stack([gd, gh, gw]).reshape(3, S).astype(jnp.float32)

    # Sampling locations in voxel coordinates (normalize/denormalize under
    # align_corners=True is the identity, so it is dropped).
    locs = flow.reshape(N, 3, S).astype(jnp.float32) + grid[None]
    if Sm != S:
        locs = jnp.pad(locs, ((0, 0), (0, 0), (0, Sm - S)))

    src_cf = src.reshape(N, C, S)                  # free reshape from NCDHW
    if Sk != S:
        src_cf = jnp.pad(src_cf, ((0, 0), (0, 0), (0, Sk - S)))

    # Per (batch, row-tile) band of source k-tiles touched by the 8 corners.
    z0 = jnp.floor(locs[:, 0])
    y0 = jnp.floor(locs[:, 1])
    x0 = jnp.floor(locs[:, 2])

    def _flat(zc, yc, xc):
        return (jnp.clip(zc, 0, D - 1).astype(jnp.int32) * HW
                + jnp.clip(yc, 0, H - 1).astype(jnp.int32) * W
                + jnp.clip(xc, 0, W - 1).astype(jnp.int32))

    idx_lo = _flat(z0, y0, x0)                     # (N, Sm)
    idx_hi = _flat(z0 + 1, y0 + 1, x0 + 1)
    klo = (idx_lo.reshape(N, num_m, TM).min(axis=-1) // TK).astype(jnp.int32)
    khi = (idx_hi.reshape(N, num_m, TM).max(axis=-1) // TK).astype(jnp.int32)

    kernel = functools.partial(_warp_kernel, D=D, H=H, W=W, TK=TK)
    out_cf = pl.pallas_call(
        kernel,
        out_shape=jax.ShapeDtypeStruct((N, C, Sm), src.dtype),
        grid_spec=pltpu.PrefetchScalarGridSpec(
            num_scalar_prefetch=2,
            grid=(N, num_m, num_k),
            in_specs=[
                # locs tile: resident across the whole k loop (no re-DMA)
                pl.BlockSpec((1, 3, TM),
                             lambda n, m, k, klo_r, khi_r: (n, 0, m)),
                # src k-tile: clip to the active band so skipped k steps do
                # not trigger fresh DMAs
                pl.BlockSpec(
                    (1, C, TK),
                    lambda n, m, k, klo_r, khi_r:
                        (n, 0, jnp.clip(k, klo_r[n, m], khi_r[n, m]))),
            ],
            out_specs=pl.BlockSpec((1, C, TM),
                                   lambda n, m, k, klo_r, khi_r: (n, 0, m)),
            scratch_shapes=[pltpu.VMEM((C, TM), jnp.float32)],
        ),
        compiler_params=pltpu.CompilerParams(
            dimension_semantics=("parallel", "parallel", "arbitrary"),
            vmem_limit_bytes=32 * 1024 * 1024),
    )(klo, khi, locs, src_cf)

    return out_cf[:, :, :S].reshape(N, C, D, H, W)


def spatial_transformer_ref(src, flow):
    """Pure-JAX reference (trilinear grid_sample, align_corners=True, zeros)."""
    N, C, D, H, W = src.shape
    gd, gh, gw = jnp.meshgrid(jnp.arange(D), jnp.arange(H), jnp.arange(W),
                              indexing="ij")
    grid = jnp.stack([gd, gh, gw]).astype(jnp.float32)       # (3, D, H, W)

    def one(src_n, flow_n):
        new = flow_n + grid
        z, y, x = new[0], new[1], new[2]
        z0, y0, x0 = jnp.floor(z), jnp.floor(y), jnp.floor(x)
        acc = jnp.zeros((C, D, H, W), jnp.float32)
        for dz in (0, 1):
            for dy in (0, 1):
                for dx in (0, 1):
                    zi, yi, xi = z0 + dz, y0 + dy, x0 + dx
                    wz = (z - z0) if dz else (1.0 - (z - z0))
                    wy = (y - y0) if dy else (1.0 - (y - y0))
                    wx = (x - x0) if dx else (1.0 - (x - x0))
                    valid = ((zi >= 0) & (zi <= D - 1) & (yi >= 0) &
                             (yi <= H - 1) & (xi >= 0) & (xi <= W - 1))
                    zc = jnp.clip(zi, 0, D - 1).astype(jnp.int32)
                    yc = jnp.clip(yi, 0, H - 1).astype(jnp.int32)
                    xc = jnp.clip(xi, 0, W - 1).astype(jnp.int32)
                    vals = src_n[:, zc, yc, xc]
                    acc = acc + (wz * wy * wx * valid)[None] * vals
        return acc.astype(src_n.dtype)

    return jax.vmap(one)(src.astype(jnp.float32), flow.astype(jnp.float32))


if __name__ == "__main__":
    key = jax.random.PRNGKey(0)
    k1, k2 = jax.random.split(key)
    N, C, D, H, W = 2, 4, 8, 8, 8
    src = jax.random.normal(k1, (N, C, D, H, W), jnp.float32)
    flow = jax.random.normal(k2, (N, 3, D, H, W), jnp.float32) * 2.0

    out = jax.block_until_ready(spatial_transformer(src, flow))
    ref = jax.block_until_ready(spatial_transformer_ref(src, flow))
    np.testing.assert_allclose(np.asarray(out), np.asarray(ref),
                               atol=1e-4, rtol=1e-4)
    print("KERNEL_OK")
</pallas_src>

<mosaic_0001>
module attributes {stable_mosaic.version = 11 : i64} {
  func.func @_warp_kernel(%arg0: i32, %arg1: i32, %arg2: i32, %arg3: memref<2x2xi32, #tpu.memory_space<smem>>, %arg4: memref<2x2xi32, #tpu.memory_space<smem>>, %arg5: memref<1x3x256xf32, #tpu.memory_space<vmem>>, %arg6: memref<1x4x256xf32, #tpu.memory_space<vmem>>, %arg7: memref<1x4x256xf32, #tpu.memory_space<vmem>>, %arg8: memref<4x256xf32, #tpu.memory_space<vmem>>) attributes {dimension_semantics = [#tpu.dimension_semantics<parallel>, #tpu.dimension_semantics<parallel>, #tpu.dimension_semantics<arbitrary>], iteration_bounds = array<i64: 2, 2, 2>, scalar_prefetch = 2 : i64, scratch_operands = 1 : i64, tpu.core_type = #tpu.core_type<tc>, window_params = [{transform_indices = @transform_0, window_bounds = array<i64: 1, 3, 256>}, {transform_indices = @transform_1, window_bounds = array<i64: 1, 4, 256>}, {transform_indices = @transform_2, window_bounds = array<i64: 1, 4, 256>}]} {
    %c0_i32 = arith.constant 0 : i32
    %0 = arith.cmpi eq, %arg2, %c0_i32 : i32
    %1 = arith.extui %0 : i1 to i32
    %c0_i32_0 = arith.constant 0 : i32
    %2 = arith.cmpi ne, %1, %c0_i32_0 : i32
    scf.if %2 {
      %cst = arith.constant 0.000000e+00 : f32
      %17 = vector.broadcast %cst : f32 to vector<4x256xf32>
      %c0 = arith.constant 0 : index
      %c0_3 = arith.constant 0 : index
      %18 = vector.load %arg8[%c0, %c0_3] : memref<4x256xf32, #tpu.memory_space<vmem>>, vector<4x256xf32>
      tpu.vector_store %arg8[%c0, %c0_3], %17 {strides = array<i32>} : memref<4x256xf32, #tpu.memory_space<vmem>>, vector<4x256xf32>,
    } else {
    }
    %3 = arith.index_cast %arg0 : i32 to index
    %4 = arith.index_cast %arg1 : i32 to index
    %5 = memref.load %arg3[%3, %4] : memref<2x2xi32, #tpu.memory_space<smem>>
    %6 = arith.cmpi sge, %arg2, %5 : i32
    %7 = arith.index_cast %arg0 : i32 to index
    %8 = arith.index_cast %arg1 : i32 to index
    %9 = memref.load %arg4[%7, %8] : memref<2x2xi32, #tpu.memory_space<smem>>
    %10 = arith.cmpi sle, %arg2, %9 : i32
    %11 = arith.andi %6, %10 : i1
    %12 = arith.extui %11 : i1 to i32
    %c0_i32_1 = arith.constant 0 : i32
    %13 = arith.cmpi ne, %12, %c0_i32_1 : i32
    scf.if %13 {
      %c0 = arith.constant 0 : index
      %c0_3 = arith.constant 0 : index
      %c0_4 = arith.constant 0 : index
      %17 = vector.load %arg5[%c0, %c0_3, %c0_4] : memref<1x3x256xf32, #tpu.memory_space<vmem>>, vector<1x3x256xf32>
      %18 = vector.shape_cast %17 : vector<1x3x256xf32> to vector<3x256xf32>
      %19 = vector.extract_strided_slice %18 {offsets = [0, 0], sizes = [1, 256], strides = [1, 1]} : vector<3x256xf32> to vector<1x256xf32>
      %20 = vector.extract_strided_slice %18 {offsets = [1, 0], sizes = [1, 256], strides = [1, 1]} : vector<3x256xf32> to vector<1x256xf32>
      %21 = vector.extract_strided_slice %18 {offsets = [2, 0], sizes = [1, 256], strides = [1, 1]} : vector<3x256xf32> to vector<1x256xf32>
      %22 = math.floor %19 : vector<1x256xf32>
      %23 = arith.subf %19, %22 : vector<1x256xf32>
      %24 = math.floor %20 : vector<1x256xf32>
      %25 = arith.subf %20, %24 : vector<1x256xf32>
      %26 = math.floor %21 : vector<1x256xf32>
      %27 = arith.subf %21, %26 : vector<1x256xf32>
      %28 = tpu.iota {dimensions = array<i32: 0>} : vector<256x256xi32>
      %c256_i32 = arith.constant 256 : i32
      %29 = arith.muli %arg2, %c256_i32 : i32
      %30 = vector.broadcast %29 : i32 to vector<256x256xi32>
      %31 = arith.addi %28, %30 : vector<256x256xi32>
      %cst = arith.constant 0.000000e+00 : f32
      %32 = vector.broadcast %cst : f32 to vector<256x256xf32>
      %cst_5 = arith.constant 0.000000e+00 : f32
      %33 = vector.broadcast %cst_5 : f32 to vector<1x256xf32>
      %34 = arith.addf %22, %33 : vector<1x256xf32>
      %cst_6 = arith.constant 1.000000e+00 : f32
      %35 = vector.broadcast %cst_6 : f32 to vector<1x256xf32>
      %36 = arith.subf %35, %23 : vector<1x256xf32>
      %cst_7 = arith.constant 0.000000e+00 : f32
      %37 = vector.broadcast %cst_7 : f32 to vector<1x256xf32>
      %38 = arith.cmpf oge, %34, %37 : vector<1x256xf32>
      %cst_8 = arith.constant 7.000000e+00 : f32
      %39 = vector.broadcast %cst_8 : f32 to vector<1x256xf32>
      %40 = arith.cmpf ole, %34, %39 : vector<1x256xf32>
      %41 = arith.andi %38, %40 : vector<1x256xi1>
      %cst_9 = arith.constant 0.000000e+00 : f32
      %cst_10 = arith.constant 7.000000e+00 : f32
      %42 = vector.broadcast %cst_9 : f32 to vector<1x256xf32>
      %43 = arith.maximumf %42, %34 : vector<1x256xf32>
      %44 = vector.broadcast %cst_10 : f32 to vector<1x256xf32>
      %45 = arith.minimumf %44, %43 : vector<1x256xf32>
      %46 = arith.fptosi %45 : vector<1x256xf32> to vector<1x256xi32>
      %cst_11 = arith.constant 0.000000e+00 : f32
      %47 = vector.broadcast %cst_11 : f32 to vector<1x256xf32>
      %48 = arith.addf %24, %47 : vector<1x256xf32>
      %cst_12 = arith.constant 1.000000e+00 : f32
      %49 = vector.broadcast %cst_12 : f32 to vector<1x256xf32>
      %50 = arith.subf %49, %25 : vector<1x256xf32>
      %cst_13 = arith.constant 0.000000e+00 : f32
      %51 = vector.broadcast %cst_13 : f32 to vector<1x256xf32>
      %52 = arith.cmpf oge, %48, %51 : vector<1x256xf32>
      %cst_14 = arith.constant 7.000000e+00 : f32
      %53 = vector.broadcast %cst_14 : f32 to vector<1x256xf32>
      %54 = arith.cmpf ole, %48, %53 : vector<1x256xf32>
      %55 = arith.andi %52, %54 : vector<1x256xi1>
      %cst_15 = arith.constant 0.000000e+00 : f32
      %cst_16 = arith.constant 7.000000e+00 : f32
      %56 = vector.broadcast %cst_15 : f32 to vector<1x256xf32>
      %57 = arith.maximumf %56, %48 : vector<1x256xf32>
      %58 = vector.broadcast %cst_16 : f32 to vector<1x256xf32>
      %59 = arith.minimumf %58, %57 : vector<1x256xf32>
      %60 = arith.fptosi %59 : vector<1x256xf32> to vector<1x256xi32>
      %cst_17 = arith.constant 0.000000e+00 : f32
      %61 = vector.broadcast %cst_17 : f32 to vector<1x256xf32>
      %62 = arith.addf %26, %61 : vector<1x256xf32>
      %cst_18 = arith.constant 1.000000e+00 : f32
      %63 = vector.broadcast %cst_18 : f32 to vector<1x256xf32>
      %64 = arith.subf %63, %27 : vector<1x256xf32>
      %cst_19 = arith.constant 0.000000e+00 : f32
      %65 = vector.broadcast %cst_19 : f32 to vector<1x256xf32>
      %66 = arith.cmpf oge, %62, %65 : vector<1x256xf32>
      %cst_20 = arith.constant 7.000000e+00 : f32
      %67 = vector.broadcast %cst_20 : f32 to vector<1x256xf32>
      %68 = arith.cmpf ole, %62, %67 : vector<1x256xf32>
      %69 = arith.andi %66, %68 : vector<1x256xi1>
      %cst_21 = arith.constant 0.000000e+00 : f32
      %cst_22 = arith.constant 7.000000e+00 : f32
      %70 = vector.broadcast %cst_21 : f32 to vector<1x256xf32>
      %71 = arith.maximumf %70, %62 : vector<1x256xf32>
      %72 = vector.broadcast %cst_22 : f32 to vector<1x256xf32>
      %73 = arith.minimumf %72, %71 : vector<1x256xf32>
      %74 = arith.fptosi %73 : vector<1x256xf32> to vector<1x256xi32>
      %75 = arith.mulf %36, %50 : vector<1x256xf32>
      %76 = arith.mulf %75, %64 : vector<1x256xf32>
      %77 = arith.andi %41, %55 : vector<1x256xi1>
      %78 = arith.andi %77, %69 : vector<1x256xi1>
      %79 = arith.extui %78 : vector<1x256xi1> to vector<1x256xi32>
      %80 = arith.sitofp %79 : vector<1x256xi32> to vector<1x256xf32>
      %81 = arith.mulf %76, %80 : vector<1x256xf32>
      %c64_i32 = arith.constant 64 : i32
      %82 = vector.broadcast %c64_i32 : i32 to vector<1x256xi32>
      %83 = arith.muli %46, %82 : vector<1x256xi32>
      %c8_i32 = arith.constant 8 : i32
      %84 = vector.broadcast %c8_i32 : i32 to vector<1x256xi32>
      %85 = arith.muli %60, %84 : vector<1x256xi32>
      %86 = arith.addi %83, %85 : vector<1x256xi32>
      %87 = arith.addi %86, %74 : vector<1x256xi32>
      %88 = vector.broadcast %87 : vector<1x256xi32> to vector<256x256xi32>
      %89 = arith.cmpi eq, %88, %31 : vector<256x256xi32>
      %90 = arith.extui %89 : vector<256x256xi1> to vector<256x256xi32>
      %91 = arith.sitofp %90 : vector<256x256xi32> to vector<256x256xf32>
      %92 = vector.broadcast %81 : vector<1x256xf32> to vector<256x256xf32>
      %93 = arith.mulf %92, %91 : vector<256x256xf32>
      %94 = arith.addf %32, %93 : vector<256x256xf32>
      %cst_23 = arith.constant 1.000000e+00 : f32
      %95 = vector.broadcast %cst_23 : f32 to vector<1x256xf32>
      %96 = arith.addf %26, %95 : vector<1x256xf32>
      %cst_24 = arith.constant 0.000000e+00 : f32
      %97 = vector.broadcast %cst_24 : f32 to vector<1x256xf32>
      %98 = arith.cmpf oge, %96, %97 : vector<1x256xf32>
      %cst_25 = arith.constant 7.000000e+00 : f32
      %99 = vector.broadcast %cst_25 : f32 to vector<1x256xf32>
      %100 = arith.cmpf ole, %96, %99 : vector<1x256xf32>
      %101 = arith.andi %98, %100 : vector<1x256xi1>
      %cst_26 = arith.constant 0.000000e+00 : f32
      %cst_27 = arith.constant 7.000000e+00 : f32
      %102 = vector.broadcast %cst_26 : f32 to vector<1x256xf32>
      %103 = arith.maximumf %102, %96 : vector<1x256xf32>
      %104 = vector.broadcast %cst_27 : f32 to vector<1x256xf32>
      %105 = arith.minimumf %104, %103 : vector<1x256xf32>
      %106 = arith.fptosi %105 : vector<1x256xf32> to vector<1x256xi32>
      %107 = arith.mulf %36, %50 : vector<1x256xf32>
      %108 = arith.mulf %107, %27 : vector<1x256xf32>
      %109 = arith.andi %41, %55 : vector<1x256xi1>
      %110 = arith.andi %109, %101 : vector<1x256xi1>
      %111 = arith.extui %110 : vector<1x256xi1> to vector<1x256xi32>
      %112 = arith.sitofp %111 : vector<1x256xi32> to vector<1x256xf32>
      %113 = arith.mulf %108, %112 : vector<1x256xf32>
      %c64_i32_28 = arith.constant 64 : i32
      %114 = vector.broadcast %c64_i32_28 : i32 to vector<1x256xi32>
      %115 = arith.muli %46, %114 : vector<1x256xi32>
      %c8_i32_29 = arith.constant 8 : i32
      %116 = vector.broadcast %c8_i32_29 : i32 to vector<1x256xi32>
      %117 = arith.muli %60, %116 : vector<1x256xi32>
      %118 = arith.addi %115, %117 : vector<1x256xi32>
      %119 = arith.addi %118, %106 : vector<1x256xi32>
      %120 = vector.broadcast %119 : vector<1x256xi32> to vector<256x256xi32>
      %121 = arith.cmpi eq, %120, %31 : vector<256x256xi32>
      %122 = arith.extui %121 : vector<256x256xi1> to vector<256x256xi32>
      %123 = arith.sitofp %122 : vector<256x256xi32> to vector<256x256xf32>
      %124 = vector.broadcast %113 : vector<1x256xf32> to vector<256x256xf32>
      %125 = arith.mulf %124, %123 : vector<256x256xf32>
      %126 = arith.addf %94, %125 : vector<256x256xf32>
      %cst_30 = arith.constant 1.000000e+00 : f32
      %127 = vector.broadcast %cst_30 : f32 to vector<1x256xf32>
      %128 = arith.addf %24, %127 : vector<1x256xf32>
      %cst_31 = arith.constant 0.000000e+00 : f32
      %129 = vector.broadcast %cst_31 : f32 to vector<1x256xf32>
      %130 = arith.cmpf oge, %128, %129 : vector<1x256xf32>
      %cst_32 = arith.constant 7.000000e+00 : f32
      %131 = vector.broadcast %cst_32 : f32 to vector<1x256xf32>
      %132 = arith.cmpf ole, %128, %131 : vector<1x256xf32>
      %133 = arith.andi %130, %132 : vector<1x256xi1>
      %cst_33 = arith.constant 0.000000e+00 : f32
      %cst_34 = arith.constant 7.000000e+00 : f32
      %134 = vector.broadcast %cst_33 : f32 to vector<1x256xf32>
      %135 = arith.maximumf %134, %128 : vector<1x256xf32>
      %136 = vector.broadcast %cst_34 : f32 to vector<1x256xf32>
      %137 = arith.minimumf %136, %135 : vector<1x256xf32>
      %138 = arith.fptosi %137 : vector<1x256xf32> to vector<1x256xi32>
      %cst_35 = arith.constant 0.000000e+00 : f32
      %139 = vector.broadcast %cst_35 : f32 to vector<1x256xf32>
      %140 = arith.addf %26, %139 : vector<1x256xf32>
      %cst_36 = arith.constant 1.000000e+00 : f32
      %141 = vector.broadcast %cst_36 : f32 to vector<1x256xf32>
      %142 = arith.subf %141, %27 : vector<1x256xf32>
      %cst_37 = arith.constant 0.000000e+00 : f32
      %143 = vector.broadcast %cst_37 : f32 to vector<1x256xf32>
      %144 = arith.cmpf oge, %140, %143 : vector<1x256xf32>
      %cst_38 = arith.constant 7.000000e+00 : f32
      %145 = vector.broadcast %cst_38 : f32 to vector<1x256xf32>
      %146 = arith.cmpf ole, %140, %145 : vector<1x256xf32>
      %147 = arith.andi %144, %146 : vector<1x256xi1>
      %cst_39 = arith.constant 0.000000e+00 : f32
      %cst_40 = arith.constant 7.000000e+00 : f32
      %148 = vector.broadcast %cst_39 : f32 to vector<1x256xf32>
      %149 = arith.maximumf %148, %140 : vector<1x256xf32>
      %150 = vector.broadcast %cst_40 : f32 to vector<1x256xf32>
      %151 = arith.minimumf %150, %149 : vector<1x256xf32>
      %152 = arith.fptosi %151 : vector<1x256xf32> to vector<1x256xi32>
      %153 = arith.mulf %36, %25 : vector<1x256xf32>
      %154 = arith.mulf %153, %142 : vector<1x256xf32>
      %155 = arith.andi %41, %133 : vector<1x256xi1>
      %156 = arith.andi %155, %147 : vector<1x256xi1>
      %157 = arith.extui %156 : vector<1x256xi1> to vector<1x256xi32>
      %158 = arith.sitofp %157 : vector<1x256xi32> to vector<1x256xf32>
      %159 = arith.mulf %154, %158 : vector<1x256xf32>
      %c64_i32_41 = arith.constant 64 : i32
      %160 = vector.broadcast %c64_i32_41 : i32 to vector<1x256xi32>
      %161 = arith.muli %46, %160 : vector<1x256xi32>
      %c8_i32_42 = arith.constant 8 : i32
      %162 = vector.broadcast %c8_i32_42 : i32 to vector<1x256xi32>
      %163 = arith.muli %138, %162 : vector<1x256xi32>
      %164 = arith.addi %161, %163 : vector<1x256xi32>
      %165 = arith.addi %164, %152 : vector<1x256xi32>
      %166 = vector.broadcast %165 : vector<1x256xi32> to vector<256x256xi32>
      %167 = arith.cmpi eq, %166, %31 : vector<256x256xi32>
      %168 = arith.extui %167 : vector<256x256xi1> to vector<256x256xi32>
      %169 = arith.sitofp %168 : vector<256x256xi32> to vector<256x256xf32>
      %170 = vector.broadcast %159 : vector<1x256xf32> to vector<256x256xf32>
      %171 = arith.mulf %170, %169 : vector<256x256xf32>
      %172 = arith.addf %126, %171 : vector<256x256xf32>
      %cst_43 = arith.constant 1.000000e+00 : f32
      %173 = vector.broadcast %cst_43 : f32 to vector<1x256xf32>
      %174 = arith.addf %26, %173 : vector<1x256xf32>
      %cst_44 = arith.constant 0.000000e+00 : f32
      %175 = vector.broadcast %cst_44 : f32 to vector<1x256xf32>
      %176 = arith.cmpf oge, %174, %175 : vector<1x256xf32>
      %cst_45 = arith.constant 7.000000e+00 : f32
      %177 = vector.broadcast %cst_45 : f32 to vector<1x256xf32>
      %178 = arith.cmpf ole, %174, %177 : vector<1x256xf32>
      %179 = arith.andi %176, %178 : vector<1x256xi1>
      %cst_46 = arith.constant 0.000000e+00 : f32
      %cst_47 = arith.constant 7.000000e+00 : f32
      %180 = vector.broadcast %cst_46 : f32 to vector<1x256xf32>
      %181 = arith.maximumf %180, %174 : vector<1x256xf32>
      %182 = vector.broadcast %cst_47 : f32 to vector<1x256xf32>
      %183 = arith.minimumf %182, %181 : vector<1x256xf32>
      %184 = arith.fptosi %183 : vector<1x256xf32> to vector<1x256xi32>
      %185 = arith.mulf %36, %25 : vector<1x256xf32>
      %186 = arith.mulf %185, %27 : vector<1x256xf32>
      %187 = arith.andi %41, %133 : vector<1x256xi1>
      %188 = arith.andi %187, %179 : vector<1x256xi1>
      %189 = arith.extui %188 : vector<1x256xi1> to vector<1x256xi32>
      %190 = arith.sitofp %189 : vector<1x256xi32> to vector<1x256xf32>
      %191 = arith.mulf %186, %190 : vector<1x256xf32>
      %c64_i32_48 = arith.constant 64 : i32
      %192 = vector.broadcast %c64_i32_48 : i32 to vector<1x256xi32>
      %193 = arith.muli %46, %192 : vector<1x256xi32>
      %c8_i32_49 = arith.constant 8 : i32
      %194 = vector.broadcast %c8_i32_49 : i32 to vector<1x256xi32>
      %195 = arith.muli %138, %194 : vector<1x256xi32>
      %196 = arith.addi %193, %195 : vector<1x256xi32>
      %197 = arith.addi %196, %184 : vector<1x256xi32>
      %198 = vector.broadcast %197 : vector<1x256xi32> to vector<256x256xi32>
      %199 = arith.cmpi eq, %198, %31 : vector<256x256xi32>
      %200 = arith.extui %199 : vector<256x256xi1> to vector<256x256xi32>
      %201 = arith.sitofp %200 : vector<256x256xi32> to vector<256x256xf32>
      %202 = vector.broadcast %191 : vector<1x256xf32> to vector<256x256xf32>
      %203 = arith.mulf %202, %201 : vector<256x256xf32>
      %204 = arith.addf %172, %203 : vector<256x256xf32>
      %cst_50 = arith.constant 1.000000e+00 : f32
      %205 = vector.broadcast %cst_50 : f32 to vector<1x256xf32>
      %206 = arith.addf %22, %205 : vector<1x256xf32>
      %cst_51 = arith.constant 0.000000e+00 : f32
      %207 = vector.broadcast %cst_51 : f32 to vector<1x256xf32>
      %208 = arith.cmpf oge, %206, %207 : vector<1x256xf32>
      %cst_52 = arith.constant 7.000000e+00 : f32
      %209 = vector.broadcast %cst_52 : f32 to vector<1x256xf32>
      %210 = arith.cmpf ole, %206, %209 : vector<1x256xf32>
      %211 = arith.andi %208, %210 : vector<1x256xi1>
      %cst_53 = arith.constant 0.000000e+00 : f32
      %cst_54 = arith.constant 7.000000e+00 : f32
      %212 = vector.broadcast %cst_53 : f32 to vector<1x256xf32>
      %213 = arith.maximumf %212, %206 : vector<1x256xf32>
      %214 = vector.broadcast %cst_54 : f32 to vector<1x256xf32>
      %215 = arith.minimumf %214, %213 : vector<1x256xf32>
      %216 = arith.fptosi %215 : vector<1x256xf32> to vector<1x256xi32>
      %cst_55 = arith.constant 0.000000e+00 : f32
      %217 = vector.broadcast %cst_55 : f32 to vector<1x256xf32>
      %218 = arith.addf %24, %217 : vector<1x256xf32>
      %cst_56 = arith.constant 1.000000e+00 : f32
      %219 = vector.broadcast %cst_56 : f32 to vector<1x256xf32>
      %220 = arith.subf %219, %25 : vector<1x256xf32>
      %cst_57 = arith.constant 0.000000e+00 : f32
      %221 = vector.broadcast %cst_57 : f32 to vector<1x256xf32>
      %222 = arith.cmpf oge, %218, %221 : vector<1x256xf32>
      %cst_58 = arith.constant 7.000000e+00 : f32
      %223 = vector.broadcast %cst_58 : f32 to vector<1x256xf32>
      %224 = arith.cmpf ole, %218, %223 : vector<1x256xf32>
      %225 = arith.andi %222, %224 : vector<1x256xi1>
      %cst_59 = arith.constant 0.000000e+00 : f32
      %cst_60 = arith.constant 7.000000e+00 : f32
      %226 = vector.broadcast %cst_59 : f32 to vector<1x256xf32>
      %227 = arith.maximumf %226, %218 : vector<1x256xf32>
      %228 = vector.broadcast %cst_60 : f32 to vector<1x256xf32>
      %229 = arith.minimumf %228, %227 : vector<1x256xf32>
      %230 = arith.fptosi %229 : vector<1x256xf32> to vector<1x256xi32>
      %cst_61 = arith.constant 0.000000e+00 : f32
      %231 = vector.broadcast %cst_61 : f32 to vector<1x256xf32>
      %232 = arith.addf %26, %231 : vector<1x256xf32>
      %cst_62 = arith.constant 1.000000e+00 : f32
      %233 = vector.broadcast %cst_62 : f32 to vector<1x256xf32>
      %234 = arith.subf %233, %27 : vector<1x256xf32>
      %cst_63 = arith.constant 0.000000e+00 : f32
      %235 = vector.broadcast %cst_63 : f32 to vector<1x256xf32>
      %236 = arith.cmpf oge, %232, %235 : vector<1x256xf32>
      %cst_64 = arith.constant 7.000000e+00 : f32
      %237 = vector.broadcast %cst_64 : f32 to vector<1x256xf32>
      %238 = arith.cmpf ole, %232, %237 : vector<1x256xf32>
      %239 = arith.andi %236, %238 : vector<1x256xi1>
      %cst_65 = arith.constant 0.000000e+00 : f32
      %cst_66 = arith.constant 7.000000e+00 : f32
      %240 = vector.broadcast %cst_65 : f32 to vector<1x256xf32>
      %241 = arith.maximumf %240, %232 : vector<1x256xf32>
      %242 = vector.broadcast %cst_66 : f32 to vector<1x256xf32>
      %243 = arith.minimumf %242, %241 : vector<1x256xf32>
      %244 = arith.fptosi %243 : vector<1x256xf32> to vector<1x256xi32>
      %245 = arith.mulf %23, %220 : vector<1x256xf32>
      %246 = arith.mulf %245, %234 : vector<1x256xf32>
      %247 = arith.andi %211, %225 : vector<1x256xi1>
      %248 = arith.andi %247, %239 : vector<1x256xi1>
      %249 = arith.extui %248 : vector<1x256xi1> to vector<1x256xi32>
      %250 = arith.sitofp %249 : vector<1x256xi32> to vector<1x256xf32>
      %251 = arith.mulf %246, %250 : vector<1x256xf32>
      %c64_i32_67 = arith.constant 64 : i32
      %252 = vector.broadcast %c64_i32_67 : i32 to vector<1x256xi32>
      %253 = arith.muli %216, %252 : vector<1x256xi32>
      %c8_i32_68 = arith.constant 8 : i32
      %254 = vector.broadcast %c8_i32_68 : i32 to vector<1x256xi32>
      %255 = arith.muli %230, %254 : vector<1x256xi32>
      %256 = arith.addi %253, %255 : vector<1x256xi32>
      %257 = arith.addi %256, %244 : vector<1x256xi32>
      %258 = vector.broadcast %257 : vector<1x256xi32> to vector<256x256xi32>
      %259 = arith.cmpi eq, %258, %31 : vector<256x256xi32>
      %260 = arith.extui %259 : vector<256x256xi1> to vector<256x256xi32>
      %261 = arith.sitofp %260 : vector<256x256xi32> to vector<256x256xf32>
      %262 = vector.broadcast %251 : vector<1x256xf32> to vector<256x256xf32>
      %263 = arith.mulf %262, %261 : vector<256x256xf32>
      %264 = arith.addf %204, %263 : vector<256x256xf32>
      %cst_69 = arith.constant 1.000000e+00 : f32
      %265 = vector.broadcast %cst_69 : f32 to vector<1x256xf32>
      %266 = arith.addf %26, %265 : vector<1x256xf32>
      %cst_70 = arith.constant 0.000000e+00 : f32
      %267 = vector.broadcast %cst_70 : f32 to vector<1x256xf32>
      %268 = arith.cmpf oge, %266, %267 : vector<1x256xf32>
      %cst_71 = arith.constant 7.000000e+00 : f32
      %269 = vector.broadcast %cst_71 : f32 to vector<1x256xf32>
      %270 = arith.cmpf ole, %266, %269 : vector<1x256xf32>
      %271 = arith.andi %268, %270 : vector<1x256xi1>
      %cst_72 = arith.constant 0.000000e+00 : f32
      %cst_73 = arith.constant 7.000000e+00 : f32
      %272 = vector.broadcast %cst_72 : f32 to vector<1x256xf32>
      %273 = arith.maximumf %272, %266 : vector<1x256xf32>
      %274 = vector.broadcast %cst_73 : f32 to vector<1x256xf32>
      %275 = arith.minimumf %274, %273 : vector<1x256xf32>
      %276 = arith.fptosi %275 : vector<1x256xf32> to vector<1x256xi32>
      %277 = arith.mulf %23, %220 : vector<1x256xf32>
      %278 = arith.mulf %277, %27 : vector<1x256xf32>
      %279 = arith.andi %211, %225 : vector<1x256xi1>
      %280 = arith.andi %279, %271 : vector<1x256xi1>
      %281 = arith.extui %280 : vector<1x256xi1> to vector<1x256xi32>
      %282 = arith.sitofp %281 : vector<1x256xi32> to vector<1x256xf32>
      %283 = arith.mulf %278, %282 : vector<1x256xf32>
      %c64_i32_74 = arith.constant 64 : i32
      %284 = vector.broadcast %c64_i32_74 : i32 to vector<1x256xi32>
      %285 = arith.muli %216, %284 : vector<1x256xi32>
      %c8_i32_75 = arith.constant 8 : i32
      %286 = vector.broadcast %c8_i32_75 : i32 to vector<1x256xi32>
      %287 = arith.muli %230, %286 : vector<1x256xi32>
      %288 = arith.addi %285, %287 : vector<1x256xi32>
      %289 = arith.addi %288, %276 : vector<1x256xi32>
      %290 = vector.broadcast %289 : vector<1x256xi32> to vector<256x256xi32>
      %291 = arith.cmpi eq, %290, %31 : vector<256x256xi32>
      %292 = arith.extui %291 : vector<256x256xi1> to vector<256x256xi32>
      %293 = arith.sitofp %292 : vector<256x256xi32> to vector<256x256xf32>
      %294 = vector.broadcast %283 : vector<1x256xf32> to vector<256x256xf32>
      %295 = arith.mulf %294, %293 : vector<256x256xf32>
      %296 = arith.addf %264, %295 : vector<256x256xf32>
      %cst_76 = arith.constant 1.000000e+00 : f32
      %297 = vector.broadcast %cst_76 : f32 to vector<1x256xf32>
      %298 = arith.addf %24, %297 : vector<1x256xf32>
      %cst_77 = arith.constant 0.000000e+00 : f32
      %299 = vector.broadcast %cst_77 : f32 to vector<1x256xf32>
      %300 = arith.cmpf oge, %298, %299 : vector<1x256xf32>
      %cst_78 = arith.constant 7.000000e+00 : f32
      %301 = vector.broadcast %cst_78 : f32 to vector<1x256xf32>
      %302 = arith.cmpf ole, %298, %301 : vector<1x256xf32>
      %303 = arith.andi %300, %302 : vector<1x256xi1>
      %cst_79 = arith.constant 0.000000e+00 : f32
      %cst_80 = arith.constant 7.000000e+00 : f32
      %304 = vector.broadcast %cst_79 : f32 to vector<1x256xf32>
      %305 = arith.maximumf %304, %298 : vector<1x256xf32>
      %306 = vector.broadcast %cst_80 : f32 to vector<1x256xf32>
      %307 = arith.minimumf %306, %305 : vector<1x256xf32>
      %308 = arith.fptosi %307 : vector<1x256xf32> to vector<1x256xi32>
      %cst_81 = arith.constant 0.000000e+00 : f32
      %309 = vector.broadcast %cst_81 : f32 to vector<1x256xf32>
      %310 = arith.addf %26, %309 : vector<1x256xf32>
      %cst_82 = arith.constant 1.000000e+00 : f32
      %311 = vector.broadcast %cst_82 : f32 to vector<1x256xf32>
      %312 = arith.subf %311, %27 : vector<1x256xf32>
      %cst_83 = arith.constant 0.000000e+00 : f32
      %313 = vector.broadcast %cst_83 : f32 to vector<1x256xf32>
      %314 = arith.cmpf oge, %310, %313 : vector<1x256xf32>
      %cst_84 = arith.constant 7.000000e+00 : f32
      %315 = vector.broadcast %cst_84 : f32 to vector<1x256xf32>
      %316 = arith.cmpf ole, %310, %315 : vector<1x256xf32>
      %317 = arith.andi %314, %316 : vector<1x256xi1>
      %cst_85 = arith.constant 0.000000e+00 : f32
      %cst_86 = arith.constant 7.000000e+00 : f32
      %318 = vector.broadcast %cst_85 : f32 to vector<1x256xf32>
      %319 = arith.maximumf %318, %310 : vector<1x256xf32>
      %320 = vector.broadcast %cst_86 : f32 to vector<1x256xf32>
      %321 = arith.minimumf %320, %319 : vector<1x256xf32>
      %322 = arith.fptosi %321 : vector<1x256xf32> to vector<1x256xi32>
      %323 = arith.mulf %23, %25 : vector<1x256xf32>
      %324 = arith.mulf %323, %312 : vector<1x256xf32>
      %325 = arith.andi %211, %303 : vector<1x256xi1>
      %326 = arith.andi %325, %317 : vector<1x256xi1>
      %327 = arith.extui %326 : vector<1x256xi1> to vector<1x256xi32>
      %328 = arith.sitofp %327 : vector<1x256xi32> to vector<1x256xf32>
      %329 = arith.mulf %324, %328 : vector<1x256xf32>
      %c64_i32_87 = arith.constant 64 : i32
      %330 = vector.broadcast %c64_i32_87 : i32 to vector<1x256xi32>
      %331 = arith.muli %216, %330 : vector<1x256xi32>
      %c8_i32_88 = arith.constant 8 : i32
      %332 = vector.broadcast %c8_i32_88 : i32 to vector<1x256xi32>
      %333 = arith.muli %308, %332 : vector<1x256xi32>
      %334 = arith.addi %331, %333 : vector<1x256xi32>
      %335 = arith.addi %334, %322 : vector<1x256xi32>
      %336 = vector.broadcast %335 : vector<1x256xi32> to vector<256x256xi32>
      %337 = arith.cmpi eq, %336, %31 : vector<256x256xi32>
      %338 = arith.extui %337 : vector<256x256xi1> to vector<256x256xi32>
      %339 = arith.sitofp %338 : vector<256x256xi32> to vector<256x256xf32>
      %340 = vector.broadcast %329 : vector<1x256xf32> to vector<256x256xf32>
      %341 = arith.mulf %340, %339 : vector<256x256xf32>
      %342 = arith.addf %296, %341 : vector<256x256xf32>
      %cst_89 = arith.constant 1.000000e+00 : f32
      %343 = vector.broadcast %cst_89 : f32 to vector<1x256xf32>
      %344 = arith.addf %26, %343 : vector<1x256xf32>
      %cst_90 = arith.constant 0.000000e+00 : f32
      %345 = vector.broadcast %cst_90 : f32 to vector<1x256xf32>
      %346 = arith.cmpf oge, %344, %345 : vector<1x256xf32>
      %cst_91 = arith.constant 7.000000e+00 : f32
      %347 = vector.broadcast %cst_91 : f32 to vector<1x256xf32>
      %348 = arith.cmpf ole, %344, %347 : vector<1x256xf32>
      %349 = arith.andi %346, %348 : vector<1x256xi1>
      %cst_92 = arith.constant 0.000000e+00 : f32
      %cst_93 = arith.constant 7.000000e+00 : f32
      %350 = vector.broadcast %cst_92 : f32 to vector<1x256xf32>
      %351 = arith.maximumf %350, %344 : vector<1x256xf32>
      %352 = vector.broadcast %cst_93 : f32 to vector<1x256xf32>
      %353 = arith.minimumf %352, %351 : vector<1x256xf32>
      %354 = arith.fptosi %353 : vector<1x256xf32> to vector<1x256xi32>
      %355 = arith.mulf %23, %25 : vector<1x256xf32>
      %356 = arith.mulf %355, %27 : vector<1x256xf32>
      %357 = arith.andi %211, %303 : vector<1x256xi1>
      %358 = arith.andi %357, %349 : vector<1x256xi1>
      %359 = arith.extui %358 : vector<1x256xi1> to vector<1x256xi32>
      %360 = arith.sitofp %359 : vector<1x256xi32> to vector<1x256xf32>
      %361 = arith.mulf %356, %360 : vector<1x256xf32>
      %c64_i32_94 = arith.constant 64 : i32
      %362 = vector.broadcast %c64_i32_94 : i32 to vector<1x256xi32>
      %363 = arith.muli %216, %362 : vector<1x256xi32>
      %c8_i32_95 = arith.constant 8 : i32
      %364 = vector.broadcast %c8_i32_95 : i32 to vector<1x256xi32>
      %365 = arith.muli %308, %364 : vector<1x256xi32>
      %366 = arith.addi %363, %365 : vector<1x256xi32>
      %367 = arith.addi %366, %354 : vector<1x256xi32>
      %368 = vector.broadcast %367 : vector<1x256xi32> to vector<256x256xi32>
      %369 = arith.cmpi eq, %368, %31 : vector<256x256xi32>
      %370 = arith.extui %369 : vector<256x256xi1> to vector<256x256xi32>
      %371 = arith.sitofp %370 : vector<256x256xi32> to vector<256x256xf32>
      %372 = vector.broadcast %361 : vector<1x256xf32> to vector<256x256xf32>
      %373 = arith.mulf %372, %371 : vector<256x256xf32>
      %374 = arith.addf %342, %373 : vector<256x256xf32>
      %c0_96 = arith.constant 0 : index
      %c0_97 = arith.constant 0 : index
      %375 = vector.load %arg8[%c0_96, %c0_97] : memref<4x256xf32, #tpu.memory_space<vmem>>, vector<4x256xf32>
      %c0_98 = arith.constant 0 : index
      %c0_99 = arith.constant 0 : index
      %c0_100 = arith.constant 0 : index
      %376 = vector.load %arg6[%c0_98, %c0_99, %c0_100] : memref<1x4x256xf32, #tpu.memory_space<vmem>>, vector<1x4x256xf32>
      %377 = vector.shape_cast %376 : vector<1x4x256xf32> to vector<4x256xf32>
      %cst_101 = arith.constant dense<0.000000e+00> : vector<4x256xf32>
      %378 = tpu.matmul %377, %374, %cst_101 {dimension_numbers = #tpu.dot_dimension_numbers<[1], [0], [0], [1], [0, 0, 1, 1], [], []>} : vector<4x256xf32>, vector<256x256xf32>, vector<4x256xf32> -> vector<4x256xf32>
      %379 = arith.addf %375, %378 : vector<4x256xf32>
      %c0_102 = arith.constant 0 : index
      %c0_103 = arith.constant 0 : index
      %380 = vector.load %arg8[%c0_102, %c0_103] : memref<4x256xf32, #tpu.memory_space<vmem>>, vector<4x256xf32>
      tpu.vector_store %arg8[%c0_102, %c0_103], %379 {strides = array<i32>} : memref<4x256xf32, #tpu.memory_space<vmem>>, vector<4x256xf32>,
    } else {
    }
    %c1_i32 = arith.constant 1 : i32
    %14 = arith.cmpi eq, %arg2, %c1_i32 : i32
    %15 = arith.extui %14 : i1 to i32
    %c0_i32_2 = arith.constant 0 : i32
    %16 = arith.cmpi ne, %15, %c0_i32_2 : i32
    scf.if %16 {
      %c0 = arith.constant 0 : index
      %c0_3 = arith.constant 0 : index
      %17 = vector.load %arg8[%c0, %c0_3] : memref<4x256xf32, #tpu.memory_space<vmem>>, vector<4x256xf32>
      %c0_4 = arith.constant 0 : index
      %c0_5 = arith.constant 0 : index
      %c0_6 = arith.constant 0 : index
      %18 = vector.load %arg7[%c0_4, %c0_5, %c0_6] : memref<1x4x256xf32, #tpu.memory_space<vmem>>, vector<1x4x256xf32>
      %19 = vector.shape_cast %18 : vector<1x4x256xf32> to vector<4x256xf32>
      %20 = vector.shape_cast %17 : vector<4x256xf32> to vector<1x4x256xf32>
      tpu.vector_store %arg7[%c0_4, %c0_5, %c0_6], %20 {strides = array<i32>} : memref<1x4x256xf32, #tpu.memory_space<vmem>>, vector<1x4x256xf32>,
    } else {
    }
    return
  }
  func.func @transform_0(%arg0: i32, %arg1: i32, %arg2: i32, %arg3: memref<2x2xi32, #tpu.memory_space<smem>>, %arg4: memref<2x2xi32, #tpu.memory_space<smem>>) -> (i32, i32, i32) {
    %c0_i32 = arith.constant 0 : i32
    %c0_i32_0 = arith.constant 0 : i32
    return %arg0, %c0_i32, %arg1 : i32, i32, i32
  }
  func.func @transform_1(%arg0: i32, %arg1: i32, %arg2: i32, %arg3: memref<2x2xi32, #tpu.memory_space<smem>>, %arg4: memref<2x2xi32, #tpu.memory_space<smem>>) -> (i32, i32, i32) {
    %0 = arith.index_cast %arg0 : i32 to index
    %1 = arith.index_cast %arg1 : i32 to index
    %2 = memref.load %arg3[%0, %1] : memref<2x2xi32, #tpu.memory_space<smem>>
    %3 = arith.index_cast %arg0 : i32 to index
    %4 = arith.index_cast %arg1 : i32 to index
    %5 = memref.load %arg4[%3, %4] : memref<2x2xi32, #tpu.memory_space<smem>>
    %6 = arith.maxsi %2, %arg2 : i32
    %7 = arith.minsi %5, %6 : i32
    %c0_i32 = arith.constant 0 : i32
    %c0_i32_0 = arith.constant 0 : i32
    return %arg0, %c0_i32, %7 : i32, i32, i32
  }
  func.func @transform_2(%arg0: i32, %arg1: i32, %arg2: i32, %arg3: memref<2x2xi32, #tpu.memory_space<smem>>, %arg4: memref<2x2xi32, #tpu.memory_space<smem>>) -> (i32, i32, i32) {
    %c0_i32 = arith.constant 0 : i32
    %c0_i32_0 = arith.constant 0 : i32
    return %arg0, %c0_i32, %arg1 : i32, i32, i32
  }
}

</mosaic_0001>

<bundles_post_ra>
// kernel: tpu_custom_call.1
= control target key start
LH: loop header
LB: loop body
LE: loop exit
PB: predicated region body
PF: predicated region fallthrough
CT: control target
= control target key end

     0   :  { %s4185_s21 = smov [#allocation4]   ;;  %s4186_s22 = smov [#allocation5]   ;;  %s6924_s0 = inlined_call_operand.vmem [shape: s32[2,2], index: 0, kind: input, shape index: {}]   ;;  %s6925_s2 = inlined_call_operand.vmem [shape: f32[2,3,512], index: 2, kind: input, shape index: {}]   ;;  %s6926_s3 = inlined_call_operand.vmem [shape: f32[2,4,512], index: 3, kind: input, shape index: {}]   ;;  %s6927_s4 = inlined_call_operand.hbm [shape: f32[2,4,512], index: 4, kind: output, shape index: {}]   ;;  %s6928_s1 = inlined_call_operand.vmem [shape: s32[2,2], index: 1, kind: input, shape index: {}]  }
   0x1   :  { %s10_s17 = sshll.u32 %s6924_s0, 4  ;;  %s15_s20 = sshll.u32 %s6928_s1, 4  ;;  %s11_s17 = int_to_ptr.vmem [resolvable:$true] %s10_s17  ;;  %s16_s20 = int_to_ptr.vmem [resolvable:$true] %s15_s20 }
   0x2   :  { %13 = dma.vmem_to_smem %s11_s17, 32, %s4185_s21, [#allocation3] }
   0x3   :  { %18 = dma.vmem_to_smem %s16_s20, 32, %s4186_s22, [#allocation3] }
   0x4   :  { %4139 = dma.done.wait [#allocation3], 64 }
   0x5   :  { %4140 = vsyncadd [#allocation3], 4294967232 }
   0x6   :  { %21 = sfence }
   0x7   :  { %22 = vsyncpa [#allocation7], 0 }
   0x8   :  { %24 = vsyncpa [#allocation7 + $0x1], 0  ;;  %s4221_s23 = smov 0   ;;  %s4223_s24 = smov 0  }
   0x9   :  { %s4225_s0 = smov 0   ;;  %s4227_s25 = smov 0  }
   0xa   :  { %s4229_s1 = smov 0   ;;  %s4231_s26 = smov 0  }
   0xb   :  { %s4233_s27 = smov 0   ;;  %s4235_s28 = smov 0  }
   0xc   :  { %s4237_s29 = smov 0   ;;  %s4239_s30 = smov 0  }
   0xd LB: > { %6941 = sst [smem:[#allocation10_spill]] %s4171_s27  ;;  %s3399_s5 = sadd.s32 4294967295, %s4183_s30   ;;  %s4183_s30 = sphi %s4239_s30, %s30_s30   ;;  %s4179_s29 = sphi %s4237_s29, %s6973_s29   ;;  %s4175_s28 = sphi %s4235_s28, %s6972_s28   ;;  %s4171_s27 = sphi %s4233_s27, %s6971_s27   ;;  %s4167_s26 = sphi %s4231_s26, %s6970_s26   ;;  %s4163_s1 = sphi %s4229_s1, %s6969_s1   ;;  %s4159_s25 = sphi %s4227_s25, %s6968_s25   ;;  %s4155_s0 = sphi %s4225_s0, %s6976_s0   ;;  %s4151_s24 = sphi %s4223_s24, %s6975_s24   ;;  %s4147_s23 = sphi %s4221_s23, %s6974_s23  }
   0xe   : > { %6942 = sst [smem:[#allocation11_spill]] %s4175_s28  ;;  %s3400_s6 = sadd.s32 4294967294, %s4183_s30  }
   0xf   : > { %6943 = sst [smem:[#allocation12_spill]] %s4179_s29  ;;  %s42_s7 = sadd.s32 1, %s4171_s27 }
  0x10   : > { %p43_p0 = scmp.ge.s32.totalorder %s42_s7, 2  ;;  %s45_s8 = sadd.s32 1, %s4175_s28 }
  0x11   : > { %s49_s9 = sadd.s32 1, %s4179_s29  ;;  %p150_p1 = scmp.ne.s32.totalorder %s4155_s0, %s4151_s24 }
  0x12   : > { %s6978_s7 = smov (%p43_p0, %s42_s7), 0  ;;  %s6980_s8 = smov (!%p43_p0, %s45_s8), %s4175_s28 }
  0x13   : > { %6944 = sst [smem:[#allocation13_spill]] %s6978_s7  ;;  %p151_p2 = scmp.eq.s32.totalorder %s3399_s5, 7 }
  0x14   : > { %p156_p3 = scmp.ne.s32.totalorder %s4151_s24, %s4147_s23  ;;  %p47_p4 = scmp.ge.s32.totalorder %s6980_s8, 2 }
  0x15   : > { %p157_p5 = scmp.eq.s32.totalorder %s3400_s6, 7  ;;  %p4283_p6 = por %p151_p2, %p150_p1 }
  0x16   : > { %s6982_s8 = smov (%p47_p4, %s6980_s8), 0  ;;  %s6984_s9 = smov (!%p47_p4, %s49_s9), %s4179_s29 }
  0x17   : > { %6946 = sst [smem:[#allocation14_spill]] %s6982_s8  ;;  %p4290_p7 = por %p157_p5, %p156_p3 }
  0x18   : > { %p3405_p8 = scmp.ge.s32.totalorder %s4183_s30, 1  ;;  %p51_p9 = scmp.ge.s32.totalorder %s6984_s9, 2 }
  0x19   : > { %p227_p10 = scmp.lt.s32.totalorder %s4183_s30, 9  ;;  %s136_s12 = ssub.s32 %s4175_s28, %s6982_s8 }
  0x1a   : > { %s6986_s9 = smov (%p51_p9, %s6984_s9), 0  ;;  %s140_s15 = sadd.s32 1, %s4155_s0 }
  0x1b   : > { %6948 = sst [smem:[#allocation15_spill]] %s6986_s9  ;;  %p228_p11 = pnand %p3405_p8, %p227_p10 }
  0x1c   : > { %s135_s13 = ssub.s32 %s4179_s29, %s6986_s9  ;;  %s6931_s17 = sand.u32 (!%p228_p11), 1, %s4151_s24  }
  0x1d   : > { %s137_s14 = sor.u32 %s136_s12, %s135_s13  ;;  %231 = sbr.rel (%p228_p11) target bundleno = 797 (0x31d), region = 28 }
  0x1e   : > { %p138_p12 = scmp.eq.s32.totalorder %s137_s14, 0  ;;  %s4308_s18 = sshll.u32 (!%p228_p11), %s4163_s1, 1 }
  0x1f   : > { %s4312_s19 = sshll.u32 (!%p228_p11), %s6931_s17, 3  ;;  %p276_p13 = scmp.lt.s32.totalorder (!%p228_p11), %s4167_s26, 1 }
  0x20   : > { %s4304_s16 = scalar_select %p138_p12, %s4155_s0, %s140_s15  }
  0x21   : > { %p278_p0 = scmp.lt.s32.totalorder (!%p228_p11), %s4308_s18, 3  ;;  %s285_s5 = sshra.s32 (!%p228_p11), %s4163_s1, 7 }
  0x22   : > { %s277_s20 = scalar_select %p276_p13, %s4167_s26, 1 }
  0x23   : > { %s279_s21 = scalar_select %p278_p0, %s4308_s18, 3 }
  0x24   : > { %s3408_s22 = sshll.u32 %s277_s20, 2  ;;  %s287_s12 = sadd.s32 %s4167_s26, %s285_s5 }
  0x25   : > { %s281_s6 = sadd.s32 %s3408_s22, %s279_s21  ;;  %s3410_s14 = sshll.u32 %s287_s12, 7 }
  0x26   : > { %s3409_s13 = sshll.u32 %s281_s6, 2  ;;  %s290_s7 = sand.u32 127, %s4163_s1 }
  0x27   : > { %s283_s8 = scalar_lea.vmem %s6925_s2, %s3409_s13  ;;  %s291_s17 = sadd.s32 %s3410_s14, %s290_s7 }
  0x28   : > { %s292_s29 = sld [smem:[#allocation4 + %s291_s17]]  ;;  %s274_s9 = scalar_lea.vmem [#allocation6], %s4312_s19 }
  0x29   : > { %s293_s28 = sld [smem:[#allocation5 + %s291_s17]]  ;;  %p3414_p4 = scmp.ne.s32.totalorder %s4159_s25, 0 }
  0x2e   : > { %p294_p1 = scmp.gt.s32.totalorder %s292_s29, %s4159_s25 }
  0x30   : > { %s6988_s29 = smov (!%p294_p1, %s292_s29), %s4159_s25 }
  0x31   : > { %p296_p2 = scmp.lt.s32.totalorder %s293_s28, %s6988_s29 }
  0x33   : > { %s6990_s28 = smov (!%p296_p2, %s293_s28), %s6988_s29 }
  0x34   : > { %s3411_s27 = sshll.u32 %s6990_s28, 1 }
  0x35   : > { %p301_p3 = scmp.lt.s32.totalorder %s3411_s27, 3 }
  0x36   : > { %325 = sbr.rel (%p3414_p4) target bundleno = 61 (0x3d), region = 32 }
  0x37   : > { %s6992_s27 = smov (!%p301_p3, %s3411_s27), 3 }
  0x38   : > { %s304_s20 = sadd.s32 %s3408_s22, %s6992_s27 }
  0x39   : > { %s3413_s21 = sshll.u32 %s304_s20, 2 }
  0x3a   : > { %s4329_s12 = scalar_lea.vmem %s6926_s3, %s3413_s21 }
  0x3b   : > { %v4187_v0 = vmov 0.0  }
  0x3c   : > { %326 = vst [vmem:[#allocation2] sm:$0xff] %v4187_v0 }
  0x3d PF: > { %s334_s1 = sld [smem:[#allocation4 + %s291_s17]] }
  0x3e   : > { %s336_s28 = sld [smem:[#allocation5 + %s291_s17]] }
  0x43   : > { %p335_p5 = scmp.ge.s32.totalorder %s4159_s25, %s334_s1 }
  0x44   : > { %p337_p8 = scmp.le.s32.totalorder %s4159_s25, %s336_s28 }
  0x46   : > { %p338_p9 = pnand %p337_p8, %p335_p5 }
  0x48   : > { %341 = sbr.rel (%p338_p9) target bundleno = 771 (0x303), region = 36 }
  0x4d   : > { %v342_v1 = vld [vmem:[%s283_s8] sm:$0x77]  ;;  %v345_v2 = vlaneseq  ;;  %s3416_s27 = sshll.u32 %s4159_s25, 8  ;;  %v4188_v14 = vmov 0   ;;  %v4189_v37 = vmov 0.0  }
  0x4e   : > { %v343_v3 = vfloor.f32 %v342_v1  ;;  %v4338_v5 = vstv %s3416_s27 }
  0x4f   : > { %v4336_v4 = vshrl.u32 %v345_v2, 7 }
  0x50   : > { %v4340_v6 = vsub.f32 %v342_v1, %v343_v3  ;;  %vm414_vm0 = vcmp.ge.f32.partialorder %v343_v3, 0.0  ;;  %vm415_vm1 = vcmp.le.f32.partialorder %v343_v3, 7.0  ;;  %v417_v7 = vmax.f32 %v343_v3, 0.0 }
  0x51   : > { %v361_v8 = vadd.s32 120, %v4336_v4  ;;  %vm4343_vm2 = vmand %vm414_vm0, %vm415_vm1  ;;  %v780_v10 = vadd.f32 1.0, %v343_v3  ;;  %v4348_v11 = vadd.s32 248, %v4336_v4 }
  0x52   : > { %v413_v12 = vsub.f32 1.0, %v4340_v6  ;;  %v418_v13 = vmin.f32 %v417_v7, 7.0  ;;  %v429_v15 = vsel %vm4343_vm2, 1, %v4188_v14  ;;  %v788_v16 = vrot.slane %v4340_v6, 6 }
  0x53   : > { %v4355_v17 = vadd.s32 %v4338_v5, %v361_v8  ;;  %v3417_v18 = vrot.slane %v429_v15, 9  ;;  %v3418_v19 = vrot.slane %v429_v15, 10  ;;  %vm781_vm3 = vcmp.ge.f32.partialorder %v780_v10, 0.0 }
  0x54   : > { %v4357_v20 = vcvt.f32.s32 %v418_v13  ;;  %v421_v21 = vrot.slane %v413_v12, 5  ;;  %v425_v22 = vrot.slane %v413_v12, 6  ;;  %vm782_vm4 = vcmp.le.f32.partialorder %v780_v10, 7.0 }
  0x55   : > { %vm4359_vm5 = vcmp.ne.s32.totalorder %v3417_v18, 0  ;;  %vm4363_vm6 = vcmp.ne.s32.totalorder %v3418_v19, 0  ;;  %vm4367_vm7 = vmand %vm781_vm3, %vm782_vm4  ;;  %v784_v26 = vmax.f32 %v780_v10, 0.0  ;;  %v4371_v27 = vrot.slane %v788_v16, 4 }
  0x56   : > { %v422_v28 = vrot.slane %v421_v21, 4  ;;  %v4373_v29 = vrot.slane %v425_v22, 4  ;;  %vm433_vm8 = vmand %vm4343_vm2, %vm4359_vm5  ;;  %v441_v30 = vmul.u32 64, %v4357_v20  ;;  %v442_v31 = vmul.u32 8, %v4357_v20 }
  0x57   : > { %vm437_vm9 = vmand %vm433_vm8, %vm4363_vm6  ;;  %v446_v32 = vrot.slane %v4357_v20, 6  ;;  %v785_v33 = vmin.f32 %v784_v26, 7.0  ;;  %v792_v34 = vsel %vm4367_vm7, 1, %v4188_v14  ;;  %v1134_v35 = vrot.slane %v4340_v6, 5 }
  0x58   : > { %v424_v36 = vmul.f32 %v422_v28, %v413_v12  ;;  %v3419_v38 = vsel %vm437_vm9, 1.0, %v4189_v37  ;;  %v443_v39 = vrot.slane %v442_v31, 5  ;;  %v3484_v40 = vrot.slane %v792_v34, 10  ;;  %vm1822_vm11 = vmand %vm4367_vm7, %vm4359_vm5 }
  0x59   : > { %v4393_v41 = vrot.slane %v446_v32, 4  ;;  %vm3950_vm10 = vcmp.lt.s32.totalorder %v785_v33, 0  ;;  %v3951_v42 = vceil.f32 %v785_v33  ;;  %v3952_v43 = vfloor.f32 %v785_v33  ;;  %vm1823_vm14 = vmand %vm1822_vm11, %vm4363_vm6 }
  0x5a   : > { %v428_v44 = vmul.f32 %v4373_v29, %v424_v36  ;;  %v444_v45 = vrot.slane %v443_v39, 4  ;;  %v791_v46 = vmul.f32 %v4371_v27, %v424_v36  ;;  %vm4401_vm12 = vcmp.ne.s32.totalorder %v3484_v40, 0 }
  0x5b   : > { %v3953_v48 = vsel %vm3950_vm10, %v3951_v42, %v3952_v43  ;;  %vm796_vm13 = vmand %vm433_vm8, %vm4401_vm12  ;;  %v1135_v49 = vrot.slane %v1134_v35, 4  ;;  %v3550_v50 = vrot.slane %v792_v34, 9  ;;  %v1820_v51 = vmul.f32 %v422_v28, %v4340_v6 }
  0x5c   : > { %v4413_v52 = vmul.f32 %v3419_v38, %v428_v44  ;;  %v445_v53 = vadd.s32 %v444_v45, %v441_v30  ;;  %v4417_v54 = vcvt.f32.s32 %v3953_v48  ;;  %v3485_v55 = vsel %vm796_vm13, 1.0, %v4189_v37  ;;  %vm2162_vm4 = vmand %vm1822_vm11, %vm4401_vm12 }
  0x5d   : > { %v4427_v56 = vmul.f32 %v3485_v55, %v791_v46  ;;  %v1137_v57 = vmul.f32 %v1135_v49, %v413_v12  ;;  %vm4429_vm15 = vcmp.ne.s32.totalorder %v3550_v50, 0  ;;  %v1821_v59 = vmul.f32 %v1820_v51, %v4373_v29 }
  0x5e   : > { %v4435_v60 = vadd.s32 %v4393_v41, %v445_v53  ;;  %v647_v61 = vperm.slane %v4413_v52, 4  ;;  %v800_v62 = vrot.slane %v4417_v54, 6  ;;  %vm1142_vm0 = vmand %vm4343_vm2, %vm4429_vm15  ;;  %v1147_v63 = vmul.u32 8, %v4417_v54 }
  0x5f   : > { %v1001_v0 = vperm.slane %v4427_v56, 4  ;;  %v1138_v1 = vmul.f32 %v1137_v57, %v4373_v29  ;;  %vm1143_vm1 = vmand %vm1142_vm0, %vm4363_vm6  ;;  %v1483_v2 = vmul.f32 %v1137_v57, %v4371_v27  ;;  %v3681_v3 = vsel %vm1823_vm14, 1.0, %v4189_v37 }
  0x60   : > { %v450_v7 = vperm.slane %v4435_v60, 4  ;;  %v4451_v8 = vperm.slane %v647_v61, 0  ;;  %v4453_v10 = vrot.slane %v800_v62, 4  ;;  %v3551_v9 = vsel %vm1143_vm1, 1.0, %v4189_v37  ;;  %vm1484_vm2 = vmand %vm1142_vm0, %vm4401_vm12 }
  0x61   : > { %v4458_v12 = vperm.slane %v1001_v0, 0  ;;  %v4460_v13 = vmul.f32 %v3551_v9, %v1138_v1  ;;  %v1148_v14 = vrot.slane %v1147_v63, 5  ;;  %v3616_v15 = vsel %vm1484_vm2, 1.0, %v4189_v37  ;;  %vm2500_vm8 = vmand %vm4367_vm7, %vm4429_vm15 }
  0x62   : > { %v4463_v16 = vperm.slane %v450_v7, 0  ;;  %v4466_v18 = vadd.s32 %v4453_v10, %v445_v53  ;;  %v4468_v19 = vmul.f32 %v3616_v15, %v1483_v2  ;;  %v4470_v21 = vmul.f32 %v3681_v3, %v1821_v59  ;;  %vm2501_vm9 = vmand %vm2500_vm8, %vm4363_vm6 }
  0x63   : > { %v1149_v22 = vrot.slane %v1148_v14, 4  ;;  %v1350_v26 = vperm.slane %v4460_v13, 4  ;;  %v1827_v28 = vmul.u32 64, %v4417_v54  ;;  %v2161_v31 = vmul.f32 %v1820_v51, %v4371_v27  ;;  %vm2839_vm14 = vmand %vm2500_vm8, %vm4401_vm12 }
  0x64   : > { %vm484_vm3 = vcmp.eq.s32.totalorder %v4463_v16, %v4355_v17  ;;  %v804_v32 = vperm.slane %v4466_v18, 4  ;;  %v1687_v33 = vperm.slane %v4468_v19, 4  ;;  %v2028_v34 = vperm.slane %v4470_v21, 4 }
  0x65   : > { %v3451_v35 = vsel %vm484_vm3, 1.0, %v4189_v37  ;;  %v1150_v36 = vadd.s32 %v1149_v22, %v441_v30  ;;  %v4490_v38 = vperm.slane %v1350_v26, 0  ;;  %v1828_v39 = vadd.s32 %v1827_v28, %v444_v45 }
  0x66   : > { %v683_v40 = vmul.f32 %v3451_v35, %v4451_v8  ;;  %v4497_v42 = vperm.slane %v804_v32, 0  ;;  %v4499_v23 = vperm.slane %v1687_v33, 0  ;;  %v4501_v43 = vperm.slane %v2028_v34, 0 }
  0x67   : > { %v4504_v44 = vadd.s32 %v1150_v36, %v4393_v41  ;;  %v4507_v20 = vadd.s32 %v1150_v36, %v4453_v10  ;;  %v4510_v30 = vadd.s32 %v1828_v39, %v4393_v41  ;;  %v3746_v45 = vsel %vm2162_vm4, 1.0, %v4189_v37 }
  0x68   : > { %vm838_vm5 = vcmp.eq.s32.totalorder %v4497_v42, %v4355_v17  ;;  %v4515_v46 = vmul.f32 %v3746_v45, %v2161_v31  ;;  %v4518_v48 = vadd.s32 %v1828_v39, %v4453_v10  ;;  %v2498_v50 = vmul.f32 %v1135_v49, %v4340_v6 }
  0x69   : > { %v3517_v51 = vsel %vm838_vm5, 1.0, %v4189_v37  ;;  %v1153_v53 = vperm.slane %v4504_v44, 4  ;;  %v1490_v54 = vperm.slane %v4507_v20, 4  ;;  %v1831_v55 = vperm.slane %v4510_v30, 4 }
  0x6a   : > { %v1037_v57 = vmul.f32 %v3517_v51, %v4458_v12  ;;  %v2168_v6 = vperm.slane %v4518_v48, 4  ;;  %v2365_v24 = vperm.slane %v4515_v46, 4  ;;  %v2499_v49 = vmul.f32 %v2498_v50, %v4373_v29 }
  0x6b   : > { %v4536_v59 = vperm.slane %v1153_v53, 0  ;;  %v4538_v61 = vperm.slane %v1490_v54, 0  ;;  %v4540_v62 = vperm.slane %v1831_v55, 0  ;;  %v3811_v63 = vsel %vm2501_vm9, 1.0, %v4189_v37 }
  0x6c   : > { %v1101_v0 = vadd.f32 %v1037_v57, %v683_v40  ;;  %v4543_v1 = vperm.slane %v2168_v6, 0  ;;  %v4545_v2 = vperm.slane %v2365_v24, 0  ;;  %v4547_v3 = vmul.f32 %v3811_v63, %v2499_v49 }
  0x6d   : > { %vm1187_vm6 = vcmp.eq.s32.totalorder %v4536_v59, %v4355_v17  ;;  %vm1524_vm10 = vcmp.eq.s32.totalorder %v4538_v61, %v4355_v17  ;;  %vm1865_vm11 = vcmp.eq.s32.totalorder %v4540_v62, %v4355_v17  ;;  %v2505_v29 = vadd.s32 %v1827_v28, %v1149_v22 }
  0x6e   : > { %v3583_v7 = vsel %vm1187_vm6, 1.0, %v4189_v37  ;;  %v3648_v9 = vsel %vm1524_vm10, 1.0, %v4189_v37  ;;  %v3713_v14 = vsel %vm1865_vm11, 1.0, %v4189_v37  ;;  %vm2202_vm13 = vcmp.eq.s32.totalorder %v4543_v1, %v4355_v17 }
  0x6f   : > { %v1386_v15 = vmul.f32 %v3583_v7, %v4490_v38  ;;  %v1723_v22 = vmul.f32 %v3648_v9, %v4499_v23  ;;  %v2064_v26 = vmul.f32 %v3713_v14, %v4501_v43  ;;  %v3778_v28 = vsel %vm2202_vm13, 1.0, %v4189_v37 }
  0x70   : > { %v2401_v31 = vmul.f32 %v3778_v28, %v4545_v2  ;;  %v4573_v32 = vadd.s32 %v2505_v29, %v4393_v41  ;;  %v2705_v47 = vperm.slane %v4547_v3, 4  ;;  %v2838_v25 = vmul.f32 %v2498_v50, %v4371_v27 }
  0x71   : > { %v1450_v58 = vadd.f32 %v1386_v15, %v1101_v0  ;;  %v3876_v33 = vsel %vm2839_vm14, 1.0, %v4189_v37  ;;  %v4579_v34 = vadd.s32 %v2505_v29, %v4453_v10  ;;  %v4583_v35 = vadd.s32 %v4338_v5, %v4348_v11 }
  0x72   : > { %v2508_v36 = vperm.slane %v4573_v32, 4  ;;  %v4586_v39 = vperm.slane %v2705_v47, 0  ;;  %v4588_v41 = vmul.f32 %v3876_v33, %v2838_v25  ;;  %v360_v40 = vadd.s32 112, %v4336_v4 }
  0x73   : > { %v1787_v45 = vadd.f32 %v1723_v22, %v1450_v58  ;;  %v2845_v27 = vperm.slane %v4579_v34, 4  ;;  %vm516_vm7 = vcmp.eq.s32.totalorder %v4463_v16, %v4583_v35  ;;  %vm870_vm12 = vcmp.eq.s32.totalorder %v4497_v42, %v4583_v35 }
  0x74   : > { %v4596_v10 = vperm.slane %v2508_v36, 0  ;;  %v3042_v11 = vperm.slane %v4588_v41, 4  ;;  %v3483_v50 = vsel %vm516_vm7, 1.0, %v4189_v37  ;;  %v3549_v51 = vsel %vm870_vm12, 1.0, %v4189_v37 }
  0x75   : > { %v2128_v53 = vadd.f32 %v2064_v26, %v1787_v45  ;;  %v4601_v54 = vperm.slane %v2845_v27, 0  ;;  %v715_v55 = vmul.f32 %v3483_v50, %v4451_v8  ;;  %v1069_v57 = vmul.f32 %v3549_v51, %v4458_v12 }
  0x76   : > { %vm2542_vm15 = vcmp.eq.s32.totalorder %v4596_v10, %v4355_v17  ;;  %v4607_v6 = vperm.slane %v3042_v11, 0  ;;  %vm1219_vm0 = vcmp.eq.s32.totalorder %v4536_v59, %v4583_v35  ;;  %vm1556_vm1 = vcmp.eq.s32.totalorder %v4538_v61, %v4583_v35 }
  0x77   : > { %v2465_v24 = vadd.f32 %v2401_v31, %v2128_v53  ;;  %v3843_v49 = vsel %vm2542_vm15, 1.0, %v4189_v37  ;;  %vm2879_vm2 = vcmp.eq.s32.totalorder %v4601_v54, %v4355_v17  ;;  %v1133_v63 = vadd.f32 %v1069_v57, %v715_v55 }
  0x78   : > { %v2741_v0 = vmul.f32 %v3843_v49, %v4586_v39  ;;  %v3908_v29 = vsel %vm2879_vm2, 1.0, %v4189_v37  ;;  %v3615_v7 = vsel %vm1219_vm0, 1.0, %v4189_v37  ;;  %v3680_v9 = vsel %vm1556_vm1, 1.0, %v4189_v37 }
  0x79   : > { %v3078_v14 = vmul.f32 %v3908_v29, %v4607_v6  ;;  %v1418_v15 = vmul.f32 %v3615_v7, %v4490_v38  ;;  %v1755_v22 = vmul.f32 %v3680_v9, %v4499_v23  ;;  %vm1897_vm3 = vcmp.eq.s32.totalorder %v4540_v62, %v4583_v35 }
  0x7a   : > { %v2805_v26 = vadd.f32 %v2741_v0, %v2465_v24  ;;  %v3745_v28 = vsel %vm1897_vm3, 1.0, %v4189_v37  ;;  %vm2234_vm4 = vcmp.eq.s32.totalorder %v4543_v1, %v4583_v35  ;;  %vm2574_vm8 = vcmp.eq.s32.totalorder %v4596_v10, %v4583_v35 }
  0x7b   : > { %v1482_v31 = vadd.f32 %v1418_v15, %v1133_v63  ;;  %v2096_v47 = vmul.f32 %v3745_v28, %v4501_v43  ;;  %v3810_v25 = vsel %vm2234_vm4, 1.0, %v4189_v37  ;;  %v3875_v58 = vsel %vm2574_vm8, 1.0, %v4189_v37 }
  0x7c   : > { %v3142_v33 = vadd.f32 %v3078_v14, %v2805_v26  ;;  %v2433_v36 = vmul.f32 %v3810_v25, %v4545_v2  ;;  %v2773_v45 = vmul.f32 %v3875_v58, %v4586_v39  ;;  %vm2911_vm5 = vcmp.eq.s32.totalorder %v4601_v54, %v4583_v35 }
  0x7d   : > { %v1819_v27 = vadd.f32 %v1755_v22, %v1482_v31  ;;  %v3940_v11 = vsel %vm2911_vm5, 1.0, %v4189_v37  ;;  %v4639_v50 = vadd.s32 %v4338_v5, %v360_v40  ;;  %v376_v51 = vadd.s32 240, %v4336_v4 }
  0x7e   : > { %3223 = vmatpush.msra.mxu2 %v3142_v33  ;;  %v3110_v53 = vmul.f32 %v3940_v11, %v4607_v6  ;;  %v359_v55 = vadd.s32 104, %v4336_v4  ;;  %v375_v57 = vadd.s32 232, %v4336_v4  ;;  %v358_v24 = vadd.s32 96, %v4336_v4 }
  0x7f   : > { %v2160_v49 = vadd.f32 %v2096_v47, %v1819_v27  ;;  %vm482_vm9 = vcmp.eq.s32.totalorder %v4463_v16, %v4639_v50  ;;  %vm836_vm6 = vcmp.eq.s32.totalorder %v4497_v42, %v4639_v50  ;;  %vm1185_vm10 = vcmp.eq.s32.totalorder %v4536_v59, %v4639_v50 }
  0x80   : > { %v3449_v40 = vsel %vm482_vm9, 1.0, %v4189_v37  ;;  %v3515_v63 = vsel %vm836_vm6, 1.0, %v4189_v37  ;;  %v3581_v0 = vsel %vm1185_vm10, 1.0, %v4189_v37  ;;  %vm1522_vm11 = vcmp.eq.s32.totalorder %v4538_v61, %v4639_v50 }
  0x81   : > { %v2497_v29 = vadd.f32 %v2433_v36, %v2160_v49  ;;  %v681_v7 = vmul.f32 %v3449_v40, %v4451_v8  ;;  %v1035_v9 = vmul.f32 %v3515_v63, %v4458_v12  ;;  %v1384_v14 = vmul.f32 %v3581_v0, %v4490_v38 }
  0x82   : > { %v3646_v15 = vsel %vm1522_vm11, 1.0, %v4189_v37  ;;  %vm1863_vm13 = vcmp.eq.s32.totalorder %v4540_v62, %v4639_v50  ;;  %vm2200_vm14 = vcmp.eq.s32.totalorder %v4543_v1, %v4639_v50  ;;  %vm2540_vm7 = vcmp.eq.s32.totalorder %v4596_v10, %v4639_v50 }
  0x83   : > { %v2837_v22 = vadd.f32 %v2773_v45, %v2497_v29  ;;  %v1099_v26 = vadd.f32 %v1035_v9, %v681_v7  ;;  %v1721_v28 = vmul.f32 %v3646_v15, %v4499_v23  ;;  %v3711_v31 = vsel %vm1863_vm13, 1.0, %v4189_v37 }
  0x84   : > { %v2062_v47 = vmul.f32 %v3711_v31, %v4501_v43  ;;  %v3776_v25 = vsel %vm2200_vm14, 1.0, %v4189_v37  ;;  %v3841_v58 = vsel %vm2540_vm7, 1.0, %v4189_v37  ;;  %vm2877_vm12 = vcmp.eq.s32.totalorder %v4601_v54, %v4639_v50 }
  0x85   : > { %v3174_v33 = vadd.f32 %v3110_v53, %v2837_v22  ;;  %v1448_v36 = vadd.f32 %v1384_v14, %v1099_v26  ;;  %v2399_v27 = vmul.f32 %v3776_v25, %v4545_v2  ;;  %v2739_v45 = vmul.f32 %v3841_v58, %v4586_v39 }
  0x86   : > { %v3906_v11 = vsel %vm2877_vm12, 1.0, %v4189_v37  ;;  %v4678_v49 = vadd.s32 %v4338_v5, %v376_v51  ;;  %v4681_v40 = vadd.s32 %v4338_v5, %v359_v55  ;;  %v4684_v63 = vadd.s32 %v4338_v5, %v375_v57 }
  0x87   : > { %3243 = vmatpush.msra.mxu3 %v3174_v33  ;;  %v1785_v0 = vadd.f32 %v1721_v28, %v1448_v36  ;;  %v3076_v53 = vmul.f32 %v3906_v11, %v4607_v6  ;;  %v4688_v29 = vadd.s32 %v4338_v5, %v358_v24  ;;  %v4691_v7 = vadd.s32 224, %v4336_v4 }
  0x88   : > { %vm514_vm15 = vcmp.eq.s32.totalorder %v4463_v16, %v4678_v49  ;;  %vm868_vm0 = vcmp.eq.s32.totalorder %v4497_v42, %v4678_v49  ;;  %vm1217_vm1 = vcmp.eq.s32.totalorder %v4536_v59, %v4678_v49  ;;  %vm1554_vm2 = vcmp.eq.s32.totalorder %v4538_v61, %v4678_v49 }
  0x89   : > { %v2126_v51 = vadd.f32 %v2062_v47, %v1785_v0  ;;  %v3481_v55 = vsel %vm514_vm15, 1.0, %v4189_v37  ;;  %v3547_v57 = vsel %vm868_vm0, 1.0, %v4189_v37  ;;  %v3613_v24 = vsel %vm1217_vm1, 1.0, %v4189_v37 }
  0x8a   : > { %v713_v9 = vmul.f32 %v3481_v55, %v4451_v8  ;;  %v1067_v14 = vmul.f32 %v3547_v57, %v4458_v12  ;;  %v1416_v15 = vmul.f32 %v3613_v24, %v4490_v38  ;;  %v3678_v22 = vsel %vm1554_vm2, 1.0, %v4189_v37 }
  0x8b   : > { %v2463_v26 = vadd.f32 %v2399_v27, %v2126_v51  ;;  %v1753_v28 = vmul.f32 %v3678_v22, %v4499_v23  ;;  %vm1895_vm3 = vcmp.eq.s32.totalorder %v4540_v62, %v4678_v49  ;;  %vm2232_vm4 = vcmp.eq.s32.totalorder %v4543_v1, %v4678_v49 }
  0x8c   : > { %v1131_v31 = vadd.f32 %v1067_v14, %v713_v9  ;;  %v3743_v47 = vsel %vm1895_vm3, 1.0, %v4189_v37  ;;  %v3808_v25 = vsel %vm2232_vm4, 1.0, %v4189_v37  ;;  %vm2572_vm8 = vcmp.eq.s32.totalorder %v4596_v10, %v4678_v49 }
  0x8d   : > { %v2803_v58 = vadd.f32 %v2739_v45, %v2463_v26  ;;  %v2094_v33 = vmul.f32 %v3743_v47, %v4501_v43  ;;  %v2431_v36 = vmul.f32 %v3808_v25, %v4545_v2  ;;  %v3873_v27 = vsel %vm2572_vm8, 1.0, %v4189_v37 }
  0x8e   : > { %v1480_v11 = vadd.f32 %v1416_v15, %v1131_v31  ;;  %v2771_v0 = vmul.f32 %v3873_v27, %v4586_v39  ;;  %vm2909_vm5 = vcmp.eq.s32.totalorder %v4601_v54, %v4678_v49  ;;  %vm480_vm9 = vcmp.eq.s32.totalorder %v4463_v16, %v4681_v40 }
  0x8f   : > { %v3140_v51 = vadd.f32 %v3076_v53, %v2803_v58  ;;  %v3938_v55 = vsel %vm2909_vm5, 1.0, %v4189_v37  ;;  %v3447_v45 = vsel %vm480_vm9, 1.0, %v4189_v37  ;;  %vm834_vm6 = vcmp.eq.s32.totalorder %v4497_v42, %v4681_v40 }
  0x90   : > { %v1817_v57 = vadd.f32 %v1753_v28, %v1480_v11  ;;  %v3108_v24 = vmul.f32 %v3938_v55, %v4607_v6  ;;  %v679_v9 = vmul.f32 %v3447_v45, %v4451_v8  ;;  %v3513_v14 = vsel %vm834_vm6, 1.0, %v4189_v37 }
  0x91   : > { %3224 = vmatpush.msra.mxu2 %v3140_v51  ;;  %v1033_v15 = vmul.f32 %v3513_v14, %v4458_v12  ;;  %vm1183_vm10 = vcmp.eq.s32.totalorder %v4536_v59, %v4681_v40  ;;  %vm1520_vm11 = vcmp.eq.s32.totalorder %v4538_v61, %v4681_v40  ;;  %vm1861_vm13 = vcmp.eq.s32.totalorder %v4540_v62, %v4681_v40 }
  0x92   : > { %v2158_v53 = vadd.f32 %v2094_v33, %v1817_v57  ;;  %v3579_v22 = vsel %vm1183_vm10, 1.0, %v4189_v37  ;;  %v3644_v26 = vsel %vm1520_vm11, 1.0, %v4189_v37  ;;  %v3709_v28 = vsel %vm1861_vm13, 1.0, %v4189_v37 }
  0x93   : > { %v1097_v31 = vadd.f32 %v1033_v15, %v679_v9  ;;  %v1382_v47 = vmul.f32 %v3579_v22, %v4490_v38  ;;  %v1719_v25 = vmul.f32 %v3644_v26, %v4499_v23  ;;  %v2060_v58 = vmul.f32 %v3709_v28, %v4501_v43 }
  0x94   : > { %v2495_v27 = vadd.f32 %v2431_v36, %v2158_v53  ;;  %vm2198_vm14 = vcmp.eq.s32.totalorder %v4543_v1, %v4681_v40  ;;  %vm2538_vm7 = vcmp.eq.s32.totalorder %v4596_v10, %v4681_v40  ;;  %vm2875_vm12 = vcmp.eq.s32.totalorder %v4601_v54, %v4681_v40 }
  0x95   : > { %v1446_v33 = vadd.f32 %v1382_v47, %v1097_v31  ;;  %v3774_v11 = vsel %vm2198_vm14, 1.0, %v4189_v37  ;;  %v3839_v51 = vsel %vm2538_vm7, 1.0, %v4189_v37  ;;  %v3904_v55 = vsel %vm2875_vm12, 1.0, %v4189_v37 }
  0x96   : > { %v2835_v45 = vadd.f32 %v2771_v0, %v2495_v27  ;;  %v2397_v57 = vmul.f32 %v3774_v11, %v4545_v2  ;;  %v2737_v36 = vmul.f32 %v3839_v51, %v4586_v39  ;;  %v3074_v9 = vmul.f32 %v3904_v55, %v4607_v6 }
  0x97   : > { %v1783_v14 = vadd.f32 %v1719_v25, %v1446_v33  ;;  %vm512_vm15 = vcmp.eq.s32.totalorder %v4463_v16, %v4684_v63  ;;  %vm866_vm0 = vcmp.eq.s32.totalorder %v4497_v42, %v4684_v63  ;;  %vm1215_vm1 = vcmp.eq.s32.totalorder %v4536_v59, %v4684_v63 }
  0x98   : > { %v3172_v15 = vadd.f32 %v3108_v24, %v2835_v45  ;;  %v3479_v53 = vsel %vm512_vm15, 1.0, %v4189_v37  ;;  %v3545_v0 = vsel %vm866_vm0, 1.0, %v4189_v37  ;;  %v3611_v22 = vsel %vm1215_vm1, 1.0, %v4189_v37 }
  0x99   : > { %v2124_v26 = vadd.f32 %v2060_v58, %v1783_v14  ;;  %v711_v28 = vmul.f32 %v3479_v53, %v4451_v8  ;;  %v1065_v31 = vmul.f32 %v3545_v0, %v4458_v12  ;;  %v1414_v47 = vmul.f32 %v3611_v22, %v4490_v38 }
  0x9a   : > { %3244 = vmatpush.msra.mxu3 %v3172_v15  ;;  %vm1552_vm2 = vcmp.eq.s32.totalorder %v4538_v61, %v4684_v63  ;;  %vm1893_vm3 = vcmp.eq.s32.totalorder %v4540_v62, %v4684_v63  ;;  %vm2230_vm4 = vcmp.eq.s32.totalorder %v4543_v1, %v4684_v63  ;;  %vm2570_vm8 = vcmp.eq.s32.totalorder %v4596_v10, %v4684_v63 }
  0x9b   : > { %v2461_v24 = vadd.f32 %v2397_v57, %v2124_v26  ;;  %v1129_v25 = vadd.f32 %v1065_v31, %v711_v28  ;;  %v3676_v58 = vsel %vm1552_vm2, 1.0, %v4189_v37  ;;  %v3741_v27 = vsel %vm1893_vm3, 1.0, %v4189_v37 }
  0x9c   : > { %v1751_v33 = vmul.f32 %v3676_v58, %v4499_v23  ;;  %v2092_v11 = vmul.f32 %v3741_v27, %v4501_v43  ;;  %v3806_v51 = vsel %vm2230_vm4, 1.0, %v4189_v37  ;;  %v3871_v55 = vsel %vm2570_vm8, 1.0, %v4189_v37 }
  0x9d   : > { %v2801_v45 = vadd.f32 %v2737_v36, %v2461_v24  ;;  %v1478_v14 = vadd.f32 %v1414_v47, %v1129_v25  ;;  %v2429_v15 = vmul.f32 %v3806_v51, %v4545_v2  ;;  %v2769_v53 = vmul.f32 %v3871_v55, %v4586_v39 }
  0x9e   : > { %vm2907_vm5 = vcmp.eq.s32.totalorder %v4601_v54, %v4684_v63  ;;  %vm478_vm9 = vcmp.eq.s32.totalorder %v4463_v16, %v4688_v29  ;;  %vm832_vm6 = vcmp.eq.s32.totalorder %v4497_v42, %v4688_v29  ;;  %vm1181_vm10 = vcmp.eq.s32.totalorder %v4536_v59, %v4688_v29 }
  0x9f   : > { %v3138_v57 = vadd.f32 %v3074_v9, %v2801_v45  ;;  %v1815_v0 = vadd.f32 %v1751_v33, %v1478_v14  ;;  %v3936_v36 = vsel %vm2907_vm5, 1.0, %v4189_v37  ;;  %v3445_v22 = vsel %vm478_vm9, 1.0, %v4189_v37 }
  0xa0   : > { %v3106_v26 = vmul.f32 %v3936_v36, %v4607_v6  ;;  %v677_v28 = vmul.f32 %v3445_v22, %v4451_v8  ;;  %v3511_v31 = vsel %vm832_vm6, 1.0, %v4189_v37  ;;  %v3577_v47 = vsel %vm1181_vm10, 1.0, %v4189_v37 }
  0xa1   : > { %3225 = vmatpush.msra.mxu2 %v3138_v57  ;;  %v2156_v24 = vadd.f32 %v2092_v11, %v1815_v0  ;;  %v1031_v25 = vmul.f32 %v3511_v31, %v4458_v12  ;;  %v1380_v58 = vmul.f32 %v3577_v47, %v4490_v38  ;;  %vm1518_vm11 = vcmp.eq.s32.totalorder %v4538_v61, %v4688_v29 }
  0xa2   : > { %v3642_v9 = vsel %vm1518_vm11, 1.0, %v4189_v37  ;;  %vm1859_vm13 = vcmp.eq.s32.totalorder %v4540_v62, %v4688_v29  ;;  %vm2196_vm14 = vcmp.eq.s32.totalorder %v4543_v1, %v4688_v29  ;;  %vm2536_vm7 = vcmp.eq.s32.totalorder %v4596_v10, %v4688_v29 }
  0xa3   : > { %v2493_v27 = vadd.f32 %v2429_v15, %v2156_v24  ;;  %v1095_v33 = vadd.f32 %v1031_v25, %v677_v28  ;;  %v1717_v11 = vmul.f32 %v3642_v9, %v4499_v23  ;;  %v3707_v51 = vsel %vm1859_vm13, 1.0, %v4189_v37 }
  0xa4   : > { %v2058_v55 = vmul.f32 %v3707_v51, %v4501_v43  ;;  %v3772_v45 = vsel %vm2196_vm14, 1.0, %v4189_v37  ;;  %v3837_v14 = vsel %vm2536_vm7, 1.0, %v4189_v37  ;;  %vm2873_vm12 = vcmp.eq.s32.totalorder %v4601_v54, %v4688_v29 }
  0xa5   : > { %v2833_v57 = vadd.f32 %v2769_v53, %v2493_v27  ;;  %v1444_v0 = vadd.f32 %v1380_v58, %v1095_v33  ;;  %v2395_v36 = vmul.f32 %v3772_v45, %v4545_v2  ;;  %v2735_v15 = vmul.f32 %v3837_v14, %v4586_v39 }
  0xa6   : > { %v3902_v22 = vsel %vm2873_vm12, 1.0, %v4189_v37  ;;  %v4822_v28 = vadd.s32 %v4338_v5, %v4691_v7  ;;  %v449_v31 = vperm.slane %v4435_v60, 0  ;;  %v646_v47 = vperm.slane %v4413_v52, 0 }
  0xa7   : > { %v3170_v24 = vadd.f32 %v3106_v26, %v2833_v57  ;;  %v1781_v25 = vadd.f32 %v1717_v11, %v1444_v0  ;;  %v3072_v9 = vmul.f32 %v3902_v22, %v4607_v6  ;;  %v803_v53 = vperm.slane %v4466_v18, 0 }
  0xa8   : > { %vm510_vm15 = vcmp.eq.s32.totalorder %v4463_v16, %v4822_v28  ;;  %vm864_vm0 = vcmp.eq.s32.totalorder %v4497_v42, %v4822_v28  ;;  %vm1213_vm1 = vcmp.eq.s32.totalorder %v4536_v59, %v4822_v28  ;;  %vm1550_vm2 = vcmp.eq.s32.totalorder %v4538_v61, %v4822_v28 }
  0xa9   : > { %3245 = vmatpush.msra.mxu3 %v3170_v24  ;;  %v2122_v52 = vadd.f32 %v2058_v55, %v1781_v25  ;;  %v3477_v60 = vsel %vm510_vm15, 1.0, %v4189_v37  ;;  %v3543_v7 = vsel %vm864_vm0, 1.0, %v4189_v37  ;;  %v3609_v18 = vsel %vm1213_vm1, 1.0, %v4189_v37 }
  0xaa   : > { %v709_v26 = vmul.f32 %v3477_v60, %v4451_v8  ;;  %v1063_v58 = vmul.f32 %v3543_v7, %v4458_v12  ;;  %v1412_v27 = vmul.f32 %v3609_v18, %v4490_v38  ;;  %v3674_v33 = vsel %vm1550_vm2, 1.0, %v4189_v37 }
  0xab   : > { %v2459_v11 = vadd.f32 %v2395_v36, %v2122_v52  ;;  %v1749_v51 = vmul.f32 %v3674_v33, %v4499_v23  ;;  %vm1891_vm3 = vcmp.eq.s32.totalorder %v4540_v62, %v4822_v28  ;;  %vm2228_vm4 = vcmp.eq.s32.totalorder %v4543_v1, %v4822_v28 }
  0xac   : > { %v1127_v55 = vadd.f32 %v1063_v58, %v709_v26  ;;  %v3739_v45 = vsel %vm1891_vm3, 1.0, %v4189_v37  ;;  %v3804_v14 = vsel %vm2228_vm4, 1.0, %v4189_v37  ;;  %vm2568_vm8 = vcmp.eq.s32.totalorder %v4596_v10, %v4822_v28 }
  0xad   : > { %v2799_v57 = vadd.f32 %v2735_v15, %v2459_v11  ;;  %v2090_v0 = vmul.f32 %v3739_v45, %v4501_v43  ;;  %v2427_v36 = vmul.f32 %v3804_v14, %v4545_v2  ;;  %v3869_v22 = vsel %vm2568_vm8, 1.0, %v4189_v37 }
  0xae   : > { %v1476_v24 = vadd.f32 %v1412_v27, %v1127_v55  ;;  %v2767_v25 = vmul.f32 %v3869_v22, %v4586_v39  ;;  %vm2905_vm5 = vcmp.eq.s32.totalorder %v4601_v54, %v4822_v28  ;;  %v4858_v52 = vperm.slane %v449_v31, 0 }
  0xaf   : > { %v3136_v60 = vadd.f32 %v3072_v9, %v2799_v57  ;;  %v3934_v7 = vsel %vm2905_vm5, 1.0, %v4189_v37  ;;  %v4861_v18 = vperm.slane %v646_v47, 0  ;;  %v4863_v15 = vperm.slane %v803_v53, 0 }
  0xb0   : > { %v1813_v26 = vadd.f32 %v1749_v51, %v1476_v24  ;;  %v3104_v58 = vmul.f32 %v3934_v7, %v4607_v6  ;;  %vm483_vm9 = vcmp.eq.s32.totalorder %v4858_v52, %v4355_v17  ;;  %v1000_v27 = vperm.slane %v4427_v56, 0 }
  0xb1   : > { %3226 = vmatpush.msra.mxu2 %v3136_v60  ;;  %v3450_v33 = vsel %vm483_vm9, 1.0, %v4189_v37  ;;  %vm837_vm6 = vcmp.eq.s32.totalorder %v4863_v15, %v4355_v17  ;;  %v1152_v31 = vperm.slane %v4504_v44, 0  ;;  %v1349_v47 = vperm.slane %v4460_v13, 0 }
  0xb2   : > { %v2154_v9 = vadd.f32 %v2090_v0, %v1813_v26  ;;  %v682_v53 = vmul.f32 %v3450_v33, %v4861_v18  ;;  %v3516_v11 = vsel %vm837_vm6, 1.0, %v4189_v37  ;;  %v4876_v51 = vperm.slane %v1000_v27, 0 }
  0xb3   : > { %v4878_v55 = vperm.slane %v1152_v31, 0  ;;  %v4880_v56 = vperm.slane %v1349_v47, 0  ;;  %v1489_v45 = vperm.slane %v4507_v20, 0  ;;  %v1686_v14 = vperm.slane %v4468_v19, 0 }
  0xb4   : > { %v2491_v57 = vadd.f32 %v2427_v36, %v2154_v9  ;;  %v1036_v44 = vmul.f32 %v3516_v11, %v4876_v51  ;;  %v1830_v13 = vperm.slane %v4510_v30, 0  ;;  %v2027_v0 = vperm.slane %v4470_v21, 0 }
  0xb5   : > { %vm1186_vm10 = vcmp.eq.s32.totalorder %v4878_v55, %v4355_v17  ;;  %v4889_v22 = vperm.slane %v1489_v45, 0  ;;  %v4891_v24 = vperm.slane %v1686_v14, 0  ;;  %v2167_v60 = vperm.slane %v4518_v48, 0 }
  0xb6   : > { %v2831_v7 = vadd.f32 %v2767_v25, %v2491_v57  ;;  %v1100_v20 = vadd.f32 %v1036_v44, %v682_v53  ;;  %v3582_v19 = vsel %vm1186_vm10, 1.0, %v4189_v37  ;;  %v4895_v36 = vperm.slane %v1830_v13, 0 }
  0xb7   : > { %v1385_v26 = vmul.f32 %v3582_v19, %v4880_v56  ;;  %vm1523_vm11 = vcmp.eq.s32.totalorder %v4889_v22, %v4355_v17  ;;  %v4900_v21 = vperm.slane %v2027_v0, 0  ;;  %v4902_v30 = vperm.slane %v2167_v60, 0 }
  0xb8   : > { %v3168_v27 = vadd.f32 %v3104_v58, %v2831_v7  ;;  %v3647_v33 = vsel %vm1523_vm11, 1.0, %v4189_v37  ;;  %vm1864_vm13 = vcmp.eq.s32.totalorder %v4895_v36, %v4355_v17  ;;  %v2364_v48 = vperm.slane %v4515_v46, 0 }
  0xb9   : > { %v1449_v25 = vadd.f32 %v1385_v26, %v1100_v20  ;;  %v1722_v31 = vmul.f32 %v3647_v33, %v4891_v24  ;;  %v3712_v47 = vsel %vm1864_vm13, 1.0, %v4189_v37  ;;  %vm2201_vm14 = vcmp.eq.s32.totalorder %v4902_v30, %v4355_v17 }
  0xba   : > { %3246 = vmatpush.msra.mxu3 %v3168_v27  ;;  %v2063_v9 = vmul.f32 %v3712_v47, %v4900_v21  ;;  %v3777_v58 = vsel %vm2201_vm14, 1.0, %v4189_v37  ;;  %v4914_v53 = vperm.slane %v2364_v48, 0  ;;  %v2507_v11 = vperm.slane %v4573_v32, 0 }
  0xbb   : > { %v1786_v45 = vadd.f32 %v1722_v31, %v1449_v25  ;;  %v2704_v46 = vperm.slane %v4547_v3, 0  ;;  %v2844_v14 = vperm.slane %v4579_v34, 0  ;;  %v3041_v57 = vperm.slane %v4588_v41, 0 }
  0xbc   : > { %v2400_v44 = vmul.f32 %v3777_v58, %v4914_v53  ;;  %v4921_v13 = vperm.slane %v2507_v11, 0  ;;  %vm515_vm7 = vcmp.eq.s32.totalorder %v4858_v52, %v4583_v35  ;;  %vm869_vm12 = vcmp.eq.s32.totalorder %v4863_v15, %v4583_v35 }
  0xbd   : > { %v2127_v0 = vadd.f32 %v2063_v9, %v1786_v45  ;;  %v4927_v60 = vperm.slane %v2704_v46, 0  ;;  %v4929_v32 = vperm.slane %v2844_v14, 0  ;;  %v4931_v3 = vperm.slane %v3041_v57, 0 }
  0xbe   : > { %vm2541_vm15 = vcmp.eq.s32.totalorder %v4921_v13, %v4355_v17  ;;  %v3482_v34 = vsel %vm515_vm7, 1.0, %v4189_v37  ;;  %v3548_v41 = vsel %vm869_vm12, 1.0, %v4189_v37  ;;  %vm1218_vm0 = vcmp.eq.s32.totalorder %v4878_v55, %v4583_v35 }
  0xbf   : > { %v2464_v7 = vadd.f32 %v2400_v44, %v2127_v0  ;;  %v3842_v20 = vsel %vm2541_vm15, 1.0, %v4189_v37  ;;  %vm2878_vm1 = vcmp.eq.s32.totalorder %v4929_v32, %v4355_v17  ;;  %v714_v19 = vmul.f32 %v3482_v34, %v4861_v18 }
  0xc0   : > { %v2740_v26 = vmul.f32 %v3842_v20, %v4927_v60  ;;  %v3907_v27 = vsel %vm2878_vm1, 1.0, %v4189_v37  ;;  %v1068_v33 = vmul.f32 %v3548_v41, %v4876_v51  ;;  %v3614_v48 = vsel %vm1218_vm0, 1.0, %v4189_v37 }
  0xc1   : > { %v3077_v25 = vmul.f32 %v3907_v27, %v4931_v3  ;;  %v1417_v31 = vmul.f32 %v3614_v48, %v4880_v56  ;;  %vm1555_vm2 = vcmp.eq.s32.totalorder %v4889_v22, %v4583_v35  ;;  %vm1896_vm3 = vcmp.eq.s32.totalorder %v4895_v36, %v4583_v35 }
  0xc2   : > { %v2804_v17 = vadd.f32 %v2740_v26, %v2464_v7  ;;  %v1132_v47 = vadd.f32 %v1068_v33, %v714_v19  ;;  %v3679_v9 = vsel %vm1555_vm2, 1.0, %v4189_v37  ;;  %v3744_v58 = vsel %vm1896_vm3, 1.0, %v4189_v37 }
  0xc3   : > { %v1754_v11 = vmul.f32 %v3679_v9, %v4891_v24  ;;  %v2095_v45 = vmul.f32 %v3744_v58, %v4900_v21  ;;  %vm2233_vm4 = vcmp.eq.s32.totalorder %v4902_v30, %v4583_v35  ;;  %vm2573_vm8 = vcmp.eq.s32.totalorder %v4921_v13, %v4583_v35 }
  0xc4   : > { %v3141_v46 = vadd.f32 %v3077_v25, %v2804_v17  ;;  %v1481_v14 = vadd.f32 %v1417_v31, %v1132_v47  ;;  %v3809_v57 = vsel %vm2233_vm4, 1.0, %v4189_v37  ;;  %v3874_v44 = vsel %vm2573_vm8, 1.0, %v4189_v37 }
  0xc5   : > { %v2432_v0 = vmul.f32 %v3809_v57, %v4914_v53  ;;  %v2772_v34 = vmul.f32 %v3874_v44, %v4927_v60  ;;  %vm2910_vm5 = vcmp.eq.s32.totalorder %v4929_v32, %v4583_v35  ;;  %v357_v41 = vadd.s32 88, %v4336_v4 }
  0xc6   : > { %3183 = vmatpush.msra.mxu0 %v3141_v46  ;;  %v1818_v7 = vadd.f32 %v1754_v11, %v1481_v14  ;;  %v3939_v20 = vsel %vm2910_vm5, 1.0, %v4189_v37  ;;  %v373_v19 = vadd.s32 216, %v4336_v4  ;;  %vm481_vm9 = vcmp.eq.s32.totalorder %v4858_v52, %v4639_v50 }
  0xc7   : > { %v3109_v26 = vmul.f32 %v3939_v20, %v4931_v3  ;;  %v4974_v27 = vadd.s32 %v4338_v5, %v357_v41  ;;  %v3448_v33 = vsel %vm481_vm9, 1.0, %v4189_v37  ;;  %vm835_vm6 = vcmp.eq.s32.totalorder %v4863_v15, %v4639_v50 }
  0xc8   : > { %v2159_v35 = vadd.f32 %v2095_v45, %v1818_v7  ;;  %v4980_v48 = vadd.s32 %v4338_v5, %v373_v19  ;;  %v4983_v25 = vmul.f32 %v3448_v33, %v4861_v18  ;;  %v3514_v31 = vsel %vm835_vm6, 1.0, %v4189_v37 }
  0xc9   : > { %vm476_vm10 = vcmp.eq.s32.totalorder %v4463_v16, %v4974_v27  ;;  %vm830_vm11 = vcmp.eq.s32.totalorder %v4497_v42, %v4974_v27  ;;  %vm1179_vm13 = vcmp.eq.s32.totalorder %v4536_v59, %v4974_v27  ;;  %vm1516_vm14 = vcmp.eq.s32.totalorder %v4538_v61, %v4974_v27 }
  0xca   : > { %v2496_v17 = vadd.f32 %v2432_v0, %v2159_v35  ;;  %v3443_v47 = vsel %vm476_vm10, 1.0, %v4189_v37  ;;  %v3509_v9 = vsel %vm830_vm11, 1.0, %v4189_v37  ;;  %v3575_v58 = vsel %vm1179_vm13, 1.0, %v4189_v37 }
  0xcb   : > { %v675_v11 = vmul.f32 %v3443_v47, %v4451_v8  ;;  %v1029_v45 = vmul.f32 %v3509_v9, %v4458_v12  ;;  %v1378_v46 = vmul.f32 %v3575_v58, %v4490_v38  ;;  %v3640_v14 = vsel %vm1516_vm14, 1.0, %v4189_v37 }
  0xcc   : > { %v2836_v57 = vadd.f32 %v2772_v34, %v2496_v17  ;;  %v1715_v44 = vmul.f32 %v3640_v14, %v4499_v23  ;;  %vm1857_vm7 = vcmp.eq.s32.totalorder %v4540_v62, %v4974_v27  ;;  %vm2194_vm12 = vcmp.eq.s32.totalorder %v4543_v1, %v4974_v27 }
  0xcd   : > { %v1093_v0 = vadd.f32 %v1029_v45, %v675_v11  ;;  %v3705_v41 = vsel %vm1857_vm7, 1.0, %v4189_v37  ;;  %v3770_v7 = vsel %vm2194_vm12, 1.0, %v4189_v37  ;;  %vm2534_vm15 = vcmp.eq.s32.totalorder %v4596_v10, %v4974_v27 }
  0xce   : > { %v3173_v20 = vadd.f32 %v3109_v26, %v2836_v57  ;;  %v2056_v19 = vmul.f32 %v3705_v41, %v4501_v43  ;;  %v2393_v34 = vmul.f32 %v3770_v7, %v4545_v2  ;;  %v3835_v33 = vsel %vm2534_vm15, 1.0, %v4189_v37 }
  0xcf   : > { %v1442_v35 = vadd.f32 %v1378_v46, %v1093_v0  ;;  %v2733_v17 = vmul.f32 %v3835_v33, %v4586_v39  ;;  %vm2871_vm0 = vcmp.eq.s32.totalorder %v4601_v54, %v4974_v27  ;;  %vm508_vm1 = vcmp.eq.s32.totalorder %v4463_v16, %v4980_v48 }
  0xd0   : > { %3203 = vmatpush.msra.mxu1 %v3173_v20  ;;  %v3900_v47 = vsel %vm2871_vm0, 1.0, %v4189_v37  ;;  %v3475_v26 = vsel %vm508_vm1, 1.0, %v4189_v37  ;;  %vm862_vm2 = vcmp.eq.s32.totalorder %v4497_v42, %v4980_v48  ;;  %vm1211_vm3 = vcmp.eq.s32.totalorder %v4536_v59, %v4980_v48 }
  0xd1   : > { %v1779_v9 = vadd.f32 %v1715_v44, %v1442_v35  ;;  %v3070_v58 = vmul.f32 %v3900_v47, %v4607_v6  ;;  %v707_v11 = vmul.f32 %v3475_v26, %v4451_v8  ;;  %v3541_v45 = vsel %vm862_vm2, 1.0, %v4189_v37 }
  0xd2   : > { %v1061_v46 = vmul.f32 %v3541_v45, %v4458_v12  ;;  %v3607_v14 = vsel %vm1211_vm3, 1.0, %v4189_v37  ;;  %vm1548_vm4 = vcmp.eq.s32.totalorder %v4538_v61, %v4980_v48  ;;  %vm1889_vm8 = vcmp.eq.s32.totalorder %v4540_v62, %v4980_v48 }
  0xd3   : > { %v2120_v57 = vadd.f32 %v2056_v19, %v1779_v9  ;;  %v1410_v0 = vmul.f32 %v3607_v14, %v4490_v38  ;;  %v3672_v44 = vsel %vm1548_vm4, 1.0, %v4189_v37  ;;  %v3737_v41 = vsel %vm1889_vm8, 1.0, %v4189_v37 }
  0xd4   : > { %v1125_v7 = vadd.f32 %v1061_v46, %v707_v11  ;;  %v1747_v20 = vmul.f32 %v3672_v44, %v4499_v23  ;;  %v2088_v33 = vmul.f32 %v3737_v41, %v4501_v43  ;;  %vm2226_vm5 = vcmp.eq.s32.totalorder %v4543_v1, %v4980_v48 }
  0xd5   : > { %v2457_v35 = vadd.f32 %v2393_v34, %v2120_v57  ;;  %v3802_v47 = vsel %vm2226_vm5, 1.0, %v4189_v37  ;;  %vm2566_vm9 = vcmp.eq.s32.totalorder %v4596_v10, %v4980_v48  ;;  %vm2903_vm6 = vcmp.eq.s32.totalorder %v4601_v54, %v4980_v48 }
  0xd6   : > { %v1474_v19 = vadd.f32 %v1410_v0, %v1125_v7  ;;  %v2425_v26 = vmul.f32 %v3802_v47, %v4545_v2  ;;  %v3867_v9 = vsel %vm2566_vm9, 1.0, %v4189_v37  ;;  %v3932_v11 = vsel %vm2903_vm6, 1.0, %v4189_v37 }
  0xd7   : > { %v2797_v45 = vadd.f32 %v2733_v17, %v2457_v35  ;;  %v2765_v46 = vmul.f32 %v3867_v9, %v4586_v39  ;;  %v3102_v34 = vmul.f32 %v3932_v11, %v4607_v6  ;;  %v1034_v14 = vmul.f32 %v3514_v31, %v4876_v51 }
  0xd8   : > { %v1811_v57 = vadd.f32 %v1747_v20, %v1474_v19  ;;  %vm1184_vm10 = vcmp.eq.s32.totalorder %v4878_v55, %v4639_v50  ;;  %vm1521_vm11 = vcmp.eq.s32.totalorder %v4889_v22, %v4639_v50  ;;  %vm1862_vm13 = vcmp.eq.s32.totalorder %v4895_v36, %v4639_v50 }
  0xd9   : > { %v3134_v0 = vadd.f32 %v3070_v58, %v2797_v45  ;;  %v1098_v44 = vadd.f32 %v1034_v14, %v4983_v25  ;;  %v3580_v17 = vsel %vm1184_vm10, 1.0, %v4189_v37  ;;  %v3645_v41 = vsel %vm1521_vm11, 1.0, %v4189_v37 }
  0xda   : > { %v2152_v7 = vadd.f32 %v2088_v33, %v1811_v57  ;;  %v1383_v31 = vmul.f32 %v3580_v17, %v4880_v56  ;;  %v1720_v20 = vmul.f32 %v3645_v41, %v4891_v24  ;;  %v3710_v35 = vsel %vm1862_vm13, 1.0, %v4189_v37 }
  0xdb   : > { %3227 = vmatpush.msra.mxu2 %v3134_v0  ;;  %v2061_v47 = vmul.f32 %v3710_v35, %v4900_v21  ;;  %vm2199_vm14 = vcmp.eq.s32.totalorder %v4902_v30, %v4639_v50  ;;  %vm2539_vm7 = vcmp.eq.s32.totalorder %v4921_v13, %v4639_v50  ;;  %vm2876_vm12 = vcmp.eq.s32.totalorder %v4929_v32, %v4639_v50 }
  0xdc   : > { %v2489_v25 = vadd.f32 %v2425_v26, %v2152_v7  ;;  %v1447_v58 = vadd.f32 %v1383_v31, %v1098_v44  ;;  %v3775_v33 = vsel %vm2199_vm14, 1.0, %v4189_v37  ;;  %v3840_v19 = vsel %vm2539_vm7, 1.0, %v4189_v37 }
  0xdd   : > { %v2398_v9 = vmul.f32 %v3775_v33, %v4914_v53  ;;  %v2738_v11 = vmul.f32 %v3840_v19, %v4927_v60  ;;  %vm513_vm15 = vcmp.eq.s32.totalorder %v4858_v52, %v4678_v49  ;;  %v3905_v57 = vsel %vm2876_vm12, 1.0, %v4189_v37 }
  0xde   : > { %v2829_v45 = vadd.f32 %v2765_v46, %v2489_v25  ;;  %v1784_v14 = vadd.f32 %v1720_v20, %v1447_v58  ;;  %v3480_v0 = vsel %vm513_vm15, 1.0, %v4189_v37  ;;  %vm867_vm0 = vcmp.eq.s32.totalorder %v4863_v15, %v4678_v49 }
  0xdf   : > { %v712_v50 = vmul.f32 %v3480_v0, %v4861_v18  ;;  %vm1216_vm1 = vcmp.eq.s32.totalorder %v4878_v55, %v4678_v49  ;;  %vm1553_vm2 = vcmp.eq.s32.totalorder %v4889_v22, %v4678_v49  ;;  %v3546_v46 = vsel %vm867_vm0, 1.0, %v4189_v37 }
  0xe0   : > { %v3166_v26 = vadd.f32 %v3102_v34, %v2829_v45  ;;  %v2125_v44 = vadd.f32 %v2061_v47, %v1784_v14  ;;  %v3612_v17 = vsel %vm1216_vm1, 1.0, %v4189_v37  ;;  %v1066_v41 = vmul.f32 %v3546_v46, %v4876_v51 }
  0xe1   : > { %v1415_v7 = vmul.f32 %v3612_v17, %v4880_v56  ;;  %v3677_v31 = vsel %vm1553_vm2, 1.0, %v4189_v37  ;;  %vm1894_vm3 = vcmp.eq.s32.totalorder %v4895_v36, %v4678_v49  ;;  %v3075_v35 = vmul.f32 %v3905_v57, %v4931_v3 }
  0xe2   : > { %3247 = vmatpush.msra.mxu3 %v3166_v26  ;;  %v2462_v20 = vadd.f32 %v2398_v9, %v2125_v44  ;;  %v3742_v34 = vsel %vm1894_vm3, 1.0, %v4189_v37  ;;  %vm2231_vm4 = vcmp.eq.s32.totalorder %v4902_v30, %v4678_v49  ;;  %v1130_v47 = vadd.f32 %v1066_v41, %v712_v50 }
  0xe3   : > { %v1752_v25 = vmul.f32 %v3677_v31, %v4891_v24  ;;  %v3807_v58 = vsel %vm2231_vm4, 1.0, %v4189_v37  ;;  %vm2571_vm8 = vcmp.eq.s32.totalorder %v4921_v13, %v4678_v49  ;;  %v2093_v19 = vmul.f32 %v3742_v34, %v4900_v21 }
  0xe4   : > { %v2802_v33 = vadd.f32 %v2738_v11, %v2462_v20  ;;  %v3872_v9 = vsel %vm2571_vm8, 1.0, %v4189_v37  ;;  %vm2908_vm5 = vcmp.eq.s32.totalorder %v4929_v32, %v4678_v49  ;;  %v1479_v45 = vadd.f32 %v1415_v7, %v1130_v47 }
  0xe5   : > { %v2430_v14 = vmul.f32 %v3807_v58, %v4914_v53  ;;  %v3937_v57 = vsel %vm2908_vm5, 1.0, %v4189_v37  ;;  %v356_v0 = vadd.s32 80, %v4336_v4  ;;  %v2770_v26 = vmul.f32 %v3872_v9, %v4927_v60 }
  0xe6   : > { %v3139_v50 = vadd.f32 %v3075_v35, %v2802_v33  ;;  %v372_v44 = vadd.s32 208, %v4336_v4  ;;  %vm479_vm9 = vcmp.eq.s32.totalorder %v4858_v52, %v4681_v40  ;;  %v1816_v11 = vadd.f32 %v1752_v25, %v1479_v45 }
  0xe7   : > { %v5112_v46 = vadd.s32 %v4338_v5, %v356_v0  ;;  %v3446_v49 = vsel %vm479_vm9, 1.0, %v4189_v37  ;;  %vm833_vm6 = vcmp.eq.s32.totalorder %v4863_v15, %v4681_v40  ;;  %v3107_v17 = vmul.f32 %v3937_v57, %v4931_v3 }
  0xe8   : > { %3184 = vmatpush.msra.mxu0 %v3139_v50  ;;  %v5119_v41 = vadd.s32 %v4338_v5, %v372_v44  ;;  %v5122_v7 = vmul.f32 %v3446_v49, %v4861_v18  ;;  %v3512_v31 = vsel %vm833_vm6, 1.0, %v4189_v37  ;;  %v2157_v20 = vadd.f32 %v2093_v19, %v1816_v11 }
  0xe9   : > { %vm474_vm10 = vcmp.eq.s32.totalorder %v4463_v16, %v5112_v46  ;;  %vm828_vm11 = vcmp.eq.s32.totalorder %v4497_v42, %v5112_v46  ;;  %vm1177_vm13 = vcmp.eq.s32.totalorder %v4536_v59, %v5112_v46  ;;  %vm1514_vm14 = vcmp.eq.s32.totalorder %v4538_v61, %v5112_v46 }
  0xea   : > { %v3441_v35 = vsel %vm474_vm10, 1.0, %v4189_v37  ;;  %v3507_v34 = vsel %vm828_vm11, 1.0, %v4189_v37  ;;  %v3573_v47 = vsel %vm1177_vm13, 1.0, %v4189_v37  ;;  %v2494_v25 = vadd.f32 %v2430_v14, %v2157_v20 }
  0xeb   : > { %v673_v58 = vmul.f32 %v3441_v35, %v4451_v8  ;;  %v1027_v33 = vmul.f32 %v3507_v34, %v4458_v12  ;;  %v1376_v19 = vmul.f32 %v3573_v47, %v4490_v38  ;;  %v3638_v9 = vsel %vm1514_vm14, 1.0, %v4189_v37 }
  0xec   : > { %vm1855_vm7 = vcmp.eq.s32.totalorder %v4540_v62, %v5112_v46  ;;  %vm2192_vm12 = vcmp.eq.s32.totalorder %v4543_v1, %v5112_v46  ;;  %vm2532_vm15 = vcmp.eq.s32.totalorder %v4596_v10, %v5112_v46  ;;  %v2834_v45 = vadd.f32 %v2770_v26, %v2494_v25 }
  0xed   : > { %v1091_v57 = vadd.f32 %v1027_v33, %v673_v58  ;;  %v1713_v14 = vmul.f32 %v3638_v9, %v4499_v23  ;;  %v3703_v0 = vsel %vm1855_vm7, 1.0, %v4189_v37  ;;  %vm1182_vm0 = vcmp.eq.s32.totalorder %v4878_v55, %v4681_v40 }
  0xee   : > { %v2054_v50 = vmul.f32 %v3703_v0, %v4501_v43  ;;  %v3768_v44 = vsel %vm2192_vm12, 1.0, %v4189_v37  ;;  %v3833_v11 = vsel %vm2532_vm15, 1.0, %v4189_v37  ;;  %vm2869_vm1 = vcmp.eq.s32.totalorder %v4601_v54, %v5112_v46 }
  0xef   : > { %v3171_v49 = vadd.f32 %v3107_v17, %v2834_v45  ;;  %v1440_v20 = vadd.f32 %v1376_v19, %v1091_v57  ;;  %v2391_v26 = vmul.f32 %v3768_v44, %v4545_v2  ;;  %v2731_v35 = vmul.f32 %v3833_v11, %v4586_v39 }
  0xf0   : > { %v3898_v34 = vsel %vm2869_vm1, 1.0, %v4189_v37  ;;  %vm506_vm2 = vcmp.eq.s32.totalorder %v4463_v16, %v5119_v41  ;;  %vm860_vm3 = vcmp.eq.s32.totalorder %v4497_v42, %v5119_v41  ;;  %vm1209_vm4 = vcmp.eq.s32.totalorder %v4536_v59, %v5119_v41 }
  0xf1   : > { %3204 = vmatpush.msra.mxu1 %v3171_v49  ;;  %v1777_v47 = vadd.f32 %v1713_v14, %v1440_v20  ;;  %v3068_v17 = vmul.f32 %v3898_v34, %v4607_v6  ;;  %v3473_v25 = vsel %vm506_vm2, 1.0, %v4189_v37  ;;  %v3539_v58 = vsel %vm860_vm3, 1.0, %v4189_v37 }
  0xf2   : > { %v705_v33 = vmul.f32 %v3473_v25, %v4451_v8  ;;  %v1059_v19 = vmul.f32 %v3539_v58, %v4458_v12  ;;  %v3605_v9 = vsel %vm1209_vm4, 1.0, %v4189_v37  ;;  %vm1546_vm8 = vcmp.eq.s32.totalorder %v4538_v61, %v5119_v41 }
  0xf3   : > { %v2118_v45 = vadd.f32 %v2054_v50, %v1777_v47  ;;  %v1408_v57 = vmul.f32 %v3605_v9, %v4490_v38  ;;  %v3670_v14 = vsel %vm1546_vm8, 1.0, %v4189_v37  ;;  %vm1887_vm5 = vcmp.eq.s32.totalorder %v4540_v62, %v5119_v41 }
  0xf4   : > { %v1123_v0 = vadd.f32 %v1059_v19, %v705_v33  ;;  %v1745_v44 = vmul.f32 %v3670_v14, %v4499_v23  ;;  %v3735_v11 = vsel %vm1887_vm5, 1.0, %v4189_v37  ;;  %vm2224_vm9 = vcmp.eq.s32.totalorder %v4543_v1, %v5119_v41 }
  0xf5   : > { %v2455_v49 = vadd.f32 %v2391_v26, %v2118_v45  ;;  %v2086_v20 = vmul.f32 %v3735_v11, %v4501_v43  ;;  %v3800_v50 = vsel %vm2224_vm9, 1.0, %v4189_v37  ;;  %vm2564_vm6 = vcmp.eq.s32.totalorder %v4596_v10, %v5119_v41 }
  0xf6   : > { %v1472_v34 = vadd.f32 %v1408_v57, %v1123_v0  ;;  %v2423_v47 = vmul.f32 %v3800_v50, %v4545_v2  ;;  %v3865_v25 = vsel %vm2564_vm6, 1.0, %v4189_v37  ;;  %vm2901_vm10 = vcmp.eq.s32.totalorder %v4601_v54, %v5119_v41 }
  0xf7   : > { %v2795_v58 = vadd.f32 %v2731_v35, %v2455_v49  ;;  %v2763_v33 = vmul.f32 %v3865_v25, %v4586_v39  ;;  %v3930_v26 = vsel %vm2901_vm10, 1.0, %v4189_v37  ;;  %v1032_v19 = vmul.f32 %v3512_v31, %v4876_v51 }
  0xf8   : > { %v1809_v9 = vadd.f32 %v1745_v44, %v1472_v34  ;;  %v3100_v45 = vmul.f32 %v3930_v26, %v4607_v6  ;;  %v3578_v57 = vsel %vm1182_vm0, 1.0, %v4189_v37  ;;  %vm1519_vm11 = vcmp.eq.s32.totalorder %v4889_v22, %v4681_v40 }
  0xf9   : > { %v3132_v14 = vadd.f32 %v3068_v17, %v2795_v58  ;;  %v1096_v35 = vadd.f32 %v1032_v19, %v5122_v7  ;;  %v1381_v0 = vmul.f32 %v3578_v57, %v4880_v56  ;;  %v3643_v11 = vsel %vm1519_vm11, 1.0, %v4189_v37 }
  0xfa   : > { %v2150_v49 = vadd.f32 %v2086_v20, %v1809_v9  ;;  %v1718_v31 = vmul.f32 %v3643_v11, %v4891_v24  ;;  %vm1860_vm13 = vcmp.eq.s32.totalorder %v4895_v36, %v4681_v40  ;;  %vm2197_vm14 = vcmp.eq.s32.totalorder %v4902_v30, %v4681_v40 }
  0xfb   : > { %3228 = vmatpush.msra.mxu2 %v3132_v14  ;;  %v1445_v44 = vadd.f32 %v1381_v0, %v1096_v35  ;;  %v3708_v50 = vsel %vm1860_vm13, 1.0, %v4189_v37  ;;  %v3773_v17 = vsel %vm2197_vm14, 1.0, %v4189_v37  ;;  %vm2537_vm7 = vcmp.eq.s32.totalorder %v4921_v13, %v4681_v40 }
  0xfc   : > { %v2487_v7 = vadd.f32 %v2423_v47, %v2150_v49  ;;  %v2059_v20 = vmul.f32 %v3708_v50, %v4900_v21  ;;  %v2396_v34 = vmul.f32 %v3773_v17, %v4914_v53  ;;  %v3838_v25 = vsel %vm2537_vm7, 1.0, %v4189_v37 }
  0xfd   : > { %v1782_v58 = vadd.f32 %v1718_v31, %v1445_v44  ;;  %v2736_v26 = vmul.f32 %v3838_v25, %v4927_v60  ;;  %vm2874_vm12 = vcmp.eq.s32.totalorder %v4929_v32, %v4681_v40  ;;  %vm511_vm15 = vcmp.eq.s32.totalorder %v4858_v52, %v4684_v63 }
  0xfe   : > { %v2827_v19 = vadd.f32 %v2763_v33, %v2487_v7  ;;  %v3903_v9 = vsel %vm2874_vm12, 1.0, %v4189_v37  ;;  %v3478_v47 = vsel %vm511_vm15, 1.0, %v4189_v37  ;;  %vm865_vm0 = vcmp.eq.s32.totalorder %v4863_v15, %v4684_v63 }
  0xff   : > { %v2123_v57 = vadd.f32 %v2059_v20, %v1782_v58  ;;  %v3073_v14 = vmul.f32 %v3903_v9, %v4931_v3  ;;  %v710_v35 = vmul.f32 %v3478_v47, %v4861_v18  ;;  %v3544_v0 = vsel %vm865_vm0, 1.0, %v4189_v37 }
 0x100   : > { %v3164_v11 = vadd.f32 %v3100_v45, %v2827_v19  ;;  %v1064_v40 = vmul.f32 %v3544_v0, %v4876_v51  ;;  %vm1214_vm1 = vcmp.eq.s32.totalorder %v4878_v55, %v4684_v63  ;;  %vm1551_vm2 = vcmp.eq.s32.totalorder %v4889_v22, %v4684_v63 }
 0x101   : > { %v2460_v33 = vadd.f32 %v2396_v34, %v2123_v57  ;;  %v3610_v49 = vsel %vm1214_vm1, 1.0, %v4189_v37  ;;  %v3675_v31 = vsel %vm1551_vm2, 1.0, %v4189_v37  ;;  %vm1892_vm3 = vcmp.eq.s32.totalorder %v4895_v36, %v4684_v63 }
 0x102   : > { %3248 = vmatpush.msra.mxu3 %v3164_v11  ;;  %v1128_v44 = vadd.f32 %v1064_v40, %v710_v35  ;;  %v1413_v45 = vmul.f32 %v3610_v49, %v4880_v56  ;;  %v1750_v50 = vmul.f32 %v3675_v31, %v4891_v24  ;;  %v3740_v17 = vsel %vm1892_vm3, 1.0, %v4189_v37 }
 0x103   : > { %v2800_v7 = vadd.f32 %v2736_v26, %v2460_v33  ;;  %v2091_v20 = vmul.f32 %v3740_v17, %v4900_v21  ;;  %vm2229_vm4 = vcmp.eq.s32.totalorder %v4902_v30, %v4684_v63  ;;  %vm2569_vm8 = vcmp.eq.s32.totalorder %v4921_v13, %v4684_v63 }
 0x104   : > { %v1477_v34 = vadd.f32 %v1413_v45, %v1128_v44  ;;  %v3805_v25 = vsel %vm2229_vm4, 1.0, %v4189_v37  ;;  %v3870_v58 = vsel %vm2569_vm8, 1.0, %v4189_v37  ;;  %vm2906_vm5 = vcmp.eq.s32.totalorder %v4929_v32, %v4684_v63 }
 0x105   : > { %v3137_v19 = vadd.f32 %v3073_v14, %v2800_v7  ;;  %v2428_v9 = vmul.f32 %v3805_v25, %v4914_v53  ;;  %v2768_v26 = vmul.f32 %v3870_v58, %v4927_v60  ;;  %v3935_v47 = vsel %vm2906_vm5, 1.0, %v4189_v37 }
 0x106   : > { %v1814_v57 = vadd.f32 %v1750_v50, %v1477_v34  ;;  %v3105_v35 = vmul.f32 %v3935_v47, %v4931_v3  ;;  %v355_v0 = vadd.s32 72, %v4336_v4  ;;  %v371_v11 = vadd.s32 200, %v4336_v4 }
 0x107   : > { %3185 = vmatpush.msra.mxu0 %v3137_v19  ;;  %vm477_vm9 = vcmp.eq.s32.totalorder %v4858_v52, %v4688_v29  ;;  %vm831_vm6 = vcmp.eq.s32.totalorder %v4863_v15, %v4688_v29  ;;  %vm1180_vm10 = vcmp.eq.s32.totalorder %v4878_v55, %v4688_v29  ;;  %vm1517_vm11 = vcmp.eq.s32.totalorder %v4889_v22, %v4688_v29 }
 0x108   : > { %v2155_v63 = vadd.f32 %v2091_v20, %v1814_v57  ;;  %v5261_v14 = vadd.s32 %v4338_v5, %v355_v0  ;;  %v5264_v40 = vadd.s32 %v4338_v5, %v371_v11  ;;  %v3444_v33 = vsel %vm477_vm9, 1.0, %v4189_v37 }
 0x109   : > { %v5268_v49 = vmul.f32 %v3444_v33, %v4861_v18  ;;  %v3510_v31 = vsel %vm831_vm6, 1.0, %v4189_v37  ;;  %v3576_v44 = vsel %vm1180_vm10, 1.0, %v4189_v37  ;;  %v5273_v45 = vsel %vm1517_vm11, 1.0, %v4189_v37 }
 0x10a   : > { %6961 = vst [vmem:[#allocation16_spill] sm:$0xff] %v5261_v14  ;;  %v2492_v50 = vadd.f32 %v2428_v9, %v2155_v63  ;;  %vm472_vm13 = vcmp.eq.s32.totalorder %v4463_v16, %v5261_v14  ;;  %vm826_vm14 = vcmp.eq.s32.totalorder %v4497_v42, %v5261_v14  ;;  %vm1175_vm7 = vcmp.eq.s32.totalorder %v4536_v59, %v5261_v14 }
 0x10b   : > { %v3439_v17 = vsel %vm472_vm13, 1.0, %v4189_v37  ;;  %v3505_v7 = vsel %vm826_vm14, 1.0, %v4189_v37  ;;  %v3571_v20 = vsel %vm1175_vm7, 1.0, %v4189_v37  ;;  %vm1512_vm12 = vcmp.eq.s32.totalorder %v4538_v61, %v5261_v14 }
 0x10c   : > { %v2832_v34 = vadd.f32 %v2768_v26, %v2492_v50  ;;  %v671_v25 = vmul.f32 %v3439_v17, %v4451_v8  ;;  %v1025_v58 = vmul.f32 %v3505_v7, %v4458_v12  ;;  %v1374_v19 = vmul.f32 %v3571_v20, %v4490_v38 }
 0x10d   : > { %v3636_v9 = vsel %vm1512_vm12, 1.0, %v4189_v37  ;;  %vm1853_vm15 = vcmp.eq.s32.totalorder %v4540_v62, %v5261_v14  ;;  %vm2190_vm0 = vcmp.eq.s32.totalorder %v4543_v1, %v5261_v14  ;;  %vm2530_vm1 = vcmp.eq.s32.totalorder %v4596_v10, %v5261_v14 }
 0x10e   : > { %v3169_v47 = vadd.f32 %v3105_v35, %v2832_v34  ;;  %v1089_v57 = vadd.f32 %v1025_v58, %v671_v25  ;;  %v1711_v26 = vmul.f32 %v3636_v9, %v4499_v23  ;;  %v3701_v0 = vsel %vm1853_vm15, 1.0, %v4189_v37 }
 0x10f   : > { %v2052_v11 = vmul.f32 %v3701_v0, %v4501_v43  ;;  %v3766_v63 = vsel %vm2190_vm0, 1.0, %v4189_v37  ;;  %v3831_v33 = vsel %vm2530_vm1, 1.0, %v4189_v37  ;;  %vm2867_vm2 = vcmp.eq.s32.totalorder %v4601_v54, %v5261_v14 }
 0x110   : > { %3205 = vmatpush.msra.mxu1 %v3169_v47  ;;  %v1438_v50 = vadd.f32 %v1374_v19, %v1089_v57  ;;  %v2389_v17 = vmul.f32 %v3766_v63, %v4545_v2  ;;  %v2729_v35 = vmul.f32 %v3831_v33, %v4586_v39  ;;  %v3896_v7 = vsel %vm2867_vm2, 1.0, %v4189_v37 }
 0x111   : > { %v3066_v20 = vmul.f32 %v3896_v7, %v4607_v6  ;;  %vm504_vm3 = vcmp.eq.s32.totalorder %v4463_v16, %v5264_v40  ;;  %vm858_vm4 = vcmp.eq.s32.totalorder %v4497_v42, %v5264_v40  ;;  %vm1207_vm8 = vcmp.eq.s32.totalorder %v4536_v59, %v5264_v40 }
 0x112   : > { %v1775_v34 = vadd.f32 %v1711_v26, %v1438_v50  ;;  %v3471_v25 = vsel %vm504_vm3, 1.0, %v4189_v37  ;;  %v3537_v58 = vsel %vm858_vm4, 1.0, %v4189_v37  ;;  %v3603_v19 = vsel %vm1207_vm8, 1.0, %v4189_v37 }
 0x113   : > { %v703_v9 = vmul.f32 %v3471_v25, %v4451_v8  ;;  %v1057_v47 = vmul.f32 %v3537_v58, %v4458_v12  ;;  %v1406_v57 = vmul.f32 %v3603_v19, %v4490_v38  ;;  %vm1544_vm5 = vcmp.eq.s32.totalorder %v4538_v61, %v5264_v40 }
 0x114   : > { %v2116_v0 = vadd.f32 %v2052_v11, %v1775_v34  ;;  %v3668_v63 = vsel %vm1544_vm5, 1.0, %v4189_v37  ;;  %vm1885_vm9 = vcmp.eq.s32.totalorder %v4540_v62, %v5264_v40  ;;  %vm2222_vm6 = vcmp.eq.s32.totalorder %v4543_v1, %v5264_v40 }
 0x115   : > { %v1121_v26 = vadd.f32 %v1057_v47, %v703_v9  ;;  %v1743_v33 = vmul.f32 %v3668_v63, %v4499_v23  ;;  %v3733_v50 = vsel %vm1885_vm9, 1.0, %v4189_v37  ;;  %v3798_v7 = vsel %vm2222_vm6, 1.0, %v4189_v37 }
 0x116   : > { %v2453_v25 = vadd.f32 %v2389_v17, %v2116_v0  ;;  %v2084_v58 = vmul.f32 %v3733_v50, %v4501_v43  ;;  %v2421_v11 = vmul.f32 %v3798_v7, %v4545_v2  ;;  %vm2562_vm10 = vcmp.eq.s32.totalorder %v4596_v10, %v5264_v40 }
 0x117   : > { %v1470_v34 = vadd.f32 %v1406_v57, %v1121_v26  ;;  %v3863_v19 = vsel %vm2562_vm10, 1.0, %v4189_v37  ;;  %vm2899_vm11 = vcmp.eq.s32.totalorder %v4601_v54, %v5264_v40  ;;  %v1030_v9 = vmul.f32 %v3510_v31, %v4876_v51 }
 0x118   : > { %v2793_v47 = vadd.f32 %v2729_v35, %v2453_v25  ;;  %v2761_v63 = vmul.f32 %v3863_v19, %v4586_v39  ;;  %v3928_v17 = vsel %vm2899_vm11, 1.0, %v4189_v37  ;;  %v1379_v0 = vmul.f32 %v3576_v44, %v4880_v56 }
 0x119   : > { %v1807_v50 = vadd.f32 %v1743_v33, %v1470_v34  ;;  %v3098_v7 = vmul.f32 %v3928_v17, %v4607_v6  ;;  %v1094_v14 = vadd.f32 %v1030_v9, %v5268_v49  ;;  %v1716_v57 = vmul.f32 %v5273_v45, %v4891_v24 }
 0x11a   : > { %v3130_v26 = vadd.f32 %v3066_v20, %v2793_v47  ;;  %vm1858_vm13 = vcmp.eq.s32.totalorder %v4895_v36, %v4688_v29  ;;  %vm2195_vm14 = vcmp.eq.s32.totalorder %v4902_v30, %v4688_v29  ;;  %vm2535_vm7 = vcmp.eq.s32.totalorder %v4921_v13, %v4688_v29 }
 0x11b   : > { %v2148_v31 = vadd.f32 %v2084_v58, %v1807_v50  ;;  %v1443_v44 = vadd.f32 %v1379_v0, %v1094_v14  ;;  %v3706_v35 = vsel %vm1858_vm13, 1.0, %v4189_v37  ;;  %v3771_v33 = vsel %vm2195_vm14, 1.0, %v4189_v37 }
 0x11c   : > { %3229 = vmatpush.msra.mxu2 %v3130_v26  ;;  %v2057_v49 = vmul.f32 %v3706_v35, %v4900_v21  ;;  %v2394_v45 = vmul.f32 %v3771_v33, %v4914_v53  ;;  %v3836_v20 = vsel %vm2535_vm7, 1.0, %v4189_v37  ;;  %vm2872_vm12 = vcmp.eq.s32.totalorder %v4929_v32, %v4688_v29 }
 0x11d   : > { %v2485_v25 = vadd.f32 %v2421_v11, %v2148_v31  ;;  %v1780_v34 = vadd.f32 %v1716_v57, %v1443_v44  ;;  %v2734_v19 = vmul.f32 %v3836_v20, %v4927_v60  ;;  %v3901_v14 = vsel %vm2872_vm12, 1.0, %v4189_v37 }
 0x11e   : > { %v3071_v58 = vmul.f32 %v3901_v14, %v4931_v3  ;;  %vm509_vm15 = vcmp.eq.s32.totalorder %v4858_v52, %v4822_v28  ;;  %vm863_vm0 = vcmp.eq.s32.totalorder %v4863_v15, %v4822_v28  ;;  %vm1212_vm1 = vcmp.eq.s32.totalorder %v4878_v55, %v4822_v28 }
 0x11f   : > { %v2825_v9 = vadd.f32 %v2761_v63, %v2485_v25  ;;  %v2121_v47 = vadd.f32 %v2057_v49, %v1780_v34  ;;  %v3476_v29 = vsel %vm509_vm15, 1.0, %v4189_v37  ;;  %v3542_v11 = vsel %vm863_vm0, 1.0, %v4189_v37 }
 0x120   : > { %v708_v17 = vmul.f32 %v3476_v29, %v4861_v18  ;;  %v1062_v0 = vmul.f32 %v3542_v11, %v4876_v51  ;;  %v3608_v50 = vsel %vm1212_vm1, 1.0, %v4189_v37  ;;  %vm1549_vm2 = vcmp.eq.s32.totalorder %v4889_v22, %v4822_v28 }
 0x121   : > { %v3162_v57 = vadd.f32 %v3098_v7, %v2825_v9  ;;  %v2458_v26 = vadd.f32 %v2394_v45, %v2121_v47  ;;  %v1411_v31 = vmul.f32 %v3608_v50, %v4880_v56  ;;  %v3673_v63 = vsel %vm1549_vm2, 1.0, %v4189_v37 }
 0x122   : > { %v1126_v44 = vadd.f32 %v1062_v0, %v708_v17  ;;  %v1748_v35 = vmul.f32 %v3673_v63, %v4891_v24  ;;  %vm1890_vm3 = vcmp.eq.s32.totalorder %v4895_v36, %v4822_v28  ;;  %vm2227_vm4 = vcmp.eq.s32.totalorder %v4902_v30, %v4822_v28 }
 0x123   : > { %3249 = vmatpush.msra.mxu3 %v3162_v57  ;;  %v2798_v33 = vadd.f32 %v2734_v19, %v2458_v26  ;;  %v3738_v49 = vsel %vm1890_vm3, 1.0, %v4189_v37  ;;  %v3803_v7 = vsel %vm2227_vm4, 1.0, %v4189_v37  ;;  %vm2567_vm8 = vcmp.eq.s32.totalorder %v4921_v13, %v4822_v28 }
 0x124   : > { %v1475_v45 = vadd.f32 %v1411_v31, %v1126_v44  ;;  %v2089_v20 = vmul.f32 %v3738_v49, %v4900_v21  ;;  %v2426_v25 = vmul.f32 %v3803_v7, %v4914_v53  ;;  %v3868_v34 = vsel %vm2567_vm8, 1.0, %v4189_v37 }
 0x125   : > { %v3135_v14 = vadd.f32 %v3071_v58, %v2798_v33  ;;  %v2766_v9 = vmul.f32 %v3868_v34, %v4927_v60  ;;  %vm2904_vm5 = vcmp.eq.s32.totalorder %v4929_v32, %v4822_v28  ;;  %v354_v19 = vadd.s32 64, %v4336_v4 }
 0x126   : > { %v1812_v47 = vadd.f32 %v1748_v35, %v1475_v45  ;;  %v3933_v29 = vsel %vm2904_vm5, 1.0, %v4189_v37  ;;  %v370_v11 = vadd.s32 192, %v4336_v4  ;;  %vm475_vm9 = vcmp.eq.s32.totalorder %v4858_v52, %v4974_v27 }
 0x127   : > { %3186 = vmatpush.msra.mxu0 %v3135_v14  ;;  %v3103_v17 = vmul.f32 %v3933_v29, %v4931_v3  ;;  %v5397_v58 = vadd.s32 %v4338_v5, %v354_v19  ;;  %v3442_v0 = vsel %vm475_vm9, 1.0, %v4189_v37  ;;  %vm829_vm6 = vcmp.eq.s32.totalorder %v4863_v15, %v4974_v27 }
 0x128   : > { %v2153_v28 = vadd.f32 %v2089_v20, %v1812_v47  ;;  %v5403_v50 = vadd.s32 %v4338_v5, %v370_v11  ;;  %v5406_v57 = vmul.f32 %v3442_v0, %v4861_v18  ;;  %v3508_v26 = vsel %vm829_vm6, 1.0, %v4189_v37 }
 0x129   : > { %vm470_vm10 = vcmp.eq.s32.totalorder %v4463_v16, %v5397_v58  ;;  %vm824_vm11 = vcmp.eq.s32.totalorder %v4497_v42, %v5397_v58  ;;  %vm1173_vm13 = vcmp.eq.s32.totalorder %v4536_v59, %v5397_v58  ;;  %vm1510_vm14 = vcmp.eq.s32.totalorder %v4538_v61, %v5397_v58 }
 0x12a   : > { %v2490_v31 = vadd.f32 %v2426_v25, %v2153_v28  ;;  %v3437_v63 = vsel %vm470_vm10, 1.0, %v4189_v37  ;;  %v3503_v44 = vsel %vm824_vm11, 1.0, %v4189_v37  ;;  %v3569_v35 = vsel %vm1173_vm13, 1.0, %v4189_v37 }
 0x12b   : > { %v669_v33 = vmul.f32 %v3437_v63, %v4451_v8  ;;  %v1023_v49 = vmul.f32 %v3503_v44, %v4458_v12  ;;  %v1372_v7 = vmul.f32 %v3569_v35, %v4490_v38  ;;  %v3634_v45 = vsel %vm1510_vm14, 1.0, %v4189_v37 }
 0x12c   : > { %v2830_v20 = vadd.f32 %v2766_v9, %v2490_v31  ;;  %v1709_v34 = vmul.f32 %v3634_v45, %v4499_v23  ;;  %vm1851_vm7 = vcmp.eq.s32.totalorder %v4540_v62, %v5397_v58  ;;  %vm2188_vm12 = vcmp.eq.s32.totalorder %v4543_v1, %v5397_v58 }
 0x12d   : > { %v1087_v25 = vadd.f32 %v1023_v49, %v669_v33  ;;  %v3699_v14 = vsel %vm1851_vm7, 1.0, %v4189_v37  ;;  %v3764_v19 = vsel %vm2188_vm12, 1.0, %v4189_v37  ;;  %vm2528_vm15 = vcmp.eq.s32.totalorder %v4596_v10, %v5397_v58 }
 0x12e   : > { %v3167_v47 = vadd.f32 %v3103_v17, %v2830_v20  ;;  %v2050_v29 = vmul.f32 %v3699_v14, %v4501_v43  ;;  %v2387_v9 = vmul.f32 %v3764_v19, %v4545_v2  ;;  %v3829_v11 = vsel %vm2528_vm15, 1.0, %v4189_v37 }
 0x12f   : > { %v1436_v0 = vadd.f32 %v1372_v7, %v1087_v25  ;;  %v2727_v28 = vmul.f32 %v3829_v11, %v4586_v39  ;;  %vm2865_vm0 = vcmp.eq.s32.totalorder %v4601_v54, %v5397_v58  ;;  %vm502_vm1 = vcmp.eq.s32.totalorder %v4463_v16, %v5403_v50 }
 0x130   : > { %3206 = vmatpush.msra.mxu1 %v3167_v47  ;;  %v3894_v31 = vsel %vm2865_vm0, 1.0, %v4189_v37  ;;  %v3469_v17 = vsel %vm502_vm1, 1.0, %v4189_v37  ;;  %vm856_vm2 = vcmp.eq.s32.totalorder %v4497_v42, %v5403_v50  ;;  %vm1205_vm3 = vcmp.eq.s32.totalorder %v4536_v59, %v5403_v50 }
 0x131   : > { %v1773_v63 = vadd.f32 %v1709_v34, %v1436_v0  ;;  %v3064_v44 = vmul.f32 %v3894_v31, %v4607_v6  ;;  %v701_v35 = vmul.f32 %v3469_v17, %v4451_v8  ;;  %v3535_v33 = vsel %vm856_vm2, 1.0, %v4189_v37 }
 0x132   : > { %v1055_v49 = vmul.f32 %v3535_v33, %v4458_v12  ;;  %v3601_v7 = vsel %vm1205_vm3, 1.0, %v4189_v37  ;;  %vm1542_vm4 = vcmp.eq.s32.totalorder %v4538_v61, %v5403_v50  ;;  %vm1883_vm8 = vcmp.eq.s32.totalorder %v4540_v62, %v5403_v50 }
 0x133   : > { %v2114_v45 = vadd.f32 %v2050_v29, %v1773_v63  ;;  %v1404_v20 = vmul.f32 %v3601_v7, %v4490_v38  ;;  %v3666_v34 = vsel %vm1542_vm4, 1.0, %v4189_v37  ;;  %v3731_v25 = vsel %vm1883_vm8, 1.0, %v4189_v37 }
 0x134   : > { %v1119_v14 = vadd.f32 %v1055_v49, %v701_v35  ;;  %v1741_v19 = vmul.f32 %v3666_v34, %v4499_v23  ;;  %v2082_v47 = vmul.f32 %v3731_v25, %v4501_v43  ;;  %vm2220_vm5 = vcmp.eq.s32.totalorder %v4543_v1, %v5403_v50 }
 0x135   : > { %v2451_v11 = vadd.f32 %v2387_v9, %v2114_v45  ;;  %v3796_v0 = vsel %vm2220_vm5, 1.0, %v4189_v37  ;;  %vm2560_vm9 = vcmp.eq.s32.totalorder %v4596_v10, %v5403_v50  ;;  %vm2897_vm6 = vcmp.eq.s32.totalorder %v4601_v54, %v5403_v50 }
 0x136   : > { %v1468_v29 = vadd.f32 %v1404_v20, %v1119_v14  ;;  %v2419_v31 = vmul.f32 %v3796_v0, %v4545_v2  ;;  %v3861_v17 = vsel %vm2560_vm9, 1.0, %v4189_v37  ;;  %v3926_v63 = vsel %vm2897_vm6, 1.0, %v4189_v37 }
 0x137   : > { %v2791_v35 = vadd.f32 %v2727_v28, %v2451_v11  ;;  %v2759_v33 = vmul.f32 %v3861_v17, %v4586_v39  ;;  %v3096_v9 = vmul.f32 %v3926_v63, %v4607_v6  ;;  %v1028_v49 = vmul.f32 %v3508_v26, %v4876_v51 }
 0x138   : > { %v1805_v7 = vadd.f32 %v1741_v19, %v1468_v29  ;;  %vm1178_vm10 = vcmp.eq.s32.totalorder %v4878_v55, %v4974_v27  ;;  %vm1515_vm11 = vcmp.eq.s32.totalorder %v4889_v22, %v4974_v27  ;;  %vm1856_vm13 = vcmp.eq.s32.totalorder %v4895_v36, %v4974_v27 }
 0x139   : > { %v3128_v45 = vadd.f32 %v3064_v44, %v2791_v35  ;;  %v1092_v20 = vadd.f32 %v1028_v49, %v5406_v57  ;;  %v3574_v28 = vsel %vm1178_vm10, 1.0, %v4189_v37  ;;  %v3639_v34 = vsel %vm1515_vm11, 1.0, %v4189_v37 }
 0x13a   : > { %v2146_v25 = vadd.f32 %v2082_v47, %v1805_v7  ;;  %v1377_v26 = vmul.f32 %v3574_v28, %v4880_v56  ;;  %v1714_v14 = vmul.f32 %v3639_v34, %v4891_v24  ;;  %v3704_v19 = vsel %vm1856_vm13, 1.0, %v4189_v37 }
 0x13b   : > { %3230 = vmatpush.msra.mxu2 %v3128_v45  ;;  %v2055_v11 = vmul.f32 %v3704_v19, %v4900_v21  ;;  %vm2193_vm14 = vcmp.eq.s32.totalorder %v4902_v30, %v4974_v27  ;;  %vm2533_vm7 = vcmp.eq.s32.totalorder %v4921_v13, %v4974_v27  ;;  %vm2870_vm12 = vcmp.eq.s32.totalorder %v4929_v32, %v4974_v27 }
 0x13c   : > { %v2483_v57 = vadd.f32 %v2419_v31, %v2146_v25  ;;  %v1441_v44 = vadd.f32 %v1377_v26, %v1092_v20  ;;  %v3769_v47 = vsel %vm2193_vm14, 1.0, %v4189_v37  ;;  %v3834_v0 = vsel %vm2533_vm7, 1.0, %v4189_v37 }
 0x13d   : > { %v2392_v29 = vmul.f32 %v3769_v47, %v4914_v53  ;;  %v2732_v17 = vmul.f32 %v3834_v0, %v4927_v60  ;;  %vm507_vm15 = vcmp.eq.s32.totalorder %v4858_v52, %v4980_v48  ;;  %v3899_v49 = vsel %vm2870_vm12, 1.0, %v4189_v37 }
 0x13e   : > { %v2823_v63 = vadd.f32 %v2759_v33, %v2483_v57  ;;  %v1778_v35 = vadd.f32 %v1714_v14, %v1441_v44  ;;  %v3474_v7 = vsel %vm507_vm15, 1.0, %v4189_v37  ;;  %vm861_vm0 = vcmp.eq.s32.totalorder %v4863_v15, %v4980_v48 }
 0x13f   : > { %v706_v27 = vmul.f32 %v3474_v7, %v4861_v18  ;;  %vm1210_vm1 = vcmp.eq.s32.totalorder %v4878_v55, %v4980_v48  ;;  %vm1547_vm2 = vcmp.eq.s32.totalorder %v4889_v22, %v4980_v48  ;;  %v3540_v33 = vsel %vm861_vm0, 1.0, %v4189_v37 }
 0x140   : > { %v3160_v31 = vadd.f32 %v3096_v9, %v2823_v63  ;;  %v2119_v45 = vadd.f32 %v2055_v11, %v1778_v35  ;;  %v3606_v20 = vsel %vm1210_vm1, 1.0, %v4189_v37  ;;  %v1060_v28 = vmul.f32 %v3540_v33, %v4876_v51 }
 0x141   : > { %v1409_v34 = vmul.f32 %v3606_v20, %v4880_v56  ;;  %v3671_v25 = vsel %vm1547_vm2, 1.0, %v4189_v37  ;;  %vm1888_vm3 = vcmp.eq.s32.totalorder %v4895_v36, %v4980_v48  ;;  %v3069_v14 = vmul.f32 %v3899_v49, %v4931_v3 }
 0x142   : > { %3250 = vmatpush.msra.mxu3 %v3160_v31  ;;  %v2456_v26 = vadd.f32 %v2392_v29, %v2119_v45  ;;  %v3736_v9 = vsel %vm1888_vm3, 1.0, %v4189_v37  ;;  %vm2225_vm4 = vcmp.eq.s32.totalorder %v4902_v30, %v4980_v48  ;;  %v1124_v19 = vadd.f32 %v1060_v28, %v706_v27 }
 0x143   : > { %v1746_v11 = vmul.f32 %v3671_v25, %v4891_v24  ;;  %v3801_v57 = vsel %vm2225_vm4, 1.0, %v4189_v37  ;;  %vm2565_vm8 = vcmp.eq.s32.totalorder %v4921_v13, %v4980_v48  ;;  %v2087_v47 = vmul.f32 %v3736_v9, %v4900_v21 }
 0x144   : > { %v2796_v44 = vadd.f32 %v2732_v17, %v2456_v26  ;;  %v3866_v0 = vsel %vm2565_vm8, 1.0, %v4189_v37  ;;  %vm2902_vm5 = vcmp.eq.s32.totalorder %v4929_v32, %v4980_v48  ;;  %v1473_v29 = vadd.f32 %v1409_v34, %v1124_v19 }
 0x145   : > { %v2424_v63 = vmul.f32 %v3801_v57, %v4914_v53  ;;  %v3931_v35 = vsel %vm2902_vm5, 1.0, %v4189_v37  ;;  %v353_v49 = vadd.s32 56, %v4336_v4  ;;  %v2764_v27 = vmul.f32 %v3866_v0, %v4927_v60 }
 0x146   : > { %v3133_v7 = vadd.f32 %v3069_v14, %v2796_v44  ;;  %v369_v31 = vadd.s32 184, %v4336_v4  ;;  %vm473_vm9 = vcmp.eq.s32.totalorder %v4858_v52, %v5112_v46  ;;  %v1810_v17 = vadd.f32 %v1746_v11, %v1473_v29 }
 0x147   : > { %v5535_v45 = vadd.s32 %v4338_v5, %v353_v49  ;;  %v3440_v48 = vsel %vm473_vm9, 1.0, %v4189_v37  ;;  %vm827_vm6 = vcmp.eq.s32.totalorder %v4863_v15, %v5112_v46  ;;  %v3101_v33 = vmul.f32 %v3931_v35, %v4931_v3 }
 0x148   : > { %3187 = vmatpush.msra.mxu0 %v3133_v7  ;;  %v5542_v20 = vadd.s32 %v4338_v5, %v369_v31  ;;  %v5545_v28 = vmul.f32 %v3440_v48, %v4861_v18  ;;  %v3506_v34 = vsel %vm827_vm6, 1.0, %v4189_v37  ;;  %v2151_v25 = vadd.f32 %v2087_v47, %v1810_v17 }
 0x149   : > { %vm468_vm10 = vcmp.eq.s32.totalorder %v4463_v16, %v5535_v45  ;;  %vm822_vm11 = vcmp.eq.s32.totalorder %v4497_v42, %v5535_v45  ;;  %vm1171_vm13 = vcmp.eq.s32.totalorder %v4536_v59, %v5535_v45  ;;  %vm1508_vm14 = vcmp.eq.s32.totalorder %v4538_v61, %v5535_v45 }
 0x14a   : > { %v3435_v26 = vsel %vm468_vm10, 1.0, %v4189_v37  ;;  %v3501_v14 = vsel %vm822_vm11, 1.0, %v4189_v37  ;;  %v3567_v9 = vsel %vm1171_vm13, 1.0, %v4189_v37  ;;  %v2488_v19 = vadd.f32 %v2424_v63, %v2151_v25 }
 0x14b   : > { %v667_v11 = vmul.f32 %v3435_v26, %v4451_v8  ;;  %v1021_v57 = vmul.f32 %v3501_v14, %v4458_v12  ;;  %v1370_v44 = vmul.f32 %v3567_v9, %v4490_v38  ;;  %v3632_v47 = vsel %vm1508_vm14, 1.0, %v4189_v37 }
 0x14c   : > { %vm1849_vm7 = vcmp.eq.s32.totalorder %v4540_v62, %v5535_v45  ;;  %vm2186_vm12 = vcmp.eq.s32.totalorder %v4543_v1, %v5535_v45  ;;  %vm2526_vm15 = vcmp.eq.s32.totalorder %v4596_v10, %v5535_v45  ;;  %v2828_v0 = vadd.f32 %v2764_v27, %v2488_v19 }
 0x14d   : > { %v1085_v29 = vadd.f32 %v1021_v57, %v667_v11  ;;  %v1707_v63 = vmul.f32 %v3632_v47, %v4499_v23  ;;  %v3697_v35 = vsel %vm1849_vm7, 1.0, %v4189_v37  ;;  %vm1176_vm0 = vcmp.eq.s32.totalorder %v4878_v55, %v5112_v46 }
 0x14e   : > { %v2048_v49 = vmul.f32 %v3697_v35, %v4501_v43  ;;  %v3762_v7 = vsel %vm2186_vm12, 1.0, %v4189_v37  ;;  %v3827_v31 = vsel %vm2526_vm15, 1.0, %v4189_v37  ;;  %vm2863_vm1 = vcmp.eq.s32.totalorder %v4601_v54, %v5535_v45 }
 0x14f   : > { %v3165_v17 = vadd.f32 %v3101_v33, %v2828_v0  ;;  %v1434_v48 = vadd.f32 %v1370_v44, %v1085_v29  ;;  %v2385_v27 = vmul.f32 %v3762_v7, %v4545_v2  ;;  %v2725_v25 = vmul.f32 %v3827_v31, %v4586_v39 }
 0x150   : > { %v3892_v26 = vsel %vm2863_vm1, 1.0, %v4189_v37  ;;  %vm500_vm2 = vcmp.eq.s32.totalorder %v4463_v16, %v5542_v20  ;;  %vm854_vm3 = vcmp.eq.s32.totalorder %v4497_v42, %v5542_v20  ;;  %vm1203_vm4 = vcmp.eq.s32.totalorder %v4536_v59, %v5542_v20 }
 0x151   : > { %3207 = vmatpush.msra.mxu1 %v3165_v17  ;;  %v1771_v14 = vadd.f32 %v1707_v63, %v1434_v48  ;;  %v3062_v33 = vmul.f32 %v3892_v26, %v4607_v6  ;;  %v3467_v9 = vsel %vm500_vm2, 1.0, %v4189_v37  ;;  %v3533_v19 = vsel %vm854_vm3, 1.0, %v4189_v37 }
 0x152   : > { %v699_v11 = vmul.f32 %v3467_v9, %v4451_v8  ;;  %v1053_v57 = vmul.f32 %v3533_v19, %v4458_v12  ;;  %v3599_v44 = vsel %vm1203_vm4, 1.0, %v4189_v37  ;;  %vm1540_vm8 = vcmp.eq.s32.totalorder %v4538_v61, %v5542_v20 }
 0x153   : > { %v2112_v47 = vadd.f32 %v2048_v49, %v1771_v14  ;;  %v1402_v0 = vmul.f32 %v3599_v44, %v4490_v38  ;;  %v3664_v29 = vsel %vm1540_vm8, 1.0, %v4189_v37  ;;  %vm1881_vm5 = vcmp.eq.s32.totalorder %v4540_v62, %v5542_v20 }
 0x154   : > { %v1117_v63 = vadd.f32 %v1053_v57, %v699_v11  ;;  %v1739_v35 = vmul.f32 %v3664_v29, %v4499_v23  ;;  %v3729_v7 = vsel %vm1881_vm5, 1.0, %v4189_v37  ;;  %vm2218_vm9 = vcmp.eq.s32.totalorder %v4543_v1, %v5542_v20 }
 0x155   : > { %v2449_v31 = vadd.f32 %v2385_v27, %v2112_v47  ;;  %v2080_v17 = vmul.f32 %v3729_v7, %v4501_v43  ;;  %v3794_v49 = vsel %vm2218_vm9, 1.0, %v4189_v37  ;;  %vm2558_vm6 = vcmp.eq.s32.totalorder %v4596_v10, %v5542_v20 }
 0x156   : > { %v1466_v48 = vadd.f32 %v1402_v0, %v1117_v63  ;;  %v2417_v26 = vmul.f32 %v3794_v49, %v4545_v2  ;;  %v3859_v14 = vsel %vm2558_vm6, 1.0, %v4189_v37  ;;  %vm2895_vm10 = vcmp.eq.s32.totalorder %v4601_v54, %v5542_v20 }
 0x157   : > { %v2789_v9 = vadd.f32 %v2725_v25, %v2449_v31  ;;  %v2757_v19 = vmul.f32 %v3859_v14, %v4586_v39  ;;  %v3924_v27 = vsel %vm2895_vm10, 1.0, %v4189_v37  ;;  %v1026_v11 = vmul.f32 %v3506_v34, %v4876_v51 }
 0x158   : > { %v1803_v57 = vadd.f32 %v1739_v35, %v1466_v48  ;;  %v3094_v44 = vmul.f32 %v3924_v27, %v4607_v6  ;;  %v3572_v47 = vsel %vm1176_vm0, 1.0, %v4189_v37  ;;  %vm1513_vm11 = vcmp.eq.s32.totalorder %v4889_v22, %v5112_v46 }
 0x159   : > { %v3126_v0 = vadd.f32 %v3062_v33, %v2789_v9  ;;  %v1090_v25 = vadd.f32 %v1026_v11, %v5545_v28  ;;  %v1375_v29 = vmul.f32 %v3572_v47, %v4880_v56  ;;  %v3637_v63 = vsel %vm1513_vm11, 1.0, %v4189_v37 }
 0x15a   : > { %v2144_v7 = vadd.f32 %v2080_v17, %v1803_v57  ;;  %v1712_v34 = vmul.f32 %v3637_v63, %v4891_v24  ;;  %vm1854_vm13 = vcmp.eq.s32.totalorder %v4895_v36, %v5112_v46  ;;  %vm2191_vm14 = vcmp.eq.s32.totalorder %v4902_v30, %v5112_v46 }
 0x15b   : > { %3231 = vmatpush.msra.mxu2 %v3126_v0  ;;  %v1439_v35 = vadd.f32 %v1375_v29, %v1090_v25  ;;  %v3702_v31 = vsel %vm1854_vm13, 1.0, %v4189_v37  ;;  %v3767_v33 = vsel %vm2191_vm14, 1.0, %v4189_v37  ;;  %vm2531_vm7 = vcmp.eq.s32.totalorder %v4921_v13, %v5112_v46 }
 0x15c   : > { %v2481_v28 = vadd.f32 %v2417_v26, %v2144_v7  ;;  %v2053_v17 = vmul.f32 %v3702_v31, %v4900_v21  ;;  %v2390_v49 = vmul.f32 %v3767_v33, %v4914_v53  ;;  %v3832_v48 = vsel %vm2531_vm7, 1.0, %v4189_v37 }
 0x15d   : > { %v1776_v14 = vadd.f32 %v1712_v34, %v1439_v35  ;;  %v2730_v9 = vmul.f32 %v3832_v48, %v4927_v60  ;;  %vm2868_vm12 = vcmp.eq.s32.totalorder %v4929_v32, %v5112_v46  ;;  %vm505_vm15 = vcmp.eq.s32.totalorder %v4858_v52, %v5119_v41 }
 0x15e   : > { %v2821_v27 = vadd.f32 %v2757_v19, %v2481_v28  ;;  %v3897_v11 = vsel %vm2868_vm12, 1.0, %v4189_v37  ;;  %v3472_v26 = vsel %vm505_vm15, 1.0, %v4189_v37  ;;  %vm859_vm0 = vcmp.eq.s32.totalorder %v4863_v15, %v5119_v41 }
 0x15f   : > { %v2117_v57 = vadd.f32 %v2053_v17, %v1776_v14  ;;  %v3067_v47 = vmul.f32 %v3897_v11, %v4931_v3  ;;  %v704_v0 = vmul.f32 %v3472_v26, %v4861_v18  ;;  %v3538_v25 = vsel %vm859_vm0, 1.0, %v4189_v37 }
 0x160   : > { %v3158_v29 = vadd.f32 %v3094_v44, %v2821_v27  ;;  %v1058_v46 = vmul.f32 %v3538_v25, %v4876_v51  ;;  %vm1208_vm1 = vcmp.eq.s32.totalorder %v4878_v55, %v5119_v41  ;;  %vm1545_vm2 = vcmp.eq.s32.totalorder %v4889_v22, %v5119_v41 }
 0x161   : > { %v2454_v19 = vadd.f32 %v2390_v49, %v2117_v57  ;;  %v3604_v63 = vsel %vm1208_vm1, 1.0, %v4189_v37  ;;  %v3669_v7 = vsel %vm1545_vm2, 1.0, %v4189_v37  ;;  %vm1886_vm3 = vcmp.eq.s32.totalorder %v4895_v36, %v5119_v41 }
 0x162   : > { %3251 = vmatpush.msra.mxu3 %v3158_v29  ;;  %v1122_v34 = vadd.f32 %v1058_v46, %v704_v0  ;;  %v1407_v44 = vmul.f32 %v3604_v63, %v4880_v56  ;;  %v1744_v35 = vmul.f32 %v3669_v7, %v4891_v24  ;;  %v3734_v31 = vsel %vm1886_vm3, 1.0, %v4189_v37  ;;  %v6962_v29 = vld [vmem:[#allocation16_spill] sm:$0xff] }
 0x163   : > { %v2794_v33 = vadd.f32 %v2730_v9, %v2454_v19  ;;  %v2085_v28 = vmul.f32 %v3734_v31, %v4900_v21  ;;  %vm2223_vm4 = vcmp.eq.s32.totalorder %v4902_v30, %v5119_v41  ;;  %vm2563_vm8 = vcmp.eq.s32.totalorder %v4921_v13, %v5119_v41 }
 0x164   : > { %v1471_v17 = vadd.f32 %v1407_v44, %v1122_v34  ;;  %v3799_v49 = vsel %vm2223_vm4, 1.0, %v4189_v37  ;;  %v3864_v48 = vsel %vm2563_vm8, 1.0, %v4189_v37  ;;  %vm2900_vm5 = vcmp.eq.s32.totalorder %v4929_v32, %v5119_v41 }
 0x165   : > { %v3131_v14 = vadd.f32 %v3067_v47, %v2794_v33  ;;  %v2422_v27 = vmul.f32 %v3799_v49, %v4914_v53  ;;  %v2762_v9 = vmul.f32 %v3864_v48, %v4927_v60  ;;  %v3929_v11 = vsel %vm2900_vm5, 1.0, %v4189_v37 }
 0x166   : > { %v1808_v26 = vadd.f32 %v1744_v35, %v1471_v17  ;;  %v3099_v57 = vmul.f32 %v3929_v11, %v4931_v3  ;;  %v352_v0 = vadd.s32 48, %v4336_v4  ;;  %v368_v25 = vadd.s32 176, %v4336_v4 }
 0x167   : > { %3188 = vmatpush.msra.mxu0 %v3131_v14  ;;  %vm471_vm9 = vcmp.eq.s32.totalorder %v4858_v52, %v6962_v29  ;;  %vm825_vm6 = vcmp.eq.s32.totalorder %v4863_v15, %v6962_v29  ;;  %vm1174_vm10 = vcmp.eq.s32.totalorder %v4878_v55, %v6962_v29  ;;  %vm1511_vm11 = vcmp.eq.s32.totalorder %v4889_v22, %v6962_v29 }
 0x168   : > { %v2149_v41 = vadd.f32 %v2085_v28, %v1808_v26  ;;  %v5684_v47 = vadd.s32 %v4338_v5, %v352_v0  ;;  %v5687_v46 = vadd.s32 %v4338_v5, %v368_v25  ;;  %v3438_v19 = vsel %vm471_vm9, 1.0, %v4189_v37 }
 0x169   : > { %v5691_v63 = vmul.f32 %v3438_v19, %v4861_v18  ;;  %v3504_v7 = vsel %vm825_vm6, 1.0, %v4189_v37  ;;  %v3570_v34 = vsel %vm1174_vm10, 1.0, %v4189_v37  ;;  %v5696_v44 = vsel %vm1511_vm11, 1.0, %v4189_v37 }
 0x16a   : > { %6963 = vst [vmem:[#allocation16_spill] sm:$0xff] %v5684_v47  ;;  %v2486_v35 = vadd.f32 %v2422_v27, %v2149_v41  ;;  %vm466_vm13 = vcmp.eq.s32.totalorder %v4463_v16, %v5684_v47  ;;  %vm820_vm14 = vcmp.eq.s32.totalorder %v4497_v42, %v5684_v47  ;;  %vm1169_vm7 = vcmp.eq.s32.totalorder %v4536_v59, %v5684_v47 }
 0x16b   : > { %v3433_v31 = vsel %vm466_vm13, 1.0, %v4189_v37  ;;  %v3499_v33 = vsel %vm820_vm14, 1.0, %v4189_v37  ;;  %v3565_v28 = vsel %vm1169_vm7, 1.0, %v4189_v37  ;;  %vm1506_vm12 = vcmp.eq.s32.totalorder %v4538_v61, %v5684_v47 }
 0x16c   : > { %v2826_v17 = vadd.f32 %v2762_v9, %v2486_v35  ;;  %v665_v49 = vmul.f32 %v3433_v31, %v4451_v8  ;;  %v1019_v48 = vmul.f32 %v3499_v33, %v4458_v12  ;;  %v1368_v14 = vmul.f32 %v3565_v28, %v4490_v38 }
 0x16d   : > { %v3630_v27 = vsel %vm1506_vm12, 1.0, %v4189_v37  ;;  %vm1847_vm15 = vcmp.eq.s32.totalorder %v4540_v62, %v5684_v47  ;;  %vm2184_vm0 = vcmp.eq.s32.totalorder %v4543_v1, %v5684_v47  ;;  %vm2524_vm1 = vcmp.eq.s32.totalorder %v4596_v10, %v5684_v47 }
 0x16e   : > { %v3163_v11 = vadd.f32 %v3099_v57, %v2826_v17  ;;  %v1083_v26 = vadd.f32 %v1019_v48, %v665_v49  ;;  %v1705_v9 = vmul.f32 %v3630_v27, %v4499_v23  ;;  %v3695_v0 = vsel %vm1847_vm15, 1.0, %v4189_v37 }
 0x16f   : > { %v2046_v25 = vmul.f32 %v3695_v0, %v4501_v43  ;;  %v3760_v41 = vsel %vm2184_vm0, 1.0, %v4189_v37  ;;  %v3825_v19 = vsel %vm2524_vm1, 1.0, %v4189_v37  ;;  %vm2861_vm2 = vcmp.eq.s32.totalorder %v4601_v54, %v5684_v47 }
 0x170   : > { %3208 = vmatpush.msra.mxu1 %v3163_v11  ;;  %v1432_v35 = vadd.f32 %v1368_v14, %v1083_v26  ;;  %v2383_v31 = vmul.f32 %v3760_v41, %v4545_v2  ;;  %v2723_v57 = vmul.f32 %v3825_v19, %v4586_v39  ;;  %v3890_v33 = vsel %vm2861_vm2, 1.0, %v4189_v37 }
 0x171   : > { %v3060_v28 = vmul.f32 %v3890_v33, %v4607_v6  ;;  %vm498_vm3 = vcmp.eq.s32.totalorder %v4463_v16, %v5687_v46  ;;  %vm852_vm4 = vcmp.eq.s32.totalorder %v4497_v42, %v5687_v46  ;;  %vm1201_vm8 = vcmp.eq.s32.totalorder %v4536_v59, %v5687_v46 }
 0x172   : > { %v1769_v17 = vadd.f32 %v1705_v9, %v1432_v35  ;;  %v3465_v49 = vsel %vm498_vm3, 1.0, %v4189_v37  ;;  %v3531_v48 = vsel %vm852_vm4, 1.0, %v4189_v37  ;;  %v3597_v14 = vsel %vm1201_vm8, 1.0, %v4189_v37 }
 0x173   : > { %v697_v27 = vmul.f32 %v3465_v49, %v4451_v8  ;;  %v1051_v11 = vmul.f32 %v3531_v48, %v4458_v12  ;;  %v1400_v26 = vmul.f32 %v3597_v14, %v4490_v38  ;;  %vm1538_vm5 = vcmp.eq.s32.totalorder %v4538_v61, %v5687_v46 }
 0x174   : > { %v2110_v0 = vadd.f32 %v2046_v25, %v1769_v17  ;;  %v3662_v41 = vsel %vm1538_vm5, 1.0, %v4189_v37  ;;  %vm1879_vm9 = vcmp.eq.s32.totalorder %v4540_v62, %v5687_v46  ;;  %vm2216_vm6 = vcmp.eq.s32.totalorder %v4543_v1, %v5687_v46 }
 0x175   : > { %v1115_v9 = vadd.f32 %v1051_v11, %v697_v27  ;;  %v1737_v19 = vmul.f32 %v3662_v41, %v4499_v23  ;;  %v3727_v35 = vsel %vm1879_vm9, 1.0, %v4189_v37  ;;  %v3792_v33 = vsel %vm2216_vm6, 1.0, %v4189_v37 }
 0x176   : > { %v2447_v49 = vadd.f32 %v2383_v31, %v2110_v0  ;;  %v2078_v48 = vmul.f32 %v3727_v35, %v4501_v43  ;;  %v2415_v25 = vmul.f32 %v3792_v33, %v4545_v2  ;;  %vm2556_vm10 = vcmp.eq.s32.totalorder %v4596_v10, %v5687_v46 }
 0x177   : > { %v1464_v17 = vadd.f32 %v1400_v26, %v1115_v9  ;;  %v3857_v14 = vsel %vm2556_vm10, 1.0, %v4189_v37  ;;  %vm2893_vm11 = vcmp.eq.s32.totalorder %v4601_v54, %v5687_v46  ;;  %v1024_v27 = vmul.f32 %v3504_v7, %v4876_v51 }
 0x178   : > { %v2787_v11 = vadd.f32 %v2723_v57, %v2447_v49  ;;  %v2755_v41 = vmul.f32 %v3857_v14, %v4586_v39  ;;  %v3922_v31 = vsel %vm2893_vm11, 1.0, %v4189_v37  ;;  %v1373_v0 = vmul.f32 %v3570_v34, %v4880_v56 }
 0x179   : > { %v1801_v35 = vadd.f32 %v1737_v19, %v1464_v17  ;;  %v3092_v33 = vmul.f32 %v3922_v31, %v4607_v6  ;;  %v1088_v47 = vadd.f32 %v1024_v27, %v5691_v63  ;;  %v1710_v26 = vmul.f32 %v5696_v44, %v4891_v24 }
 0x17a   : > { %v3124_v9 = vadd.f32 %v3060_v28, %v2787_v11  ;;  %vm1852_vm13 = vcmp.eq.s32.totalorder %v4895_v36, %v6962_v29  ;;  %vm2189_vm14 = vcmp.eq.s32.totalorder %v4902_v30, %v6962_v29  ;;  %vm2529_vm7 = vcmp.eq.s32.totalorder %v4921_v13, %v6962_v29 }
 0x17b   : > { %v2142_v7 = vadd.f32 %v2078_v48, %v1801_v35  ;;  %v1437_v34 = vadd.f32 %v1373_v0, %v1088_v47  ;;  %v3700_v57 = vsel %vm1852_vm13, 1.0, %v4189_v37  ;;  %v3765_v19 = vsel %vm2189_vm14, 1.0, %v4189_v37 }
 0x17c   : > { %3232 = vmatpush.msra.mxu2 %v3124_v9  ;;  %v2051_v63 = vmul.f32 %v3700_v57, %v4900_v21  ;;  %v2388_v44 = vmul.f32 %v3765_v19, %v4914_v53  ;;  %v3830_v28 = vsel %vm2529_vm7, 1.0, %v4189_v37  ;;  %vm2866_vm12 = vcmp.eq.s32.totalorder %v4929_v32, %v6962_v29 }
 0x17d   : > { %v2479_v49 = vadd.f32 %v2415_v25, %v2142_v7  ;;  %v1774_v17 = vadd.f32 %v1710_v26, %v1437_v34  ;;  %v2728_v14 = vmul.f32 %v3830_v28, %v4927_v60  ;;  %v3895_v47 = vsel %vm2866_vm12, 1.0, %v4189_v37 }
 0x17e   : > { %v3065_v48 = vmul.f32 %v3895_v47, %v4931_v3  ;;  %vm503_vm15 = vcmp.eq.s32.totalorder %v4858_v52, %v5264_v40  ;;  %vm857_vm0 = vcmp.eq.s32.totalorder %v4863_v15, %v5264_v40  ;;  %vm1206_vm1 = vcmp.eq.s32.totalorder %v4878_v55, %v5264_v40 }
 0x17f   : > { %v2819_v27 = vadd.f32 %v2755_v41, %v2479_v49  ;;  %v2115_v11 = vadd.f32 %v2051_v63, %v1774_v17  ;;  %v3470_v29 = vsel %vm503_vm15, 1.0, %v4189_v37  ;;  %v3536_v25 = vsel %vm857_vm0, 1.0, %v4189_v37 }
 0x180   : > { %v702_v31 = vmul.f32 %v3470_v29, %v4861_v18  ;;  %v1056_v0 = vmul.f32 %v3536_v25, %v4876_v51  ;;  %v3602_v35 = vsel %vm1206_vm1, 1.0, %v4189_v37  ;;  %vm1543_vm2 = vcmp.eq.s32.totalorder %v4889_v22, %v5264_v40 }
 0x181   : > { %v3156_v26 = vadd.f32 %v3092_v33, %v2819_v27  ;;  %v2452_v9 = vadd.f32 %v2388_v44, %v2115_v11  ;;  %v1405_v7 = vmul.f32 %v3602_v35, %v4880_v56  ;;  %v3667_v41 = vsel %vm1543_vm2, 1.0, %v4189_v37 }
 0x182   : > { %v1120_v34 = vadd.f32 %v1056_v0, %v702_v31  ;;  %v1742_v57 = vmul.f32 %v3667_v41, %v4891_v24  ;;  %vm1884_vm3 = vcmp.eq.s32.totalorder %v4895_v36, %v5264_v40  ;;  %vm2221_vm4 = vcmp.eq.s32.totalorder %v4902_v30, %v5264_v40 }
 0x183   : > { %3252 = vmatpush.msra.mxu3 %v3156_v26  ;;  %v2792_v19 = vadd.f32 %v2728_v14, %v2452_v9  ;;  %v3732_v63 = vsel %vm1884_vm3, 1.0, %v4189_v37  ;;  %v3797_v33 = vsel %vm2221_vm4, 1.0, %v4189_v37  ;;  %vm2561_vm8 = vcmp.eq.s32.totalorder %v4921_v13, %v5264_v40 }
 0x184   : > { %v1469_v44 = vadd.f32 %v1405_v7, %v1120_v34  ;;  %v2083_v28 = vmul.f32 %v3732_v63, %v4900_v21  ;;  %v2420_v49 = vmul.f32 %v3797_v33, %v4914_v53  ;;  %v3862_v17 = vsel %vm2561_vm8, 1.0, %v4189_v37 }
 0x185   : > { %v3129_v47 = vadd.f32 %v3065_v48, %v2792_v19  ;;  %v2760_v27 = vmul.f32 %v3862_v17, %v4927_v60  ;;  %vm2898_vm5 = vcmp.eq.s32.totalorder %v4929_v32, %v5264_v40  ;;  %v351_v14 = vadd.s32 40, %v4336_v4 }
 0x186   : > { %v1806_v11 = vadd.f32 %v1742_v57, %v1469_v44  ;;  %v3927_v29 = vsel %vm2898_vm5, 1.0, %v4189_v37  ;;  %v367_v25 = vadd.s32 168, %v4336_v4  ;;  %vm469_vm9 = vcmp.eq.s32.totalorder %v4858_v52, %v5397_v58 }
 0x187   : > { %3189 = vmatpush.msra.mxu0 %v3129_v47  ;;  %v3097_v31 = vmul.f32 %v3927_v29, %v4931_v3  ;;  %v5820_v48 = vadd.s32 %v4338_v5, %v351_v14  ;;  %v3436_v0 = vsel %vm469_vm9, 1.0, %v4189_v37  ;;  %vm823_vm6 = vcmp.eq.s32.totalorder %v4863_v15, %v5397_v58 }
 0x188   : > { %v2147_v40 = vadd.f32 %v2083_v28, %v1806_v11  ;;  %v5826_v35 = vadd.s32 %v4338_v5, %v367_v25  ;;  %v5829_v26 = vmul.f32 %v3436_v0, %v4861_v18  ;;  %v3502_v9 = vsel %vm823_vm6, 1.0, %v4189_v37 }
 0x189   : > { %vm464_vm10 = vcmp.eq.s32.totalorder %v4463_v16, %v5820_v48  ;;  %vm818_vm11 = vcmp.eq.s32.totalorder %v4497_v42, %v5820_v48  ;;  %vm1167_vm13 = vcmp.eq.s32.totalorder %v4536_v59, %v5820_v48  ;;  %vm1504_vm14 = vcmp.eq.s32.totalorder %v4538_v61, %v5820_v48 }
 0x18a   : > { %v2484_v7 = vadd.f32 %v2420_v49, %v2147_v40  ;;  %v3431_v41 = vsel %vm464_vm10, 1.0, %v4189_v37  ;;  %v3497_v34 = vsel %vm818_vm11, 1.0, %v4189_v37  ;;  %v3563_v57 = vsel %vm1167_vm13, 1.0, %v4189_v37 }
 0x18b   : > { %v663_v19 = vmul.f32 %v3431_v41, %v4451_v8  ;;  %v1017_v63 = vmul.f32 %v3497_v34, %v4458_v12  ;;  %v1366_v33 = vmul.f32 %v3563_v57, %v4490_v38  ;;  %v3628_v44 = vsel %vm1504_vm14, 1.0, %v4189_v37 }
 0x18c   : > { %v2824_v28 = vadd.f32 %v2760_v27, %v2484_v7  ;;  %v1703_v17 = vmul.f32 %v3628_v44, %v4499_v23  ;;  %vm1845_vm7 = vcmp.eq.s32.totalorder %v4540_v62, %v5820_v48  ;;  %vm2182_vm12 = vcmp.eq.s32.totalorder %v4543_v1, %v5820_v48 }
 0x18d   : > { %v1081_v49 = vadd.f32 %v1017_v63, %v663_v19  ;;  %v3693_v47 = vsel %vm1845_vm7, 1.0, %v4189_v37  ;;  %v3758_v14 = vsel %vm2182_vm12, 1.0, %v4189_v37  ;;  %vm2522_vm15 = vcmp.eq.s32.totalorder %v4596_v10, %v5820_v48 }
 0x18e   : > { %v3161_v11 = vadd.f32 %v3097_v31, %v2824_v28  ;;  %v2044_v29 = vmul.f32 %v3693_v47, %v4501_v43  ;;  %v2381_v27 = vmul.f32 %v3758_v14, %v4545_v2  ;;  %v3823_v25 = vsel %vm2522_vm15, 1.0, %v4189_v37 }
 0x18f   : > { %v1430_v0 = vadd.f32 %v1366_v33, %v1081_v49  ;;  %v2721_v40 = vmul.f32 %v3823_v25, %v4586_v39  ;;  %vm2859_vm0 = vcmp.eq.s32.totalorder %v4601_v54, %v5820_v48  ;;  %vm496_vm1 = vcmp.eq.s32.totalorder %v4463_v16, %v5826_v35 }
 0x190   : > { %3209 = vmatpush.msra.mxu1 %v3161_v11  ;;  %v3888_v7 = vsel %vm2859_vm0, 1.0, %v4189_v37  ;;  %v3463_v31 = vsel %vm496_vm1, 1.0, %v4189_v37  ;;  %vm850_vm2 = vcmp.eq.s32.totalorder %v4497_v42, %v5826_v35  ;;  %vm1199_vm3 = vcmp.eq.s32.totalorder %v4536_v59, %v5826_v35 }
 0x191   : > { %v1767_v41 = vadd.f32 %v1703_v17, %v1430_v0  ;;  %v3058_v34 = vmul.f32 %v3888_v7, %v4607_v6  ;;  %v695_v57 = vmul.f32 %v3463_v31, %v4451_v8  ;;  %v3529_v19 = vsel %vm850_vm2, 1.0, %v4189_v37 }
 0x192   : > { %v1049_v63 = vmul.f32 %v3529_v19, %v4458_v12  ;;  %v3595_v33 = vsel %vm1199_vm3, 1.0, %v4189_v37  ;;  %vm1536_vm4 = vcmp.eq.s32.totalorder %v4538_v61, %v5826_v35  ;;  %vm1877_vm8 = vcmp.eq.s32.totalorder %v4540_v62, %v5826_v35 }
 0x193   : > { %v2108_v44 = vadd.f32 %v2044_v29, %v1767_v41  ;;  %v1398_v28 = vmul.f32 %v3595_v33, %v4490_v38  ;;  %v3660_v17 = vsel %vm1536_vm4, 1.0, %v4189_v37  ;;  %v3725_v49 = vsel %vm1877_vm8, 1.0, %v4189_v37 }
 0x194   : > { %v1113_v47 = vadd.f32 %v1049_v63, %v695_v57  ;;  %v1735_v14 = vmul.f32 %v3660_v17, %v4499_v23  ;;  %v2076_v11 = vmul.f32 %v3725_v49, %v4501_v43  ;;  %vm2214_vm5 = vcmp.eq.s32.totalorder %v4543_v1, %v5826_v35 }
 0x195   : > { %v2445_v25 = vadd.f32 %v2381_v27, %v2108_v44  ;;  %v3790_v0 = vsel %vm2214_vm5, 1.0, %v4189_v37  ;;  %vm2554_vm9 = vcmp.eq.s32.totalorder %v4596_v10, %v5826_v35  ;;  %vm2891_vm6 = vcmp.eq.s32.totalorder %v4601_v54, %v5826_v35 }
 0x196   : > { %v1462_v29 = vadd.f32 %v1398_v28, %v1113_v47  ;;  %v2413_v7 = vmul.f32 %v3790_v0, %v4545_v2  ;;  %v3855_v31 = vsel %vm2554_vm9, 1.0, %v4189_v37  ;;  %v3920_v41 = vsel %vm2891_vm6, 1.0, %v4189_v37 }
 0x197   : > { %v2785_v57 = vadd.f32 %v2721_v40, %v2445_v25  ;;  %v2753_v19 = vmul.f32 %v3855_v31, %v4586_v39  ;;  %v3090_v27 = vmul.f32 %v3920_v41, %v4607_v6  ;;  %v1022_v63 = vmul.f32 %v3502_v9, %v4876_v51 }
 0x198   : > { %v1799_v33 = vadd.f32 %v1735_v14, %v1462_v29  ;;  %vm1172_vm10 = vcmp.eq.s32.totalorder %v4878_v55, %v5397_v58  ;;  %vm1509_vm11 = vcmp.eq.s32.totalorder %v4889_v22, %v5397_v58  ;;  %vm1850_vm13 = vcmp.eq.s32.totalorder %v4895_v36, %v5397_v58 }
 0x199   : > { %v3122_v44 = vadd.f32 %v3058_v34, %v2785_v57  ;;  %v1086_v28 = vadd.f32 %v1022_v63, %v5829_v26  ;;  %v3568_v40 = vsel %vm1172_vm10, 1.0, %v4189_v37  ;;  %v3633_v17 = vsel %vm1509_vm11, 1.0, %v4189_v37 }
 0x19a   : > { %v2140_v49 = vadd.f32 %v2076_v11, %v1799_v33  ;;  %v1371_v9 = vmul.f32 %v3568_v40, %v4880_v56  ;;  %v1708_v47 = vmul.f32 %v3633_v17, %v4891_v24  ;;  %v3698_v14 = vsel %vm1850_vm13, 1.0, %v4189_v37 }
 0x19b   : > { %3233 = vmatpush.msra.mxu2 %v3122_v44  ;;  %v2049_v25 = vmul.f32 %v3698_v14, %v4900_v21  ;;  %vm2187_vm14 = vcmp.eq.s32.totalorder %v4902_v30, %v5397_v58  ;;  %vm2527_vm7 = vcmp.eq.s32.totalorder %v4921_v13, %v5397_v58  ;;  %vm2864_vm12 = vcmp.eq.s32.totalorder %v4929_v32, %v5397_v58 }
 0x19c   : > { %v2477_v26 = vadd.f32 %v2413_v7, %v2140_v49  ;;  %v1435_v34 = vadd.f32 %v1371_v9, %v1086_v28  ;;  %v3763_v11 = vsel %vm2187_vm14, 1.0, %v4189_v37  ;;  %v3828_v0 = vsel %vm2527_vm7, 1.0, %v4189_v37 }
 0x19d   : > { %v2386_v29 = vmul.f32 %v3763_v11, %v4914_v53  ;;  %v2726_v31 = vmul.f32 %v3828_v0, %v4927_v60  ;;  %vm501_vm15 = vcmp.eq.s32.totalorder %v4858_v52, %v5403_v50  ;;  %v3893_v63 = vsel %vm2864_vm12, 1.0, %v4189_v37 }
 0x19e   : > { %v2817_v41 = vadd.f32 %v2753_v19, %v2477_v26  ;;  %v1772_v57 = vadd.f32 %v1708_v47, %v1435_v34  ;;  %v3468_v33 = vsel %vm501_vm15, 1.0, %v4189_v37  ;;  %vm855_vm0 = vcmp.eq.s32.totalorder %v4863_v15, %v5403_v50 }
 0x19f   : > { %v700_v58 = vmul.f32 %v3468_v33, %v4861_v18  ;;  %vm1204_vm1 = vcmp.eq.s32.totalorder %v4878_v55, %v5403_v50  ;;  %vm1541_vm2 = vcmp.eq.s32.totalorder %v4889_v22, %v5403_v50  ;;  %v3534_v19 = vsel %vm855_vm0, 1.0, %v4189_v37 }
 0x1a0   : > { %v3154_v7 = vadd.f32 %v3090_v27, %v2817_v41  ;;  %v2113_v44 = vadd.f32 %v2049_v25, %v1772_v57  ;;  %v3600_v28 = vsel %vm1204_vm1, 1.0, %v4189_v37  ;;  %v1054_v40 = vmul.f32 %v3534_v19, %v4876_v51 }
 0x1a1   : > { %v1403_v17 = vmul.f32 %v3600_v28, %v4880_v56  ;;  %v3665_v49 = vsel %vm1541_vm2, 1.0, %v4189_v37  ;;  %vm1882_vm3 = vcmp.eq.s32.totalorder %v4895_v36, %v5403_v50  ;;  %v3063_v47 = vmul.f32 %v3893_v63, %v4931_v3 }
 0x1a2   : > { %3253 = vmatpush.msra.mxu3 %v3154_v7  ;;  %v2450_v9 = vadd.f32 %v2386_v29, %v2113_v44  ;;  %v3730_v27 = vsel %vm1882_vm3, 1.0, %v4189_v37  ;;  %vm2219_vm4 = vcmp.eq.s32.totalorder %v4902_v30, %v5403_v50  ;;  %v1118_v14 = vadd.f32 %v1054_v40, %v700_v58 }
 0x1a3   : > { %v1740_v25 = vmul.f32 %v3665_v49, %v4891_v24  ;;  %v3795_v26 = vsel %vm2219_vm4, 1.0, %v4189_v37  ;;  %vm2559_vm8 = vcmp.eq.s32.totalorder %v4921_v13, %v5403_v50  ;;  %v2081_v11 = vmul.f32 %v3730_v27, %v4900_v21 }
 0x1a4   : > { %v2790_v34 = vadd.f32 %v2726_v31, %v2450_v9  ;;  %v3860_v0 = vsel %vm2559_vm8, 1.0, %v4189_v37  ;;  %vm2896_vm5 = vcmp.eq.s32.totalorder %v4929_v32, %v5403_v50  ;;  %v1467_v29 = vadd.f32 %v1403_v17, %v1118_v14 }
 0x1a5   : > { %v2418_v41 = vmul.f32 %v3795_v26, %v4914_v53  ;;  %v3925_v57 = vsel %vm2896_vm5, 1.0, %v4189_v37  ;;  %v350_v63 = vadd.s32 32, %v4336_v4  ;;  %v2758_v58 = vmul.f32 %v3860_v0, %v4927_v60 }
 0x1a6   : > { %v3127_v33 = vadd.f32 %v3063_v47, %v2790_v34  ;;  %v366_v7 = vadd.s32 160, %v4336_v4  ;;  %vm467_vm9 = vcmp.eq.s32.totalorder %v4858_v52, %v5535_v45  ;;  %v1804_v31 = vadd.f32 %v1740_v25, %v1467_v29 }
 0x1a7   : > { %v5958_v44 = vadd.s32 %v4338_v5, %v350_v63  ;;  %v3434_v50 = vsel %vm467_vm9, 1.0, %v4189_v37  ;;  %vm821_vm6 = vcmp.eq.s32.totalorder %v4863_v15, %v5535_v45  ;;  %v3095_v19 = vmul.f32 %v3925_v57, %v4931_v3 }
 0x1a8   : > { %3190 = vmatpush.msra.mxu0 %v3127_v33  ;;  %v5965_v28 = vadd.s32 %v4338_v5, %v366_v7  ;;  %v5968_v40 = vmul.f32 %v3434_v50, %v4861_v18  ;;  %v3500_v17 = vsel %vm821_vm6, 1.0, %v4189_v37  ;;  %v2145_v49 = vadd.f32 %v2081_v11, %v1804_v31 }
 0x1a9   : > { %vm462_vm10 = vcmp.eq.s32.totalorder %v4463_v16, %v5958_v44  ;;  %vm816_vm11 = vcmp.eq.s32.totalorder %v4497_v42, %v5958_v44  ;;  %vm1165_vm13 = vcmp.eq.s32.totalorder %v4536_v59, %v5958_v44  ;;  %vm1502_vm14 = vcmp.eq.s32.totalorder %v4538_v61, %v5958_v44 }
 0x1aa   : > { %v3429_v9 = vsel %vm462_vm10, 1.0, %v4189_v37  ;;  %v3495_v47 = vsel %vm816_vm11, 1.0, %v4189_v37  ;;  %v3561_v27 = vsel %vm1165_vm13, 1.0, %v4189_v37  ;;  %v2482_v14 = vadd.f32 %v2418_v41, %v2145_v49 }
 0x1ab   : > { %v661_v25 = vmul.f32 %v3429_v9, %v4451_v8  ;;  %v1015_v26 = vmul.f32 %v3495_v47, %v4458_v12  ;;  %v1364_v34 = vmul.f32 %v3561_v27, %v4490_v38  ;;  %v3626_v11 = vsel %vm1502_vm14, 1.0, %v4189_v37 }
 0x1ac   : > { %vm1843_vm7 = vcmp.eq.s32.totalorder %v4540_v62, %v5958_v44  ;;  %vm2180_vm12 = vcmp.eq.s32.totalorder %v4543_v1, %v5958_v44  ;;  %vm2520_vm15 = vcmp.eq.s32.totalorder %v4596_v10, %v5958_v44  ;;  %v2822_v0 = vadd.f32 %v2758_v58, %v2482_v14 }
 0x1ad   : > { %v1079_v29 = vadd.f32 %v1015_v26, %v661_v25  ;;  %v1701_v41 = vmul.f32 %v3626_v11, %v4499_v23  ;;  %v3691_v57 = vsel %vm1843_vm7, 1.0, %v4189_v37  ;;  %vm1170_vm0 = vcmp.eq.s32.totalorder %v4878_v55, %v5535_v45 }
 0x1ae   : > { %v2042_v63 = vmul.f32 %v3691_v57, %v4501_v43  ;;  %v3756_v33 = vsel %vm2180_vm12, 1.0, %v4189_v37  ;;  %v3821_v7 = vsel %vm2520_vm15, 1.0, %v4189_v37  ;;  %vm2857_vm1 = vcmp.eq.s32.totalorder %v4601_v54, %v5958_v44 }
 0x1af   : > { %v3159_v31 = vadd.f32 %v3095_v19, %v2822_v0  ;;  %v1428_v50 = vadd.f32 %v1364_v34, %v1079_v29  ;;  %v2379_v58 = vmul.f32 %v3756_v33, %v4545_v2  ;;  %v2719_v49 = vmul.f32 %v3821_v7, %v4586_v39 }
 0x1b0   : > { %v3886_v9 = vsel %vm2857_vm1, 1.0, %v4189_v37  ;;  %vm494_vm2 = vcmp.eq.s32.totalorder %v4463_v16, %v5965_v28  ;;  %vm848_vm3 = vcmp.eq.s32.totalorder %v4497_v42, %v5965_v28  ;;  %vm1197_vm4 = vcmp.eq.s32.totalorder %v4536_v59, %v5965_v28 }
 0x1b1   : > { %3210 = vmatpush.msra.mxu1 %v3159_v31  ;;  %v1765_v47 = vadd.f32 %v1701_v41, %v1428_v50  ;;  %v3056_v19 = vmul.f32 %v3886_v9, %v4607_v6  ;;  %v3461_v27 = vsel %vm494_vm2, 1.0, %v4189_v37  ;;  %v3527_v14 = vsel %vm848_vm3, 1.0, %v4189_v37 }
 0x1b2   : > { %v693_v25 = vmul.f32 %v3461_v27, %v4451_v8  ;;  %v1047_v26 = vmul.f32 %v3527_v14, %v4458_v12  ;;  %v3593_v34 = vsel %vm1197_vm4, 1.0, %v4189_v37  ;;  %vm1534_vm8 = vcmp.eq.s32.totalorder %v4538_v61, %v5965_v28 }
 0x1b3   : > { %v2106_v11 = vadd.f32 %v2042_v63, %v1765_v47  ;;  %v1396_v0 = vmul.f32 %v3593_v34, %v4490_v38  ;;  %v3658_v29 = vsel %vm1534_vm8, 1.0, %v4189_v37  ;;  %vm1875_vm5 = vcmp.eq.s32.totalorder %v4540_v62, %v5965_v28 }
 0x1b4   : > { %v1111_v41 = vadd.f32 %v1047_v26, %v693_v25  ;;  %v1733_v57 = vmul.f32 %v3658_v29, %v4499_v23  ;;  %v3723_v33 = vsel %vm1875_vm5, 1.0, %v4189_v37  ;;  %vm2212_vm9 = vcmp.eq.s32.totalorder %v4543_v1, %v5965_v28 }
 0x1b5   : > { %v2443_v7 = vadd.f32 %v2379_v58, %v2106_v11  ;;  %v2074_v31 = vmul.f32 %v3723_v33, %v4501_v43  ;;  %v3788_v63 = vsel %vm2212_vm9, 1.0, %v4189_v37  ;;  %vm2552_vm6 = vcmp.eq.s32.totalorder %v4596_v10, %v5965_v28 }
 0x1b6   : > { %v1460_v50 = vadd.f32 %v1396_v0, %v1111_v41  ;;  %v2411_v9 = vmul.f32 %v3788_v63, %v4545_v2  ;;  %v3853_v47 = vsel %vm2552_vm6, 1.0, %v4189_v37  ;;  %vm2889_vm10 = vcmp.eq.s32.totalorder %v4601_v54, %v5965_v28 }
 0x1b7   : > { %v2783_v27 = vadd.f32 %v2719_v49, %v2443_v7  ;;  %v2751_v14 = vmul.f32 %v3853_v47, %v4586_v39  ;;  %v3918_v58 = vsel %vm2889_vm10, 1.0, %v4189_v37  ;;  %v1020_v25 = vmul.f32 %v3500_v17, %v4876_v51 }
 0x1b8   : > { %v1797_v26 = vadd.f32 %v1733_v57, %v1460_v50  ;;  %v3088_v34 = vmul.f32 %v3918_v58, %v4607_v6  ;;  %v3566_v11 = vsel %vm1170_vm0, 1.0, %v4189_v37  ;;  %vm1507_vm11 = vcmp.eq.s32.totalorder %v4889_v22, %v5535_v45 }
 0x1b9   : > { %v3120_v0 = vadd.f32 %v3056_v19, %v2783_v27  ;;  %v1084_v49 = vadd.f32 %v1020_v25, %v5968_v40  ;;  %v1369_v29 = vmul.f32 %v3566_v11, %v4880_v56  ;;  %v3631_v41 = vsel %vm1507_vm11, 1.0, %v4189_v37 }
 0x1ba   : > { %v2138_v33 = vadd.f32 %v2074_v31, %v1797_v26  ;;  %v1706_v17 = vmul.f32 %v3631_v41, %v4891_v24  ;;  %vm1848_vm13 = vcmp.eq.s32.totalorder %v4895_v36, %v5535_v45  ;;  %vm2185_vm14 = vcmp.eq.s32.totalorder %v4902_v30, %v5535_v45 }
 0x1bb   : > { %3234 = vmatpush.msra.mxu2 %v3120_v0  ;;  %v1433_v57 = vadd.f32 %v1369_v29, %v1084_v49  ;;  %v3696_v7 = vsel %vm1848_vm13, 1.0, %v4189_v37  ;;  %v3761_v19 = vsel %vm2185_vm14, 1.0, %v4189_v37  ;;  %vm2525_vm7 = vcmp.eq.s32.totalorder %v4921_v13, %v5535_v45 }
 0x1bc   : > { %v2475_v40 = vadd.f32 %v2411_v9, %v2138_v33  ;;  %v2047_v31 = vmul.f32 %v3696_v7, %v4900_v21  ;;  %v2384_v63 = vmul.f32 %v3761_v19, %v4914_v53  ;;  %v3826_v50 = vsel %vm2525_vm7, 1.0, %v4189_v37 }
 0x1bd   : > { %v1770_v47 = vadd.f32 %v1706_v17, %v1433_v57  ;;  %v2724_v27 = vmul.f32 %v3826_v50, %v4927_v60  ;;  %vm2862_vm12 = vcmp.eq.s32.totalorder %v4929_v32, %v5535_v45  ;;  %vm499_vm15 = vcmp.eq.s32.totalorder %v4858_v52, %v5542_v20 }
 0x1be   : > { %v2815_v58 = vadd.f32 %v2751_v14, %v2475_v40  ;;  %v3891_v25 = vsel %vm2862_vm12, 1.0, %v4189_v37  ;;  %v3466_v9 = vsel %vm499_vm15, 1.0, %v4189_v37  ;;  %vm853_vm0 = vcmp.eq.s32.totalorder %v4863_v15, %v5542_v20 }
 0x1bf   : > { %v2111_v26 = vadd.f32 %v2047_v31, %v1770_v47  ;;  %v3061_v11 = vmul.f32 %v3891_v25, %v4931_v3  ;;  %v698_v0 = vmul.f32 %v3466_v9, %v4861_v18  ;;  %v3532_v49 = vsel %vm853_vm0, 1.0, %v4189_v37 }
 0x1c0   : > { %v3152_v29 = vadd.f32 %v3088_v34, %v2815_v58  ;;  %v1052_v45 = vmul.f32 %v3532_v49, %v4876_v51  ;;  %vm1202_vm1 = vcmp.eq.s32.totalorder %v4878_v55, %v5542_v20  ;;  %vm1539_vm2 = vcmp.eq.s32.totalorder %v4889_v22, %v5542_v20 }
 0x1c1   : > { %v2448_v14 = vadd.f32 %v2384_v63, %v2111_v26  ;;  %v3598_v41 = vsel %vm1202_vm1, 1.0, %v4189_v37  ;;  %v3663_v33 = vsel %vm1539_vm2, 1.0, %v4189_v37  ;;  %vm1880_vm3 = vcmp.eq.s32.totalorder %v4895_v36, %v5542_v20 }
 0x1c2   : > { %3254 = vmatpush.msra.mxu3 %v3152_v29  ;;  %v1116_v17 = vadd.f32 %v1052_v45, %v698_v0  ;;  %v1401_v34 = vmul.f32 %v3598_v41, %v4880_v56  ;;  %v1738_v57 = vmul.f32 %v3663_v33, %v4891_v24  ;;  %v3728_v7 = vsel %vm1880_vm3, 1.0, %v4189_v37  ;;  %v6964_v29 = vld [vmem:[#allocation16_spill] sm:$0xff] }
 0x1c3   : > { %v2788_v19 = vadd.f32 %v2724_v27, %v2448_v14  ;;  %v2079_v40 = vmul.f32 %v3728_v7, %v4900_v21  ;;  %vm2217_vm4 = vcmp.eq.s32.totalorder %v4902_v30, %v5542_v20  ;;  %vm2557_vm8 = vcmp.eq.s32.totalorder %v4921_v13, %v5542_v20 }
 0x1c4   : > { %v1465_v31 = vadd.f32 %v1401_v34, %v1116_v17  ;;  %v3793_v63 = vsel %vm2217_vm4, 1.0, %v4189_v37  ;;  %v3858_v50 = vsel %vm2557_vm8, 1.0, %v4189_v37  ;;  %vm2894_vm5 = vcmp.eq.s32.totalorder %v4929_v32, %v5542_v20 }
 0x1c5   : > { %v3125_v47 = vadd.f32 %v3061_v11, %v2788_v19  ;;  %v2416_v58 = vmul.f32 %v3793_v63, %v4914_v53  ;;  %v2756_v27 = vmul.f32 %v3858_v50, %v4927_v60  ;;  %v3923_v25 = vsel %vm2894_vm5, 1.0, %v4189_v37 }
 0x1c6   : > { %v1802_v9 = vadd.f32 %v1738_v57, %v1465_v31  ;;  %v3093_v26 = vmul.f32 %v3923_v25, %v4931_v3  ;;  %v349_v0 = vadd.s32 24, %v4336_v4  ;;  %v365_v49 = vadd.s32 152, %v4336_v4 }
 0x1c7   : > { %3191 = vmatpush.msra.mxu0 %v3125_v47  ;;  %vm465_vm9 = vcmp.eq.s32.totalorder %v4858_v52, %v6964_v29  ;;  %vm819_vm6 = vcmp.eq.s32.totalorder %v4863_v15, %v6964_v29  ;;  %vm1168_vm10 = vcmp.eq.s32.totalorder %v4878_v55, %v6964_v29  ;;  %vm1505_vm11 = vcmp.eq.s32.totalorder %v4889_v22, %v6964_v29 }
 0x1c8   : > { %v2143_v20 = vadd.f32 %v2079_v40, %v1802_v9  ;;  %v6107_v11 = vadd.s32 %v4338_v5, %v349_v0  ;;  %v6110_v45 = vadd.s32 %v4338_v5, %v365_v49  ;;  %v3432_v14 = vsel %vm465_vm9, 1.0, %v4189_v37 }
 0x1c9   : > { %v6114_v41 = vmul.f32 %v3432_v14, %v4861_v18  ;;  %v3498_v33 = vsel %vm819_vm6, 1.0, %v4189_v37  ;;  %v3564_v17 = vsel %vm1168_vm10, 1.0, %v4189_v37  ;;  %v6119_v34 = vsel %vm1505_vm11, 1.0, %v4189_v37 }
 0x1ca   : > { %6965 = vst [vmem:[#allocation16_spill] sm:$0xff] %v6107_v11  ;;  %v2480_v57 = vadd.f32 %v2416_v58, %v2143_v20  ;;  %vm460_vm13 = vcmp.eq.s32.totalorder %v4463_v16, %v6107_v11  ;;  %vm814_vm14 = vcmp.eq.s32.totalorder %v4497_v42, %v6107_v11  ;;  %vm1163_vm7 = vcmp.eq.s32.totalorder %v4536_v59, %v6107_v11 }
 0x1cb   : > { %v3427_v7 = vsel %vm460_vm13, 1.0, %v4189_v37  ;;  %v3493_v19 = vsel %vm814_vm14, 1.0, %v4189_v37  ;;  %v3559_v40 = vsel %vm1163_vm7, 1.0, %v4189_v37  ;;  %vm1500_vm12 = vcmp.eq.s32.totalorder %v4538_v61, %v6107_v11 }
 0x1cc   : > { %v2820_v31 = vadd.f32 %v2756_v27, %v2480_v57  ;;  %v659_v63 = vmul.f32 %v3427_v7, %v4451_v8  ;;  %v1013_v50 = vmul.f32 %v3493_v19, %v4458_v12  ;;  %v1362_v47 = vmul.f32 %v3559_v40, %v4490_v38 }
 0x1cd   : > { %v3624_v58 = vsel %vm1500_vm12, 1.0, %v4189_v37  ;;  %vm1841_vm15 = vcmp.eq.s32.totalorder %v4540_v62, %v6107_v11  ;;  %vm2178_vm0 = vcmp.eq.s32.totalorder %v4543_v1, %v6107_v11  ;;  %vm2518_vm1 = vcmp.eq.s32.totalorder %v4596_v10, %v6107_v11 }
 0x1ce   : > { %v3157_v25 = vadd.f32 %v3093_v26, %v2820_v31  ;;  %v1077_v9 = vadd.f32 %v1013_v50, %v659_v63  ;;  %v1699_v27 = vmul.f32 %v3624_v58, %v4499_v23  ;;  %v3689_v0 = vsel %vm1841_vm15, 1.0, %v4189_v37 }
 0x1cf   : > { %v2040_v49 = vmul.f32 %v3689_v0, %v4501_v43  ;;  %v3754_v20 = vsel %vm2178_vm0, 1.0, %v4189_v37  ;;  %v3819_v14 = vsel %vm2518_vm1, 1.0, %v4189_v37  ;;  %vm2855_vm2 = vcmp.eq.s32.totalorder %v4601_v54, %v6107_v11 }
 0x1d0   : > { %3211 = vmatpush.msra.mxu1 %v3157_v25  ;;  %v1426_v57 = vadd.f32 %v1362_v47, %v1077_v9  ;;  %v2377_v7 = vmul.f32 %v3754_v20, %v4545_v2  ;;  %v2717_v26 = vmul.f32 %v3819_v14, %v4586_v39  ;;  %v3884_v19 = vsel %vm2855_vm2, 1.0, %v4189_v37 }
 0x1d1   : > { %v3054_v40 = vmul.f32 %v3884_v19, %v4607_v6  ;;  %vm492_vm3 = vcmp.eq.s32.totalorder %v4463_v16, %v6110_v45  ;;  %vm846_vm4 = vcmp.eq.s32.totalorder %v4497_v42, %v6110_v45  ;;  %vm1195_vm8 = vcmp.eq.s32.totalorder %v4536_v59, %v6110_v45 }
 0x1d2   : > { %v1763_v31 = vadd.f32 %v1699_v27, %v1426_v57  ;;  %v3459_v63 = vsel %vm492_vm3, 1.0, %v4189_v37  ;;  %v3525_v50 = vsel %vm846_vm4, 1.0, %v4189_v37  ;;  %v3591_v47 = vsel %vm1195_vm8, 1.0, %v4189_v37 }
 0x1d3   : > { %v691_v58 = vmul.f32 %v3459_v63, %v4451_v8  ;;  %v1045_v25 = vmul.f32 %v3525_v50, %v4458_v12  ;;  %v1394_v9 = vmul.f32 %v3591_v47, %v4490_v38  ;;  %vm1532_vm5 = vcmp.eq.s32.totalorder %v4538_v61, %v6110_v45 }
 0x1d4   : > { %v2104_v0 = vadd.f32 %v2040_v49, %v1763_v31  ;;  %v3656_v20 = vsel %vm1532_vm5, 1.0, %v4189_v37  ;;  %vm1873_vm9 = vcmp.eq.s32.totalorder %v4540_v62, %v6110_v45  ;;  %vm2210_vm6 = vcmp.eq.s32.totalorder %v4543_v1, %v6110_v45 }
 0x1d5   : > { %v1109_v27 = vadd.f32 %v1045_v25, %v691_v58  ;;  %v1731_v14 = vmul.f32 %v3656_v20, %v4499_v23  ;;  %v3721_v57 = vsel %vm1873_vm9, 1.0, %v4189_v37  ;;  %v3786_v19 = vsel %vm2210_vm6, 1.0, %v4189_v37 }
 0x1d6   : > { %v2441_v63 = vadd.f32 %v2377_v7, %v2104_v0  ;;  %v2072_v50 = vmul.f32 %v3721_v57, %v4501_v43  ;;  %v2409_v49 = vmul.f32 %v3786_v19, %v4545_v2  ;;  %vm2550_vm10 = vcmp.eq.s32.totalorder %v4596_v10, %v6110_v45 }
 0x1d7   : > { %v1458_v31 = vadd.f32 %v1394_v9, %v1109_v27  ;;  %v3851_v47 = vsel %vm2550_vm10, 1.0, %v4189_v37  ;;  %vm2887_vm11 = vcmp.eq.s32.totalorder %v4601_v54, %v6110_v45  ;;  %v1018_v58 = vmul.f32 %v3498_v33, %v4876_v51 }
 0x1d8   : > { %v2781_v25 = vadd.f32 %v2717_v26, %v2441_v63  ;;  %v2749_v20 = vmul.f32 %v3851_v47, %v4586_v39  ;;  %v3916_v7 = vsel %vm2887_vm11, 1.0, %v4189_v37  ;;  %v1367_v0 = vmul.f32 %v3564_v17, %v4880_v56 }
 0x1d9   : > { %v1795_v57 = vadd.f32 %v1731_v14, %v1458_v31  ;;  %v3086_v19 = vmul.f32 %v3916_v7, %v4607_v6  ;;  %v1082_v11 = vadd.f32 %v1018_v58, %v6114_v41  ;;  %v1704_v9 = vmul.f32 %v6119_v34, %v4891_v24 }
 0x1da   : > { %v3118_v27 = vadd.f32 %v3054_v40, %v2781_v25  ;;  %vm1846_vm13 = vcmp.eq.s32.totalorder %v4895_v36, %v6964_v29  ;;  %vm2183_vm14 = vcmp.eq.s32.totalorder %v4902_v30, %v6964_v29  ;;  %vm2523_vm7 = vcmp.eq.s32.totalorder %v4921_v13, %v6964_v29 }
 0x1db   : > { %v2136_v33 = vadd.f32 %v2072_v50, %v1795_v57  ;;  %v1431_v17 = vadd.f32 %v1367_v0, %v1082_v11  ;;  %v3694_v26 = vsel %vm1846_vm13, 1.0, %v4189_v37  ;;  %v3759_v14 = vsel %vm2183_vm14, 1.0, %v4189_v37 }
 0x1dc   : > { %3235 = vmatpush.msra.mxu2 %v3118_v27  ;;  %v2045_v41 = vmul.f32 %v3694_v26, %v4900_v21  ;;  %v2382_v34 = vmul.f32 %v3759_v14, %v4914_v53  ;;  %v3824_v40 = vsel %vm2523_vm7, 1.0, %v4189_v37  ;;  %vm2860_vm12 = vcmp.eq.s32.totalorder %v4929_v32, %v6964_v29 }
 0x1dd   : > { %v2473_v63 = vadd.f32 %v2409_v49, %v2136_v33  ;;  %v1768_v31 = vadd.f32 %v1704_v9, %v1431_v17  ;;  %v2722_v47 = vmul.f32 %v3824_v40, %v4927_v60  ;;  %v3889_v11 = vsel %vm2860_vm12, 1.0, %v4189_v37 }
 0x1de   : > { %v3059_v50 = vmul.f32 %v3889_v11, %v4931_v3  ;;  %vm497_vm15 = vcmp.eq.s32.totalorder %v4858_v52, %v5687_v46  ;;  %vm851_vm0 = vcmp.eq.s32.totalorder %v4863_v15, %v5687_v46  ;;  %vm1200_vm1 = vcmp.eq.s32.totalorder %v4878_v55, %v5687_v46 }
 0x1df   : > { %v2813_v58 = vadd.f32 %v2749_v20, %v2473_v63  ;;  %v2109_v25 = vadd.f32 %v2045_v41, %v1768_v31  ;;  %v3464_v29 = vsel %vm497_vm15, 1.0, %v4189_v37  ;;  %v3530_v49 = vsel %vm851_vm0, 1.0, %v4189_v37 }
 0x1e0   : > { %v696_v7 = vmul.f32 %v3464_v29, %v4861_v18  ;;  %v1050_v0 = vmul.f32 %v3530_v49, %v4876_v51  ;;  %v3596_v57 = vsel %vm1200_vm1, 1.0, %v4189_v37  ;;  %vm1537_vm2 = vcmp.eq.s32.totalorder %v4889_v22, %v5687_v46 }
 0x1e1   : > { %v3150_v9 = vadd.f32 %v3086_v19, %v2813_v58  ;;  %v2446_v27 = vadd.f32 %v2382_v34, %v2109_v25  ;;  %v1399_v33 = vmul.f32 %v3596_v57, %v4880_v56  ;;  %v3661_v20 = vsel %vm1537_vm2, 1.0, %v4189_v37 }
 0x1e2   : > { %v1114_v17 = vadd.f32 %v1050_v0, %v696_v7  ;;  %v1736_v26 = vmul.f32 %v3661_v20, %v4891_v24  ;;  %vm1878_vm3 = vcmp.eq.s32.totalorder %v4895_v36, %v5687_v46  ;;  %vm2215_vm4 = vcmp.eq.s32.totalorder %v4902_v30, %v5687_v46 }
 0x1e3   : > { %3255 = vmatpush.msra.mxu3 %v3150_v9  ;;  %v2786_v14 = vadd.f32 %v2722_v47, %v2446_v27  ;;  %v3726_v41 = vsel %vm1878_vm3, 1.0, %v4189_v37  ;;  %v3791_v19 = vsel %vm2215_vm4, 1.0, %v4189_v37  ;;  %vm2555_vm8 = vcmp.eq.s32.totalorder %v4921_v13, %v5687_v46 }
 0x1e4   : > { %v1463_v34 = vadd.f32 %v1399_v33, %v1114_v17  ;;  %v2077_v40 = vmul.f32 %v3726_v41, %v4900_v21  ;;  %v2414_v63 = vmul.f32 %v3791_v19, %v4914_v53  ;;  %v3856_v31 = vsel %vm2555_vm8, 1.0, %v4189_v37 }
 0x1e5   : > { %v3123_v11 = vadd.f32 %v3059_v50, %v2786_v14  ;;  %v2754_v58 = vmul.f32 %v3856_v31, %v4927_v60  ;;  %vm2892_vm5 = vcmp.eq.s32.totalorder %v4929_v32, %v5687_v46  ;;  %v348_v47 = vadd.s32 16, %v4336_v4 }
 0x1e6   : > { %v1800_v25 = vadd.f32 %v1736_v26, %v1463_v34  ;;  %v3921_v29 = vsel %vm2892_vm5, 1.0, %v4189_v37  ;;  %v364_v49 = vadd.s32 144, %v4336_v4  ;;  %vm463_vm9 = vcmp.eq.s32.totalorder %v4858_v52, %v5820_v48 }
 0x1e7   : > { %3192 = vmatpush.msra.mxu0 %v3123_v11  ;;  %v3091_v7 = vmul.f32 %v3921_v29, %v4931_v3  ;;  %v6243_v50 = vadd.s32 %v4338_v5, %v348_v47  ;;  %v3430_v0 = vsel %vm463_vm9, 1.0, %v4189_v37  ;;  %vm817_vm6 = vcmp.eq.s32.totalorder %v4863_v15, %v5820_v48 }
 0x1e8   : > { %v2141_v46 = vadd.f32 %v2077_v40, %v1800_v25  ;;  %v6249_v57 = vadd.s32 %v4338_v5, %v364_v49  ;;  %v6252_v9 = vmul.f32 %v3430_v0, %v4861_v18  ;;  %v3496_v27 = vsel %vm817_vm6, 1.0, %v4189_v37 }
 0x1e9   : > { %vm458_vm10 = vcmp.eq.s32.totalorder %v4463_v16, %v6243_v50  ;;  %vm812_vm11 = vcmp.eq.s32.totalorder %v4497_v42, %v6243_v50  ;;  %vm1161_vm13 = vcmp.eq.s32.totalorder %v4536_v59, %v6243_v50  ;;  %vm1498_vm14 = vcmp.eq.s32.totalorder %v4538_v61, %v6243_v50 }
 0x1ea   : > { %v2478_v33 = vadd.f32 %v2414_v63, %v2141_v46  ;;  %v3425_v20 = vsel %vm458_vm10, 1.0, %v4189_v37  ;;  %v3491_v17 = vsel %vm812_vm11, 1.0, %v4189_v37  ;;  %v3557_v26 = vsel %vm1161_vm13, 1.0, %v4189_v37 }
 0x1eb   : > { %v657_v14 = vmul.f32 %v3425_v20, %v4451_v8  ;;  %v1011_v41 = vmul.f32 %v3491_v17, %v4458_v12  ;;  %v1360_v19 = vmul.f32 %v3557_v26, %v4490_v38  ;;  %v3622_v34 = vsel %vm1498_vm14, 1.0, %v4189_v37 }
 0x1ec   : > { %v2818_v40 = vadd.f32 %v2754_v58, %v2478_v33  ;;  %v1697_v31 = vmul.f32 %v3622_v34, %v4499_v23  ;;  %vm1839_vm7 = vcmp.eq.s32.totalorder %v4540_v62, %v6243_v50  ;;  %vm2176_vm12 = vcmp.eq.s32.totalorder %v4543_v1, %v6243_v50 }
 0x1ed   : > { %v1075_v63 = vadd.f32 %v1011_v41, %v657_v14  ;;  %v3687_v11 = vsel %vm1839_vm7, 1.0, %v4189_v37  ;;  %v3752_v47 = vsel %vm2176_vm12, 1.0, %v4189_v37  ;;  %vm2516_vm15 = vcmp.eq.s32.totalorder %v4596_v10, %v6243_v50 }
 0x1ee   : > { %v3155_v25 = vadd.f32 %v3091_v7, %v2818_v40  ;;  %v2038_v29 = vmul.f32 %v3687_v11, %v4501_v43  ;;  %v2375_v58 = vmul.f32 %v3752_v47, %v4545_v2  ;;  %v3817_v49 = vsel %vm2516_vm15, 1.0, %v4189_v37 }
 0x1ef   : > { %v1424_v0 = vadd.f32 %v1360_v19, %v1075_v63  ;;  %v2715_v46 = vmul.f32 %v3817_v49, %v4586_v39  ;;  %vm2853_vm0 = vcmp.eq.s32.totalorder %v4601_v54, %v6243_v50  ;;  %vm490_vm1 = vcmp.eq.s32.totalorder %v4463_v16, %v6249_v57 }
 0x1f0   : > { %3212 = vmatpush.msra.mxu1 %v3155_v25  ;;  %v3882_v33 = vsel %vm2853_vm0, 1.0, %v4189_v37  ;;  %v3457_v7 = vsel %vm490_vm1, 1.0, %v4189_v37  ;;  %vm844_vm2 = vcmp.eq.s32.totalorder %v4497_v42, %v6249_v57  ;;  %vm1193_vm3 = vcmp.eq.s32.totalorder %v4536_v59, %v6249_v57 }
 0x1f1   : > { %v1761_v20 = vadd.f32 %v1697_v31, %v1424_v0  ;;  %v3052_v17 = vmul.f32 %v3882_v33, %v4607_v6  ;;  %v689_v26 = vmul.f32 %v3457_v7, %v4451_v8  ;;  %v3523_v14 = vsel %vm844_vm2, 1.0, %v4189_v37 }
 0x1f2   : > { %v1043_v41 = vmul.f32 %v3523_v14, %v4458_v12  ;;  %v3589_v19 = vsel %vm1193_vm3, 1.0, %v4189_v37  ;;  %vm1530_vm4 = vcmp.eq.s32.totalorder %v4538_v61, %v6249_v57  ;;  %vm1871_vm8 = vcmp.eq.s32.totalorder %v4540_v62, %v6249_v57 }
 0x1f3   : > { %v2102_v34 = vadd.f32 %v2038_v29, %v1761_v20  ;;  %v1392_v40 = vmul.f32 %v3589_v19, %v4490_v38  ;;  %v3654_v31 = vsel %vm1530_vm4, 1.0, %v4189_v37  ;;  %v3719_v63 = vsel %vm1871_vm8, 1.0, %v4189_v37 }
 0x1f4   : > { %v1107_v11 = vadd.f32 %v1043_v41, %v689_v26  ;;  %v1729_v47 = vmul.f32 %v3654_v31, %v4499_v23  ;;  %v2070_v25 = vmul.f32 %v3719_v63, %v4501_v43  ;;  %vm2208_vm5 = vcmp.eq.s32.totalorder %v4543_v1, %v6249_v57 }
 0x1f5   : > { %v2439_v49 = vadd.f32 %v2375_v58, %v2102_v34  ;;  %v3784_v0 = vsel %vm2208_vm5, 1.0, %v4189_v37  ;;  %vm2548_vm9 = vcmp.eq.s32.totalorder %v4596_v10, %v6249_v57  ;;  %vm2885_vm6 = vcmp.eq.s32.totalorder %v4601_v54, %v6249_v57 }
 0x1f6   : > { %v1456_v29 = vadd.f32 %v1392_v40, %v1107_v11  ;;  %v2407_v33 = vmul.f32 %v3784_v0, %v4545_v2  ;;  %v3849_v7 = vsel %vm2548_vm9, 1.0, %v4189_v37  ;;  %v3914_v20 = vsel %vm2885_vm6, 1.0, %v4189_v37 }
 0x1f7   : > { %v2779_v26 = vadd.f32 %v2715_v46, %v2439_v49  ;;  %v2747_v14 = vmul.f32 %v3849_v7, %v4586_v39  ;;  %v3084_v58 = vmul.f32 %v3914_v20, %v4607_v6  ;;  %v1016_v41 = vmul.f32 %v3496_v27, %v4876_v51 }
 0x1f8   : > { %v1793_v19 = vadd.f32 %v1729_v47, %v1456_v29  ;;  %vm1166_vm10 = vcmp.eq.s32.totalorder %v4878_v55, %v5820_v48  ;;  %vm1503_vm11 = vcmp.eq.s32.totalorder %v4889_v22, %v5820_v48  ;;  %vm1844_vm13 = vcmp.eq.s32.totalorder %v4895_v36, %v5820_v48 }
 0x1f9   : > { %v3116_v34 = vadd.f32 %v3052_v17, %v2779_v26  ;;  %v1080_v40 = vadd.f32 %v1016_v41, %v6252_v9  ;;  %v3562_v46 = vsel %vm1166_vm10, 1.0, %v4189_v37  ;;  %v3627_v31 = vsel %vm1503_vm11, 1.0, %v4189_v37 }
 0x1fa   : > { %v2134_v63 = vadd.f32 %v2070_v25, %v1793_v19  ;;  %v1365_v27 = vmul.f32 %v3562_v46, %v4880_v56  ;;  %v1702_v11 = vmul.f32 %v3627_v31, %v4891_v24  ;;  %v3692_v47 = vsel %vm1844_vm13, 1.0, %v4189_v37 }
 0x1fb   : > { %3236 = vmatpush.msra.mxu2 %v3116_v34  ;;  %v2043_v49 = vmul.f32 %v3692_v47, %v4900_v21  ;;  %vm2181_vm14 = vcmp.eq.s32.totalorder %v4902_v30, %v5820_v48  ;;  %vm2521_vm7 = vcmp.eq.s32.totalorder %v4921_v13, %v5820_v48  ;;  %vm2858_vm12 = vcmp.eq.s32.totalorder %v4929_v32, %v5820_v48 }
 0x1fc   : > { %v2471_v9 = vadd.f32 %v2407_v33, %v2134_v63  ;;  %v1429_v17 = vadd.f32 %v1365_v27, %v1080_v40  ;;  %v3757_v25 = vsel %vm2181_vm14, 1.0, %v4189_v37  ;;  %v3822_v0 = vsel %vm2521_vm7, 1.0, %v4189_v37 }
 0x1fd   : > { %v2380_v29 = vmul.f32 %v3757_v25, %v4914_v53  ;;  %v2720_v7 = vmul.f32 %v3822_v0, %v4927_v60  ;;  %vm495_vm15 = vcmp.eq.s32.totalorder %v4858_v52, %v5826_v35  ;;  %v3887_v41 = vsel %vm2858_vm12, 1.0, %v4189_v37 }
 0x1fe   : > { %v2811_v20 = vadd.f32 %v2747_v14, %v2471_v9  ;;  %v1766_v26 = vadd.f32 %v1702_v11, %v1429_v17  ;;  %v3462_v19 = vsel %vm495_vm15, 1.0, %v4189_v37  ;;  %vm849_vm0 = vcmp.eq.s32.totalorder %v4863_v15, %v5826_v35 }
 0x1ff   : > { %v694_v48 = vmul.f32 %v3462_v19, %v4861_v18  ;;  %vm1198_vm1 = vcmp.eq.s32.totalorder %v4878_v55, %v5826_v35  ;;  %vm1535_vm2 = vcmp.eq.s32.totalorder %v4889_v22, %v5826_v35  ;;  %v3528_v14 = vsel %vm849_vm0, 1.0, %v4189_v37 }
 0x200   : > { %v3148_v33 = vadd.f32 %v3084_v58, %v2811_v20  ;;  %v2107_v34 = vadd.f32 %v2043_v49, %v1766_v26  ;;  %v3594_v40 = vsel %vm1198_vm1, 1.0, %v4189_v37  ;;  %v1048_v46 = vmul.f32 %v3528_v14, %v4876_v51 }
 0x201   : > { %v1397_v31 = vmul.f32 %v3594_v40, %v4880_v56  ;;  %v3659_v63 = vsel %vm1535_vm2, 1.0, %v4189_v37  ;;  %vm1876_vm3 = vcmp.eq.s32.totalorder %v4895_v36, %v5826_v35  ;;  %v3057_v11 = vmul.f32 %v3887_v41, %v4931_v3 }
 0x202   : > { %3256 = vmatpush.msra.mxu3 %v3148_v33  ;;  %v2444_v27 = vadd.f32 %v2380_v29, %v2107_v34  ;;  %v3724_v58 = vsel %vm1876_vm3, 1.0, %v4189_v37  ;;  %vm2213_vm4 = vcmp.eq.s32.totalorder %v4902_v30, %v5826_v35  ;;  %v1112_v47 = vadd.f32 %v1048_v46, %v694_v48 }
 0x203   : > { %v1734_v49 = vmul.f32 %v3659_v63, %v4891_v24  ;;  %v3789_v9 = vsel %vm2213_vm4, 1.0, %v4189_v37  ;;  %vm2553_vm8 = vcmp.eq.s32.totalorder %v4921_v13, %v5826_v35  ;;  %v2075_v25 = vmul.f32 %v3724_v58, %v4900_v21 }
 0x204   : > { %v2784_v17 = vadd.f32 %v2720_v7, %v2444_v27  ;;  %v3854_v0 = vsel %vm2553_vm8, 1.0, %v4189_v37  ;;  %vm2890_vm5 = vcmp.eq.s32.totalorder %v4929_v32, %v5826_v35  ;;  %v1461_v29 = vadd.f32 %v1397_v31, %v1112_v47 }
 0x205   : > { %v2412_v20 = vmul.f32 %v3789_v9, %v4914_v53  ;;  %v3919_v26 = vsel %vm2890_vm5, 1.0, %v4189_v37  ;;  %v347_v41 = vadd.s32 8, %v4336_v4  ;;  %v2752_v48 = vmul.f32 %v3854_v0, %v4927_v60 }
 0x206   : > { %v3121_v19 = vadd.f32 %v3057_v11, %v2784_v17  ;;  %v363_v33 = vadd.s32 136, %v4336_v4  ;;  %vm461_vm9 = vcmp.eq.s32.totalorder %v4858_v52, %v5958_v44  ;;  %v1798_v7 = vadd.f32 %v1734_v49, %v1461_v29 }
 0x207   : > { %v6381_v34 = vadd.s32 %v4338_v5, %v347_v41  ;;  %v3428_v35 = vsel %vm461_vm9, 1.0, %v4189_v37  ;;  %vm815_vm6 = vcmp.eq.s32.totalorder %v4863_v15, %v5958_v44  ;;  %v3089_v14 = vmul.f32 %v3919_v26, %v4931_v3 }
 0x208   : > { %3193 = vmatpush.msra.mxu0 %v3121_v19  ;;  %v6388_v40 = vadd.s32 %v4338_v5, %v363_v33  ;;  %v6391_v46 = vmul.f32 %v3428_v35, %v4861_v18  ;;  %v3494_v31 = vsel %vm815_vm6, 1.0, %v4189_v37  ;;  %v2139_v63 = vadd.f32 %v2075_v25, %v1798_v7 }
 0x209   : > { %vm456_vm10 = vcmp.eq.s32.totalorder %v4463_v16, %v6381_v34  ;;  %vm810_vm11 = vcmp.eq.s32.totalorder %v4497_v42, %v6381_v34  ;;  %vm1159_vm13 = vcmp.eq.s32.totalorder %v4536_v59, %v6381_v34  ;;  %vm1496_vm14 = vcmp.eq.s32.totalorder %v4538_v61, %v6381_v34 }
 0x20a   : > { %v3423_v27 = vsel %vm456_vm10, 1.0, %v4189_v37  ;;  %v3489_v11 = vsel %vm810_vm11, 1.0, %v4189_v37  ;;  %v3555_v58 = vsel %vm1159_vm13, 1.0, %v4189_v37  ;;  %v2476_v47 = vadd.f32 %v2412_v20, %v2139_v63 }
 0x20b   : > { %v655_v49 = vmul.f32 %v3423_v27, %v4451_v8  ;;  %v1009_v9 = vmul.f32 %v3489_v11, %v4458_v12  ;;  %v1358_v17 = vmul.f32 %v3555_v58, %v4490_v38  ;;  %v3620_v25 = vsel %vm1496_vm14, 1.0, %v4189_v37 }
 0x20c   : > { %vm1837_vm7 = vcmp.eq.s32.totalorder %v4540_v62, %v6381_v34  ;;  %vm2174_vm12 = vcmp.eq.s32.totalorder %v4543_v1, %v6381_v34  ;;  %vm2514_vm15 = vcmp.eq.s32.totalorder %v4596_v10, %v6381_v34  ;;  %v2816_v0 = vadd.f32 %v2752_v48, %v2476_v47 }
 0x20d   : > { %v1073_v29 = vadd.f32 %v1009_v9, %v655_v49  ;;  %v1695_v20 = vmul.f32 %v3620_v25, %v4499_v23  ;;  %v3685_v26 = vsel %vm1837_vm7, 1.0, %v4189_v37  ;;  %vm1164_vm0 = vcmp.eq.s32.totalorder %v4878_v55, %v5958_v44 }
 0x20e   : > { %v2036_v41 = vmul.f32 %v3685_v26, %v4501_v43  ;;  %v3750_v19 = vsel %vm2174_vm12, 1.0, %v4189_v37  ;;  %v3815_v33 = vsel %vm2514_vm15, 1.0, %v4189_v37  ;;  %vm2851_vm1 = vcmp.eq.s32.totalorder %v4601_v54, %v6381_v34 }
 0x20f   : > { %v3153_v7 = vadd.f32 %v3089_v14, %v2816_v0  ;;  %v1422_v35 = vadd.f32 %v1358_v17, %v1073_v29  ;;  %v2373_v48 = vmul.f32 %v3750_v19, %v4545_v2  ;;  %v2713_v63 = vmul.f32 %v3815_v33, %v4586_v39 }
 0x210   : > { %v3880_v27 = vsel %vm2851_vm1, 1.0, %v4189_v37  ;;  %vm488_vm2 = vcmp.eq.s32.totalorder %v4463_v16, %v6388_v40  ;;  %vm842_vm3 = vcmp.eq.s32.totalorder %v4497_v42, %v6388_v40  ;;  %vm1191_vm4 = vcmp.eq.s32.totalorder %v4536_v59, %v6388_v40 }
 0x211   : > { %3213 = vmatpush.msra.mxu1 %v3153_v7  ;;  %v1759_v11 = vadd.f32 %v1695_v20, %v1422_v35  ;;  %v3050_v14 = vmul.f32 %v3880_v27, %v4607_v6  ;;  %v3455_v58 = vsel %vm488_vm2, 1.0, %v4189_v37  ;;  %v3521_v47 = vsel %vm842_vm3, 1.0, %v4189_v37 }
 0x212   : > { %v687_v49 = vmul.f32 %v3455_v58, %v4451_v8  ;;  %v1041_v9 = vmul.f32 %v3521_v47, %v4458_v12  ;;  %v3587_v17 = vsel %vm1191_vm4, 1.0, %v4189_v37  ;;  %vm1528_vm8 = vcmp.eq.s32.totalorder %v4538_v61, %v6388_v40 }
 0x213   : > { %v2100_v25 = vadd.f32 %v2036_v41, %v1759_v11  ;;  %v1390_v0 = vmul.f32 %v3587_v17, %v4490_v38  ;;  %v3652_v29 = vsel %vm1528_vm8, 1.0, %v4189_v37  ;;  %vm1869_vm5 = vcmp.eq.s32.totalorder %v4540_v62, %v6388_v40 }
 0x214   : > { %v1105_v20 = vadd.f32 %v1041_v9, %v687_v49  ;;  %v1727_v26 = vmul.f32 %v3652_v29, %v4499_v23  ;;  %v3717_v19 = vsel %vm1869_vm5, 1.0, %v4189_v37  ;;  %vm2206_vm9 = vcmp.eq.s32.totalorder %v4543_v1, %v6388_v40 }
 0x215   : > { %v2437_v33 = vadd.f32 %v2373_v48, %v2100_v25  ;;  %v2068_v7 = vmul.f32 %v3717_v19, %v4501_v43  ;;  %v3782_v41 = vsel %vm2206_vm9, 1.0, %v4189_v37  ;;  %vm2546_vm6 = vcmp.eq.s32.totalorder %v4596_v10, %v6388_v40 }
 0x216   : > { %v1454_v35 = vadd.f32 %v1390_v0, %v1105_v20  ;;  %v2405_v27 = vmul.f32 %v3782_v41, %v4545_v2  ;;  %v3847_v11 = vsel %vm2546_vm6, 1.0, %v4189_v37  ;;  %vm2883_vm10 = vcmp.eq.s32.totalorder %v4601_v54, %v6388_v40 }
 0x217   : > { %v2777_v58 = vadd.f32 %v2713_v63, %v2437_v33  ;;  %v2745_v47 = vmul.f32 %v3847_v11, %v4586_v39  ;;  %v3912_v48 = vsel %vm2883_vm10, 1.0, %v4189_v37  ;;  %v1014_v49 = vmul.f32 %v3494_v31, %v4876_v51 }
 0x218   : > { %v1791_v9 = vadd.f32 %v1727_v26, %v1454_v35  ;;  %v3082_v17 = vmul.f32 %v3912_v48, %v4607_v6  ;;  %v3560_v25 = vsel %vm1164_vm0, 1.0, %v4189_v37  ;;  %vm1501_vm11 = vcmp.eq.s32.totalorder %v4889_v22, %v5958_v44 }
 0x219   : > { %v3114_v0 = vadd.f32 %v3050_v14, %v2777_v58  ;;  %v1078_v63 = vadd.f32 %v1014_v49, %v6391_v46  ;;  %v1363_v29 = vmul.f32 %v3560_v25, %v4880_v56  ;;  %v3625_v20 = vsel %vm1501_vm11, 1.0, %v4189_v37  ;;  %v3176_v46 = vld [vmem:[%s4329_s12] sm:$0xff] }
 0x21a   : > { %v2132_v31 = vadd.f32 %v2068_v7, %v1791_v9  ;;  %v1700_v26 = vmul.f32 %v3625_v20, %v4891_v24  ;;  %vm1842_vm13 = vcmp.eq.s32.totalorder %v4895_v36, %v5958_v44  ;;  %vm2179_vm14 = vcmp.eq.s32.totalorder %v4902_v30, %v5958_v44  ;;  %3178 = vst [vmem:[#allocation1] ss:$2 sm:$0xff] %v3176_v46 }
 0x21b   : > { %3237 = vmatpush.msra.mxu2 %v3114_v0  ;;  %v1427_v19 = vadd.f32 %v1363_v29, %v1078_v63  ;;  %v3690_v33 = vsel %vm1842_vm13, 1.0, %v4189_v37  ;;  %v3755_v14 = vsel %vm2179_vm14, 1.0, %v4189_v37  ;;  %vm2519_vm7 = vcmp.eq.s32.totalorder %v4921_v13, %v5958_v44 }
 0x21c   : > { %v2469_v41 = vadd.f32 %v2405_v27, %v2132_v31  ;;  %v2041_v7 = vmul.f32 %v3690_v33, %v4900_v21  ;;  %v2378_v35 = vmul.f32 %v3755_v14, %v4914_v53  ;;  %v3820_v11 = vsel %vm2519_vm7, 1.0, %v4189_v37 }
 0x21d   : > { %v1764_v58 = vadd.f32 %v1700_v26, %v1427_v19  ;;  %v2718_v48 = vmul.f32 %v3820_v11, %v4927_v60  ;;  %vm2856_vm12 = vcmp.eq.s32.totalorder %v4929_v32, %v5958_v44  ;;  %vm493_vm15 = vcmp.eq.s32.totalorder %v4858_v52, %v5965_v28 }
 0x21e   : > { %v2809_v49 = vadd.f32 %v2745_v47, %v2469_v41  ;;  %v3885_v9 = vsel %vm2856_vm12, 1.0, %v4189_v37  ;;  %v3460_v27 = vsel %vm493_vm15, 1.0, %v4189_v37  ;;  %vm847_vm0 = vcmp.eq.s32.totalorder %v4863_v15, %v5965_v28 }
 0x21f   : > { %v2105_v25 = vadd.f32 %v2041_v7, %v1764_v58  ;;  %v3055_v0 = vmul.f32 %v3885_v9, %v4931_v3  ;;  %v692_v63 = vmul.f32 %v3460_v27, %v4861_v18  ;;  %v3526_v29 = vsel %vm847_vm0, 1.0, %v4189_v37 }
 0x220   : > { %v3146_v20 = vadd.f32 %v3082_v17, %v2809_v49  ;;  %v1046_v44 = vmul.f32 %v3526_v29, %v4876_v51  ;;  %vm1196_vm1 = vcmp.eq.s32.totalorder %v4878_v55, %v5965_v28  ;;  %vm1533_vm2 = vcmp.eq.s32.totalorder %v4889_v22, %v5965_v28 }
 0x221   : > { %v2442_v47 = vadd.f32 %v2378_v35, %v2105_v25  ;;  %v3592_v31 = vsel %vm1196_vm1, 1.0, %v4189_v37  ;;  %v3657_v26 = vsel %vm1533_vm2, 1.0, %v4189_v37  ;;  %vm1874_vm3 = vcmp.eq.s32.totalorder %v4895_v36, %v5965_v28 }
 0x222   : > { %3257 = vmatpush.msra.mxu3 %v3146_v20  ;;  %v1110_v19 = vadd.f32 %v1046_v44, %v692_v63  ;;  %v1395_v17 = vmul.f32 %v3592_v31, %v4880_v56  ;;  %v1732_v33 = vmul.f32 %v3657_v26, %v4891_v24  ;;  %v3722_v14 = vsel %vm1874_vm3, 1.0, %v4189_v37  ;;  %v6966_v20 = vld [vmem:[#allocation16_spill] sm:$0xff] }
 0x223   : > { %v2782_v46 = vadd.f32 %v2718_v48, %v2442_v47  ;;  %v2073_v41 = vmul.f32 %v3722_v14, %v4900_v21  ;;  %vm2211_vm4 = vcmp.eq.s32.totalorder %v4902_v30, %v5965_v28  ;;  %vm2551_vm8 = vcmp.eq.s32.totalorder %v4921_v13, %v5965_v28 }
 0x224   : > { %v1459_v7 = vadd.f32 %v1395_v17, %v1110_v19  ;;  %v3787_v35 = vsel %vm2211_vm4, 1.0, %v4189_v37  ;;  %v3852_v11 = vsel %vm2551_vm8, 1.0, %v4189_v37  ;;  %vm2888_vm5 = vcmp.eq.s32.totalorder %v4929_v32, %v5965_v28 }
 0x225   : > { %v3119_v58 = vadd.f32 %v3055_v0, %v2782_v46  ;;  %v3917_v49 = vsel %vm2888_vm5, 1.0, %v4189_v37  ;;  %v2410_v9 = vmul.f32 %v3787_v35, %v4914_v53  ;;  %v2750_v27 = vmul.f32 %v3852_v11, %v4927_v60 }
 0x226   : > { %v1796_v48 = vadd.f32 %v1732_v33, %v1459_v7  ;;  %v6521_v25 = vadd.s32 %v4338_v5, %v4336_v4  ;;  %v3087_v63 = vmul.f32 %v3917_v49, %v4931_v3  ;;  %v362_v29 = vadd.s32 128, %v4336_v4 }
 0x227   : > { %3194 = vmatpush.msra.mxu0 %v3119_v58  ;;  %vm459_vm9 = vcmp.eq.s32.totalorder %v4858_v52, %v6966_v20  ;;  %vm813_vm6 = vcmp.eq.s32.totalorder %v4863_v15, %v6966_v20  ;;  %vm1162_vm1 = vcmp.eq.s32.totalorder %v4878_v55, %v6966_v20  ;;  %vm1499_vm2 = vcmp.eq.s32.totalorder %v4889_v22, %v6966_v20 }
 0x228   : > { %v2137_v28 = vadd.f32 %v2073_v41, %v1796_v48  ;;  %vm454_vm10 = vcmp.eq.s32.totalorder %v4463_v16, %v6521_v25  ;;  %vm808_vm11 = vcmp.eq.s32.totalorder %v4497_v42, %v6521_v25  ;;  %vm1157_vm13 = vcmp.eq.s32.totalorder %v4536_v59, %v6521_v25 }
 0x229   : > { %v3421_v0 = vsel %vm454_vm10, 1.0, %v4189_v37  ;;  %v3487_v4 = vsel %vm808_vm11, 1.0, %v4189_v37  ;;  %v3553_v44 = vsel %vm1157_vm13, 1.0, %v4189_v37  ;;  %vm1494_vm14 = vcmp.eq.s32.totalorder %v4538_v61, %v6521_v25 }
 0x22a   : > { %v2474_v47 = vadd.f32 %v2410_v9, %v2137_v28  ;;  %v653_v31 = vmul.f32 %v3421_v0, %v4451_v8  ;;  %v1007_v26 = vmul.f32 %v3487_v4, %v4458_v12  ;;  %v1356_v19 = vmul.f32 %v3553_v44, %v4490_v38 }
 0x22b   : > { %v3618_v17 = vsel %vm1494_vm14, 1.0, %v4189_v37  ;;  %vm1835_vm7 = vcmp.eq.s32.totalorder %v4540_v62, %v6521_v25  ;;  %vm2172_vm12 = vcmp.eq.s32.totalorder %v4543_v1, %v6521_v25  ;;  %vm2512_vm15 = vcmp.eq.s32.totalorder %v4596_v10, %v6521_v25 }
 0x22c   : > { %v2814_v33 = vadd.f32 %v2750_v27, %v2474_v47  ;;  %v1071_v14 = vadd.f32 %v1007_v26, %v653_v31  ;;  %v1693_v46 = vmul.f32 %v3618_v17, %v4499_v23  ;;  %v3683_v41 = vsel %vm1835_vm7, 1.0, %v4189_v37 }
 0x22d   : > { %v2034_v7 = vmul.f32 %v3683_v41, %v4501_v43  ;;  %v3748_v35 = vsel %vm2172_vm12, 1.0, %v4189_v37  ;;  %v3813_v11 = vsel %vm2512_vm15, 1.0, %v4189_v37  ;;  %vm2849_vm0 = vcmp.eq.s32.totalorder %v4601_v54, %v6521_v25 }
 0x22e   : > { %v3151_v58 = vadd.f32 %v3087_v63, %v2814_v33  ;;  %v1420_v49 = vadd.f32 %v1356_v19, %v1071_v14  ;;  %v2371_v48 = vmul.f32 %v3748_v35, %v4545_v2  ;;  %v2711_v9 = vmul.f32 %v3813_v11, %v4586_v39 }
 0x22f   : > { %v3878_v27 = vsel %vm2849_vm0, 1.0, %v4189_v37  ;;  %v6565_v28 = vadd.s32 %v4338_v5, %v362_v29  ;;  %v3426_v0 = vsel %vm459_vm9, 1.0, %v4189_v37  ;;  %v3492_v63 = vsel %vm813_vm6, 1.0, %v4189_v37 }
 0x230   : > { %3214 = vmatpush.msra.mxu1 %v3151_v58  ;;  %v1757_v4 = vadd.f32 %v1693_v46, %v1420_v49  ;;  %v3048_v44 = vmul.f32 %v3878_v27, %v4607_v6  ;;  %v658_v47 = vmul.f32 %v3426_v0, %v4861_v18  ;;  %v1012_v31 = vmul.f32 %v3492_v63, %v4876_v51  ;;  %v6609_v58 = vld.sshfl [vmem:[#allocation1] sm:$0xff pattern:$0x75316420] }
 0x231   : > { %vm486_vm3 = vcmp.eq.s32.totalorder %v4463_v16, %v6565_v28  ;;  %vm840_vm4 = vcmp.eq.s32.totalorder %v4497_v42, %v6565_v28  ;;  %vm1189_vm8 = vcmp.eq.s32.totalorder %v4536_v59, %v6565_v28  ;;  %vm1526_vm5 = vcmp.eq.s32.totalorder %v4538_v61, %v6565_v28 }
 0x232   : > { %v2098_v5 = vadd.f32 %v2034_v7, %v1757_v4  ;;  %v3453_v29 = vsel %vm486_vm3, 1.0, %v4189_v37  ;;  %v3519_v26 = vsel %vm840_vm4, 1.0, %v4189_v37  ;;  %v3585_v19 = vsel %vm1189_vm8, 1.0, %v4189_v37 }
 0x233   : > { %v685_v17 = vmul.f32 %v3453_v29, %v4451_v8  ;;  %v1039_v16 = vmul.f32 %v3519_v26, %v4458_v12  ;;  %v1388_v33 = vmul.f32 %v3585_v19, %v4490_v38  ;;  %v3650_v42 = vsel %vm1526_vm5, 1.0, %v4189_v37 }
 0x234   : > { %v2435_v14 = vadd.f32 %v2371_v48, %v2098_v5  ;;  %v1725_v59 = vmul.f32 %v3650_v42, %v4499_v23  ;;  %vm1867_vm9 = vcmp.eq.s32.totalorder %v4540_v62, %v6565_v28  ;;  %vm2204_vm6 = vcmp.eq.s32.totalorder %v4543_v1, %v6565_v28 }
 0x235   : > { %v1103_v61 = vadd.f32 %v1039_v16, %v685_v17  ;;  %v3715_v46 = vsel %vm1867_vm9, 1.0, %v4189_v37  ;;  %v3780_v8 = vsel %vm2204_vm6, 1.0, %v4189_v37  ;;  %vm2544_vm10 = vcmp.eq.s32.totalorder %v4596_v10, %v6565_v28 }
 0x236   : > { %v2775_v12 = vadd.f32 %v2711_v9, %v2435_v14  ;;  %v2066_v38 = vmul.f32 %v3715_v46, %v4501_v43  ;;  %v2403_v41 = vmul.f32 %v3780_v8, %v4545_v2  ;;  %v3845_v23 = vsel %vm2544_vm10, 1.0, %v4189_v37 }
 0x237   : > { %v1452_v7 = vadd.f32 %v1388_v33, %v1103_v61  ;;  %v2743_v62 = vmul.f32 %v3845_v23, %v4586_v39  ;;  %vm2881_vm11 = vcmp.eq.s32.totalorder %v4601_v54, %v6565_v28  ;;  %v1076_v1 = vadd.f32 %v1012_v31, %v658_v47  ;;  %v6653_v61 = vld.sshfl [vmem:[#allocation1 + $0x8] sm:$0xff pattern:$0x75316420] }
 0x238   : > { %v3112_v35 = vadd.f32 %v3048_v44, %v2775_v12  ;;  %v3910_v11 = vsel %vm2881_vm11, 1.0, %v4189_v37  ;;  %v3558_v43 = vsel %vm1162_vm1, 1.0, %v4189_v37  ;;  %v3623_v2 = vsel %vm1499_vm2, 1.0, %v4189_v37 }
 0x239   : > { %v1789_v39 = vadd.f32 %v1725_v59, %v1452_v7  ;;  %v3080_v10 = vmul.f32 %v3910_v11, %v4607_v6  ;;  %v1361_v54 = vmul.f32 %v3558_v43, %v4880_v56  ;;  %v1698_v49 = vmul.f32 %v3623_v2, %v4891_v24 }
 0x23a   : > { %3238 = vmatpush.msra.mxu2 %v3112_v35  ;;  %vm1840_vm13 = vcmp.eq.s32.totalorder %v4895_v36, %v6966_v20  ;;  %vm2177_vm14 = vcmp.eq.s32.totalorder %v4902_v30, %v6966_v20  ;;  %vm2517_vm7 = vcmp.eq.s32.totalorder %v4921_v13, %v6966_v20  ;;  %vm2854_vm12 = vcmp.eq.s32.totalorder %v4929_v32, %v6966_v20 }
 0x23b   : > { %v2130_v48 = vadd.f32 %v2066_v38, %v1789_v39  ;;  %3239 = vmatmul.f32.vlgmr.msra.gmra.mxu2 %v6609_v58  ;;  %v1425_v6 = vadd.f32 %v1361_v54, %v1076_v1  ;;  %v3688_v9 = vsel %vm1840_vm13, 1.0, %v4189_v37  ;;  %v3753_v27 = vsel %vm2177_vm14, 1.0, %v4189_v37 }
 0x23c   : > { %v2039_v0 = vmul.f32 %v3688_v9, %v4900_v21  ;;  %v2376_v63 = vmul.f32 %v3753_v27, %v4914_v53  ;;  %v3818_v4 = vsel %vm2517_vm7, 1.0, %v4189_v37  ;;  %v3883_v44 = vsel %vm2854_vm12, 1.0, %v4189_v37 }
 0x23d   : > { %v2467_v47 = vadd.f32 %v2403_v41, %v2130_v48  ;;  %v1762_v31 = vadd.f32 %v1698_v49, %v1425_v6  ;;  %v2716_v20 = vmul.f32 %v3818_v4, %v4927_v60  ;;  %v3053_v5 = vmul.f32 %v3883_v44, %v4931_v3 }
 0x23e   : > { %vm491_vm15 = vcmp.eq.s32.totalorder %v4858_v52, %v6110_v45  ;;  %vm845_vm0 = vcmp.eq.s32.totalorder %v4863_v15, %v6110_v45  ;;  %vm1194_vm1 = vcmp.eq.s32.totalorder %v4878_v55, %v6110_v45  ;;  %vm1531_vm2 = vcmp.eq.s32.totalorder %v4889_v22, %v6110_v45 }
 0x23f   : > { %v2807_v29 = vadd.f32 %v2743_v62, %v2467_v47  ;;  %v2103_v26 = vadd.f32 %v2039_v0, %v1762_v31  ;;  %v3458_v19 = vsel %vm491_vm15, 1.0, %v4189_v37  ;;  %v3524_v17 = vsel %vm845_vm0, 1.0, %v4189_v37 }
 0x240   : > { %v690_v16 = vmul.f32 %v3458_v19, %v4861_v18  ;;  %v1044_v33 = vmul.f32 %v3524_v17, %v4876_v51  ;;  %v3590_v42 = vsel %vm1194_vm1, 1.0, %v4189_v37  ;;  %v3655_v14 = vsel %vm1531_vm2, 1.0, %v4189_v37 }
 0x241   : > { %v3144_v59 = vadd.f32 %v3080_v10, %v2807_v29  ;;  %v2440_v46 = vadd.f32 %v2376_v63, %v2103_v26  ;;  %v1393_v8 = vmul.f32 %v3590_v42, %v4880_v56  ;;  %v1730_v12 = vmul.f32 %v3655_v14, %v4891_v24 }
 0x242   : > { %v1108_v38 = vadd.f32 %v1044_v33, %v690_v16  ;;  %vm1872_vm3 = vcmp.eq.s32.totalorder %v4895_v36, %v6110_v45  ;;  %vm2209_vm4 = vcmp.eq.s32.totalorder %v4902_v30, %v6110_v45  ;;  %vm2549_vm8 = vcmp.eq.s32.totalorder %v4921_v13, %v6110_v45 }
 0x243   : > { %3258 = vmatpush.msra.mxu3 %v3144_v59  ;;  %v2780_v41 = vadd.f32 %v2716_v20, %v2440_v46  ;;  %v3720_v23 = vsel %vm1872_vm3, 1.0, %v4189_v37  ;;  %v3785_v7 = vsel %vm2209_vm4, 1.0, %v4189_v37  ;;  %v3850_v62 = vsel %vm2549_vm8, 1.0, %v4189_v37 }
 0x244   : > { %3259 = vmatmul.f32.vlgmr.msra.gmra.mxu3 %v6653_v61  ;;  %v1457_v1 = vadd.f32 %v1393_v8, %v1108_v38  ;;  %v2071_v35 = vmul.f32 %v3720_v23, %v4900_v21  ;;  %v2408_v11 = vmul.f32 %v3785_v7, %v4914_v53  ;;  %v2748_v43 = vmul.f32 %v3850_v62, %v4927_v60 }
 0x245   : > { %v3117_v2 = vadd.f32 %v3053_v5, %v2780_v41  ;;  %vm2886_vm5 = vcmp.eq.s32.totalorder %v4929_v32, %v6110_v45  ;;  %vm457_vm9 = vcmp.eq.s32.totalorder %v4858_v52, %v6243_v50  ;;  %vm811_vm6 = vcmp.eq.s32.totalorder %v4863_v15, %v6243_v50 }
 0x246   : > { %v1794_v39 = vadd.f32 %v1730_v12, %v1457_v1  ;;  %v3915_v10 = vsel %vm2886_vm5, 1.0, %v4189_v37  ;;  %v3424_v54 = vsel %vm457_vm9, 1.0, %v4189_v37  ;;  %v3490_v49 = vsel %vm811_vm6, 1.0, %v4189_v37 }
 0x247   : > { %3195 = vmatpush.msra.mxu0 %v3117_v2  ;;  %v3085_v48 = vmul.f32 %v3915_v10, %v4931_v3  ;;  %v656_v6 = vmul.f32 %v3424_v54, %v4861_v18  ;;  %v1010_v45 = vmul.f32 %v3490_v49, %v4876_v51  ;;  %vm1160_vm10 = vcmp.eq.s32.totalorder %v4878_v55, %v6243_v50 }
 0x248   : > { %v2135_v9 = vadd.f32 %v2071_v35, %v1794_v39  ;;  %v3556_v27 = vsel %vm1160_vm10, 1.0, %v4189_v37  ;;  %vm1497_vm11 = vcmp.eq.s32.totalorder %v4889_v22, %v6243_v50  ;;  %vm1838_vm13 = vcmp.eq.s32.totalorder %v4895_v36, %v6243_v50 }
 0x249   : > { %v1074_v0 = vadd.f32 %v1010_v45, %v656_v6  ;;  %v1359_v63 = vmul.f32 %v3556_v27, %v4880_v56  ;;  %v3621_v4 = vsel %vm1497_vm11, 1.0, %v4189_v37  ;;  %v3686_v44 = vsel %vm1838_vm13, 1.0, %v4189_v37 }
 0x24a   : > { %v2472_v47 = vadd.f32 %v2408_v11, %v2135_v9  ;;  %v1696_v31 = vmul.f32 %v3621_v4, %v4891_v24  ;;  %v2037_v20 = vmul.f32 %v3686_v44, %v4900_v21  ;;  %vm2175_vm14 = vcmp.eq.s32.totalorder %v4902_v30, %v6243_v50 }
 0x24b   : > { %v1423_v5 = vadd.f32 %v1359_v63, %v1074_v0  ;;  %v3751_v29 = vsel %vm2175_vm14, 1.0, %v4189_v37  ;;  %vm2515_vm7 = vcmp.eq.s32.totalorder %v4921_v13, %v6243_v50  ;;  %vm2852_vm12 = vcmp.eq.s32.totalorder %v4929_v32, %v6243_v50 }
 0x24c   : > { %v2812_v26 = vadd.f32 %v2748_v43, %v2472_v47  ;;  %v2374_v19 = vmul.f32 %v3751_v29, %v4914_v53  ;;  %v3816_v17 = vsel %vm2515_vm7, 1.0, %v4189_v37  ;;  %v3881_v16 = vsel %vm2852_vm12, 1.0, %v4189_v37 }
 0x24d   : > { %v1760_v33 = vadd.f32 %v1696_v31, %v1423_v5  ;;  %v2714_v42 = vmul.f32 %v3816_v17, %v4927_v60  ;;  %v3051_v14 = vmul.f32 %v3881_v16, %v4931_v3  ;;  %vm489_vm15 = vcmp.eq.s32.totalorder %v4858_v52, %v6249_v57 }
 0x24e   : > { %v3149_v59 = vadd.f32 %v3085_v48, %v2812_v26  ;;  %v3456_v46 = vsel %vm489_vm15, 1.0, %v4189_v37  ;;  %vm843_vm0 = vcmp.eq.s32.totalorder %v4863_v15, %v6249_v57  ;;  %vm1192_vm1 = vcmp.eq.s32.totalorder %v4878_v55, %v6249_v57 }
 0x24f   : > { %v2101_v50 = vadd.f32 %v2037_v20, %v1760_v33  ;;  %v688_v8 = vmul.f32 %v3456_v46, %v4861_v18  ;;  %v3522_v12 = vsel %vm843_vm0, 1.0, %v4189_v37  ;;  %v3588_v38 = vsel %vm1192_vm1, 1.0, %v4189_v37 }
 0x250   : > { %3215 = vmatpush.msra.mxu1 %v3149_v59  ;;  %v1042_v41 = vmul.f32 %v3522_v12, %v4876_v51  ;;  %v1391_v23 = vmul.f32 %v3588_v38, %v4880_v56  ;;  %vm1529_vm2 = vcmp.eq.s32.totalorder %v4889_v22, %v6249_v57  ;;  %vm1870_vm3 = vcmp.eq.s32.totalorder %v4895_v36, %v6249_v57 }
 0x251   : > { %v2438_v7 = vadd.f32 %v2374_v19, %v2101_v50  ;;  %v3653_v62 = vsel %vm1529_vm2, 1.0, %v4189_v37  ;;  %v3718_v1 = vsel %vm1870_vm3, 1.0, %v4189_v37  ;;  %vm2207_vm4 = vcmp.eq.s32.totalorder %v4902_v30, %v6249_v57 }
 0x252   : > { %v1106_v35 = vadd.f32 %v1042_v41, %v688_v8  ;;  %v1728_v11 = vmul.f32 %v3653_v62, %v4891_v24  ;;  %v2069_v43 = vmul.f32 %v3718_v1, %v4900_v21  ;;  %v3783_v2 = vsel %vm2207_vm4, 1.0, %v4189_v37 }
 0x253   : > { %v2778_v39 = vadd.f32 %v2714_v42, %v2438_v7  ;;  %v2406_v10 = vmul.f32 %v3783_v2, %v4914_v53  ;;  %vm2547_vm8 = vcmp.eq.s32.totalorder %v4921_v13, %v6249_v57  ;;  %vm2884_vm5 = vcmp.eq.s32.totalorder %v4929_v32, %v6249_v57 }
 0x254   : > { %v1455_v54 = vadd.f32 %v1391_v23, %v1106_v35  ;;  %v3848_v49 = vsel %vm2547_vm8, 1.0, %v4189_v37  ;;  %v3913_v48 = vsel %vm2884_vm5, 1.0, %v4189_v37  ;;  %vm455_vm9 = vcmp.eq.s32.totalorder %v4858_v52, %v6381_v34 }
 0x255   : > { %v3115_v6 = vadd.f32 %v3051_v14, %v2778_v39  ;;  %v2746_v45 = vmul.f32 %v3848_v49, %v4927_v60  ;;  %v3083_v9 = vmul.f32 %v3913_v48, %v4931_v3  ;;  %v3422_v27 = vsel %vm455_vm9, 1.0, %v4189_v37 }
 0x256   : > { %v1792_v0 = vadd.f32 %v1728_v11, %v1455_v54  ;;  %v654_v63 = vmul.f32 %v3422_v27, %v4861_v18  ;;  %vm809_vm6 = vcmp.eq.s32.totalorder %v4863_v15, %v6381_v34  ;;  %vm1158_vm10 = vcmp.eq.s32.totalorder %v4878_v55, %v6381_v34 }
 0x257   : > { %3196 = vmatpush.msra.mxu0 %v3115_v6  ;;  %v3488_v57 = vsel %vm809_vm6, 1.0, %v4189_v37  ;;  %v3554_v4 = vsel %vm1158_vm10, 1.0, %v4189_v37  ;;  %vm1495_vm11 = vcmp.eq.s32.totalorder %v4889_v22, %v6381_v34  ;;  %vm1836_vm13 = vcmp.eq.s32.totalorder %v4895_v36, %v6381_v34 }
 0x258   : > { %v2133_v44 = vadd.f32 %v2069_v43, %v1792_v0  ;;  %v1008_v47 = vmul.f32 %v3488_v57, %v4876_v51  ;;  %v1357_v31 = vmul.f32 %v3554_v4, %v4880_v56  ;;  %v3619_v20 = vsel %vm1495_vm11, 1.0, %v4189_v37 }
 0x259   : > { %v1694_v5 = vmul.f32 %v3619_v20, %v4891_v24  ;;  %v3684_v29 = vsel %vm1836_vm13, 1.0, %v4189_v37  ;;  %vm2173_vm14 = vcmp.eq.s32.totalorder %v4902_v30, %v6381_v34  ;;  %vm2513_vm7 = vcmp.eq.s32.totalorder %v4921_v13, %v6381_v34 }
 0x25a   : > { %v2470_v26 = vadd.f32 %v2406_v10, %v2133_v44  ;;  %v1072_v19 = vadd.f32 %v1008_v47, %v654_v63  ;;  %v2035_v17 = vmul.f32 %v3684_v29, %v4900_v21  ;;  %v3749_v16 = vsel %vm2173_vm14, 1.0, %v4189_v37 }
 0x25b   : > { %v2372_v33 = vmul.f32 %v3749_v16, %v4914_v53  ;;  %v3814_v42 = vsel %vm2513_vm7, 1.0, %v4189_v37  ;;  %vm2850_vm12 = vcmp.eq.s32.totalorder %v4929_v32, %v6381_v34  ;;  %vm487_vm15 = vcmp.eq.s32.totalorder %v4858_v52, %v6388_v40 }
 0x25c   : > { %v2810_v14 = vadd.f32 %v2746_v45, %v2470_v26  ;;  %v1421_v59 = vadd.f32 %v1357_v31, %v1072_v19  ;;  %v2712_v46 = vmul.f32 %v3814_v42, %v4927_v60  ;;  %v3879_v50 = vsel %vm2850_vm12, 1.0, %v4189_v37 }
 0x25d   : > { %v3049_v8 = vmul.f32 %v3879_v50, %v4931_v3  ;;  %v3454_v12 = vsel %vm487_vm15, 1.0, %v4189_v37  ;;  %vm841_vm0 = vcmp.eq.s32.totalorder %v4863_v15, %v6388_v40  ;;  %vm1190_vm1 = vcmp.eq.s32.totalorder %v4878_v55, %v6388_v40 }
 0x25e   : > { %v3147_v34 = vadd.f32 %v3083_v9, %v2810_v14  ;;  %v1758_v38 = vadd.f32 %v1694_v5, %v1421_v59  ;;  %v686_v41 = vmul.f32 %v3454_v12, %v4861_v18  ;;  %v3520_v23 = vsel %vm841_vm0, 1.0, %v4189_v37 }
 0x25f   : > { %v1040_v7 = vmul.f32 %v3520_v23, %v4876_v51  ;;  %v3586_v62 = vsel %vm1190_vm1, 1.0, %v4189_v37  ;;  %vm1527_vm2 = vcmp.eq.s32.totalorder %v4889_v22, %v6388_v40  ;;  %vm1868_vm3 = vcmp.eq.s32.totalorder %v4895_v36, %v6388_v40 }
 0x260   : > { %3216 = vmatpush.msra.mxu1 %v3147_v34  ;;  %v2099_v1 = vadd.f32 %v2035_v17, %v1758_v38  ;;  %v1389_v35 = vmul.f32 %v3586_v62, %v4880_v56  ;;  %v3651_v11 = vsel %vm1527_vm2, 1.0, %v4189_v37  ;;  %v3716_v43 = vsel %vm1868_vm3, 1.0, %v4189_v37 }
 0x261   : > { %v1104_v2 = vadd.f32 %v1040_v7, %v686_v41  ;;  %v1726_v39 = vmul.f32 %v3651_v11, %v4891_v24  ;;  %v2067_v10 = vmul.f32 %v3716_v43, %v4900_v21  ;;  %vm2205_vm4 = vcmp.eq.s32.totalorder %v4902_v30, %v6388_v40 }
 0x262   : > { %v2436_v54 = vadd.f32 %v2372_v33, %v2099_v1  ;;  %v3781_v49 = vsel %vm2205_vm4, 1.0, %v4189_v37  ;;  %vm2545_vm8 = vcmp.eq.s32.totalorder %v4921_v13, %v6388_v40  ;;  %vm2882_vm5 = vcmp.eq.s32.totalorder %v4929_v32, %v6388_v40 }
 0x263   : > { %v1453_v48 = vadd.f32 %v1389_v35, %v1104_v2  ;;  %v2404_v6 = vmul.f32 %v3781_v49, %v4914_v53  ;;  %v3846_v45 = vsel %vm2545_vm8, 1.0, %v4189_v37  ;;  %v3911_v9 = vsel %vm2882_vm5, 1.0, %v4189_v37 }
 0x264   : > { %v2776_v27 = vadd.f32 %v2712_v46, %v2436_v54  ;;  %v2744_v0 = vmul.f32 %v3846_v45, %v4927_v60  ;;  %v3081_v63 = vmul.f32 %v3911_v9, %v4931_v3  ;;  %vm453_vm9 = vcmp.eq.s32.totalorder %v4858_v52, %v6521_v25 }
 0x265   : > { %v1790_v57 = vadd.f32 %v1726_v39, %v1453_v48  ;;  %v3420_v4 = vsel %vm453_vm9, 1.0, %v4189_v37  ;;  %vm807_vm6 = vcmp.eq.s32.totalorder %v4863_v15, %v6521_v25  ;;  %vm1156_vm10 = vcmp.eq.s32.totalorder %v4878_v55, %v6521_v25 }
 0x266   : > { %v3113_v40 = vadd.f32 %v3049_v8, %v2776_v27  ;;  %v652_v44 = vmul.f32 %v3420_v4, %v4861_v18  ;;  %v3486_v47 = vsel %vm807_vm6, 1.0, %v4189_v37  ;;  %v3552_v31 = vsel %vm1156_vm10, 1.0, %v4189_v37 }
 0x267   : > { %v2131_v20 = vadd.f32 %v2067_v10, %v1790_v57  ;;  %v1006_v5 = vmul.f32 %v3486_v47, %v4876_v51  ;;  %v1355_v29 = vmul.f32 %v3552_v31, %v4880_v56  ;;  %vm1493_vm11 = vcmp.eq.s32.totalorder %v4889_v22, %v6521_v25 }
 0x268   : > { %3197 = vmatpush.msra.mxu0 %v3113_v40  ;;  %v3617_v26 = vsel %vm1493_vm11, 1.0, %v4189_v37  ;;  %vm1834_vm13 = vcmp.eq.s32.totalorder %v4895_v36, %v6521_v25  ;;  %vm2171_vm14 = vcmp.eq.s32.totalorder %v4902_v30, %v6521_v25  ;;  %vm2511_vm7 = vcmp.eq.s32.totalorder %v4921_v13, %v6521_v25 }
 0x269   : > { %v2468_v19 = vadd.f32 %v2404_v6, %v2131_v20  ;;  %v1070_v17 = vadd.f32 %v1006_v5, %v652_v44  ;;  %v1692_v16 = vmul.f32 %v3617_v26, %v4891_v24  ;;  %v3682_v33 = vsel %vm1834_vm13, 1.0, %v4189_v37 }
 0x26a   : > { %v3747_v42 = vsel %vm2171_vm14, 1.0, %v4189_v37  ;;  %v3812_v14 = vsel %vm2511_vm7, 1.0, %v4189_v37  ;;  %vm2848_vm12 = vcmp.eq.s32.totalorder %v4929_v32, %v6521_v25  ;;  %v2033_v50 = vmul.f32 %v3682_v33, %v4900_v21 }
 0x26b   : > { %v2808_v59 = vadd.f32 %v2744_v0, %v2468_v19  ;;  %v1419_v46 = vadd.f32 %v1355_v29, %v1070_v17  ;;  %v2370_v8 = vmul.f32 %v3747_v42, %v4914_v53  ;;  %v2710_v12 = vmul.f32 %v3812_v14, %v4927_v60  ;;  %v3175_v0 = vld [vmem:[#allocation2] sm:$0xff] }
 0x26c   : > { %vm485_vm15 = vcmp.eq.s32.totalorder %v4858_v52, %v6565_v28  ;;  %vm839_vm0 = vcmp.eq.s32.totalorder %v4863_v15, %v6565_v28  ;;  %vm1188_vm1 = vcmp.eq.s32.totalorder %v4878_v55, %v6565_v28  ;;  %v3877_v25 = vsel %vm2848_vm12, 1.0, %v4189_v37 }
 0x26d   : > { %v3145_v34 = vadd.f32 %v3081_v63, %v2808_v59  ;;  %v1756_v38 = vadd.f32 %v1692_v16, %v1419_v46  ;;  %v3452_v41 = vsel %vm485_vm15, 1.0, %v4189_v37  ;;  %v3518_v7 = vsel %vm839_vm0, 1.0, %v4189_v37 }
 0x26e   : > { %v684_v23 = vmul.f32 %v3452_v41, %v4861_v18  ;;  %v3584_v62 = vsel %vm1188_vm1, 1.0, %v4189_v37  ;;  %vm1525_vm2 = vcmp.eq.s32.totalorder %v4889_v22, %v6565_v28  ;;  %v1038_v15 = vmul.f32 %v3518_v7, %v4876_v51 }
 0x26f   : > { %3217 = vmatpush.msra.mxu1 %v3145_v34  ;;  %v2097_v52 = vadd.f32 %v2033_v50, %v1756_v38  ;;  %v1387_v55 = vmul.f32 %v3584_v62, %v4880_v56  ;;  %v3649_v1 = vsel %vm1525_vm2, 1.0, %v4189_v37  ;;  %v3047_v35 = vmul.f32 %v3877_v25, %v4931_v3 }
 0x270   : > { %v1724_v11 = vmul.f32 %v3649_v1, %v4891_v24  ;;  %vm1866_vm3 = vcmp.eq.s32.totalorder %v4895_v36, %v6565_v28  ;;  %vm2203_vm4 = vcmp.eq.s32.totalorder %v4902_v30, %v6565_v28  ;;  %v1102_v22 = vadd.f32 %v1038_v15, %v684_v23 }
 0x271   : > { %v2434_v18 = vadd.f32 %v2370_v8, %v2097_v52  ;;  %v3714_v43 = vsel %vm1866_vm3, 1.0, %v4189_v37  ;;  %vm2543_vm8 = vcmp.eq.s32.totalorder %v4921_v13, %v6565_v28  ;;  %v3779_v51 = vsel %vm2203_vm4, 1.0, %v4189_v37 }
 0x272   : > { %v1451_v2 = vadd.f32 %v1387_v55, %v1102_v22  ;;  %v2065_v39 = vmul.f32 %v3714_v43, %v4900_v21  ;;  %vm2880_vm5 = vcmp.eq.s32.totalorder %v4929_v32, %v6565_v28  ;;  %v3844_v24 = vsel %vm2543_vm8, 1.0, %v4189_v37 }
 0x273   : > { %v2774_v56 = vadd.f32 %v2710_v12, %v2434_v18  ;;  %v2402_v10 = vmul.f32 %v3779_v51, %v4914_v53  ;;  %v3909_v54 = vsel %vm2880_vm5, 1.0, %v4189_v37  ;;  %v2742_v13 = vmul.f32 %v3844_v24, %v4927_v60 }
 0x274   : > { %v1788_v30 = vadd.f32 %v1724_v11, %v1451_v2  ;;  %v3079_v21 = vmul.f32 %v3909_v54, %v4931_v3  ;;  %vm3266_vm9 = vcmask 1043456  }
 0x275   : > { %v3111_v36 = vadd.f32 %v3047_v35, %v2774_v56 }
 0x276   : > { %v2129_v49 = vadd.f32 %v2065_v39, %v1788_v30 }
 0x277   : > { %3198 = vmatpush.msra.mxu0 %v3111_v36 }
 0x278   : > { %3199 = vmatmul.f32.vlgmr.msra.gmra.mxu0 %v6609_v58  ;;  %v2466_v48 = vadd.f32 %v2402_v10, %v2129_v49 }
 0x27a   : > { %v2806_v6 = vadd.f32 %v2742_v13, %v2466_v48 }
 0x27c   : > { %v3143_v45 = vadd.f32 %v3079_v21, %v2806_v6 }
 0x27e   : > { %3218 = vmatpush.msra.mxu1 %v3143_v45 }
 0x27f   : > { %3219 = vmatmul.f32.vlgmr.msra.gmra.mxu1 %v6653_v61 }
 0x2be   : > { %v3240_v32 = vpop.f32.mrf.mxu2 }
 0x2c7   : > { %v3260_v28 = vpop.f32.mrf.mxu3 }
 0x2c8   : > { %v3261_v9 = vadd.f32 %v3260_v28, %v3240_v32 }
 0x2ca   : > { %v3265_v27 = vrot.slane %v3261_v9, 4 }
 0x2f5   : > { %v3200_v53 = vpop.f32.mrf.mxu0 }
 0x2fc   : > { %v3220_v37 = vpop.f32.mrf.mxu1 }
 0x2fd   : > { %v3221_v63 = vadd.f32 %v3220_v37, %v3200_v53 }
 0x2ff   : > { %v3267_v60 = vsel %vm3266_vm9, %v3221_v63, %v3265_v27 }
 0x300   : > { %v3269_v57 = vadd.f32 %v3267_v60, %v3175_v0 }
 0x302   : > { %3270 = vst [vmem:[#allocation2] sm:$0xff] %v3269_v57 }
 0x303 PF: > { %p3941_p10 = scmp.ne.s32.totalorder %s4159_s25, 1 }
 0x305   : > { %3274 = sbr.rel (%p3941_p10) target bundleno = 780 (0x30c), region = 40 }
 0x30a   : > { %v3275_v3 = vld [vmem:[#allocation2] sm:$0xff] }
 0x30b   : > { %3276 = vst [vmem:[%s274_s9] sm:$0xff] %v3275_v3 }
 0x30c PF: > { %s3944_s29 = sshll.u32 %s4167_s26, 2  ;;  %s3293_s8 = sshll.u32 %s274_s9, 4  ;;  %s3294_s8 = int_to_ptr.vmem [resolvable:$true] %s3293_s8 }
 0x30d   : > { %s3289_s7 = sadd.s32 %s3944_s29, %s4308_s18  ;;  %s6967_s15 = sand.u32 1, %s4151_s24  }
 0x30e   : > { %s3945_s17 = sshll.u32 %s3289_s7, 2  ;;  %s3278_s20 = scalar_lea.sflag [#allocation7], %s6967_s15 }
 0x30f   : > { %s3291_s25 = scalar_lea.hbm %s6927_s4, %s3945_s17  ;;  %s4091_s19 = scalar_lea.hbm %s6927_s4, 32 }
 0x310   : > { %s3295_s14 = sshll.u32 %s3291_s25, 4  ;;  %s3296_s14 = int_to_ptr.hbm [resolvable:$true] %s3295_s14 }
 0x311   : > { %s4085_s21 = sshra.s32 %s3296_s14, 4  ;;  %s4086_s21 = int_to_ptr.hbm [resolvable:$true] %s4085_s21 }
 0x312   : > { %s4087_s5 = scalar_lea.hbm %s4086_s21, 8  ;;  %p4092_p0 = scmp.lt.s32.totalorder %s4086_s21, %s6927_s4 }
 0x313   : > { %p4088_p11 = scmp.ne.s32.totalorder %s4086_s21, %s4087_s5  ;;  %p4093_p1 = scmp.lt.s32.totalorder %s4091_s19, %s4087_s5 }
 0x315   : > { %p4089_p12 = pnand %p4088_p11, %p4283_p6  ;;  %p4094_p2 = por %p4093_p1, %p4092_p0 }
 0x317   : > { %p4090_p13 = pneg %p4089_p12 }
 0x319   : > { %p4095_p3 = pnand %p4094_p2, %p4090_p13 }
 0x31b   : > { %4098 = shalt.err (!%p4095_p3)
}
 0x31c   : > { %3955 = dma.vmem_to_hbm [thread:$0]  (%p4283_p6), %s3294_s8, 128, %s3296_s14, %s3278_s20  }
 0x31d PF: > { %p3961_p4 = scmp.ge.s32.totalorder %s4183_s30, 2  ;;  %s3307_s9 = sand.u32 1, %s4147_s23  }
 0x31e   : > { %s3308_s1 = scalar_lea.sflag [#allocation7], %s3307_s9 }
 0x31f   : > { %p3958_p5 = pnand %p3961_p4, %p4290_p7 }
 0x321   : > { %p3959_p8 = pneg %p3958_p5 }
 0x323   : > { %4142 = dma.done.wait (%p3959_p8), %s3308_s1, 128  }
 0x324   : > { %4144 = vsyncadd (%p3959_p8), %s3308_s1, 4294967168  ;;  %s30_s30 = sadd.s32 1, %s4183_s30   ;;  %s6968_s25 = sld [smem:[#allocation10_spill]] }
 0x325   : > { %p27_p9 = scmp.ge.s32.totalorder %s30_s30, 10   ;;  %s6969_s1 = sld [smem:[#allocation11_spill]] }
 0x326   : > { %s6970_s26 = sld [smem:[#allocation12_spill]]  ;;  %s6974_s23 = smov %s4151_s24 }
 0x327   : > { %s6971_s27 = sld [smem:[#allocation13_spill]]  ;;  %s6975_s24 = smov %s4155_s0 }
 0x328   : > { %s6972_s28 = sld [smem:[#allocation14_spill]]  ;;  %s6976_s0 = smov %s4304_s16 }
 0x329   : > { %s6973_s29 = sld [smem:[#allocation15_spill]]  ;;  %29 = sbr.rel (!%p27_p9) target bundleno = 13 (0xd), region = 78 }
 0x32e   :  { %3314 = vsyncpa [#allocation7], 1 }
 0x32f   :  { %3316 = vsyncpa [#allocation7 + $0x1], 1 }

</bundles_post_ra>
